<compile_context>
chip_gen: v6e
topology: v6e:2x2x1
jax: 0.10.0
libtpu: 0.0.40
codegen_flags: <defaults>
</compile_context>

<pallas_src>
import jax
import jax.numpy as jnp
from jax.experimental import pallas as pl
from jax.experimental.pallas import tpu as pltpu

# ----------------------------- config (synthetic cfg.*) -----------------------------
ANCHOR_RATIOS = (0.5, 1.0, 2.0)          # -> A = 3
A = len(ANCHOR_RATIOS)
NC_SCORE_OUT = 1 * A * 1                 # 3
NC_BBOX_OUT = 1 * A * 4                  # 12
MID_CH = 256                             # RPN_Conv output channels (fixed by module)
HEAD_PAD = 128                           # fused cls|box|prob output, padded to a full lane group
NMS_PRE = 200                            # cfg['TEST'].RPN_PRE_NMS_TOP_N (small, synthetic)


# ----------------------------- Pallas kernel -----------------------------
def _rpn_level_kernel(xp_ref, wconv_ref, bconv_ref, wheads_ref, bheads_ref, out_ref):
    """One batch element of one FPN level.

    xp_ref    : (1, H+2, W+2, Cin) f32   zero-padded NHWC input
    wconv_ref : (9*Cin, MID_CH)   bf16   im2col 3x3 conv weight (tap-major rows)
    bconv_ref : (1, MID_CH)       f32
    wheads_ref: (MID_CH, 128)     bf16   fused [cls(A) | bbox(4A) | zero-pad] 1x1 weights
    bheads_ref: (1, 128)          f32    fused bias (zero-padded)
    out_ref   : (1, HW, 128)      f32    lane-dense packed output:
                 [:, :, 0:A]            cls logits
                 [:, :, A:A+4A]         bbox deltas
                 [:, :, A+4A:A+4A+A]    sigmoid(cls)
                 [:, :, 18:]            zeros (padding)
    """
    Hp2, Wp2, Cin = xp_ref.shape[1], xp_ref.shape[2], xp_ref.shape[3]
    H, W = Hp2 - 2, Wp2 - 2
    HW = H * W

    xp = xp_ref[0]  # (H+2, W+2, Cin)

    # im2col: 3x3 / stride 1 / pad 1 conv  ==  one (HW, 9*Cin) x (9*Cin, 256) matmul.
    cols = []
    for dy in range(3):
        for dx in range(3):
            cols.append(xp[dy:dy + H, dx:dx + W, :].reshape(HW, Cin))
    patches = jnp.concatenate(cols, axis=-1).astype(jnp.bfloat16)      # (HW, 9*Cin)

    conv1 = jnp.dot(patches, wconv_ref[...],
                    preferred_element_type=jnp.float32)                # (HW, 256) f32
    conv1 = jnp.maximum(conv1 + bconv_ref[0], 0.0)                     # ReLU(RPN_Conv(x))

    # Fused 1x1 heads in a single MXU matmul (lane dim padded to 128).
    heads = jnp.dot(conv1.astype(jnp.bfloat16), wheads_ref[...],
                    preferred_element_type=jnp.float32) + bheads_ref[0]  # (HW, 128)

    n_cb = NC_SCORE_OUT + NC_BBOX_OUT                                  # 15
    prob = jax.nn.sigmoid(heads[:, :NC_SCORE_OUT])                     # sigmoid(cls)
    # pack [cls | box | prob | zeros] -> single unmasked 128-lane store
    out_ref[0] = jnp.concatenate(
        [heads[:, :n_cb], prob, heads[:, n_cb + NC_SCORE_OUT:]], axis=-1)


def rpn_level_pallas(x_nchw, params):
    """Run the RPN heads for one FPN level.  x_nchw: (B, Cin, H, W) float32."""
    B, Cin, H, W = x_nchw.shape
    wconv_r, bconv, wheads, bheads = params

    # NCHW -> NHWC + zero pad H/W by 1 (XLA fuses these into one pre-pass).
    xp = jnp.pad(jnp.transpose(x_nchw, (0, 2, 3, 1)),
                 ((0, 0), (1, 1), (1, 1), (0, 0)))
    HW = H * W

    out = pl.pallas_call(
        _rpn_level_kernel,
        out_shape=jax.ShapeDtypeStruct((B, HW, HEAD_PAD), jnp.float32),
        grid=(B,),
        in_specs=[
            pl.BlockSpec((1, H + 2, W + 2, Cin), lambda b: (b, 0, 0, 0)),
            pl.BlockSpec((9 * Cin, MID_CH), lambda b: (0, 0)),
            pl.BlockSpec((1, MID_CH), lambda b: (0, 0)),
            pl.BlockSpec((MID_CH, HEAD_PAD), lambda b: (0, 0)),
            pl.BlockSpec((1, HEAD_PAD), lambda b: (0, 0)),
        ],
        out_specs=pl.BlockSpec((1, HW, HEAD_PAD), lambda b: (b, 0, 0)),
        compiler_params=pltpu.CompilerParams(
            dimension_semantics=("parallel",)),
    )(xp, wconv_r, bconv, wheads, bheads)
    return out


# ----------------------------- forward glue (matches PyTorch semantics) -----------------------------
def rpn_fpn_forward(rpn_feature_maps, im_info, params, nms_pre=NMS_PRE):
    """Inference-mode (`self.training == False`) forward of _RPN_FPN."""
    batch_size = rpn_feature_maps[0].shape[0]

    rpn_cls_scores, rpn_cls_probs, rpn_bbox_preds = [], [], []
    rpn_shapes, rpn_rank_inds, level_ids = [], [], []

    for i, feat in enumerate(rpn_feature_maps):
        H, W = feat.shape[2], feat.shape[3]
        fused = rpn_level_pallas(feat, params)           # (B, HW, 128) packed

        rpn_shapes.append([H, W])

        # Kernel output is NHWC-flattened == permute(0,2,3,1).contiguous().view(...)
        cls = fused[:, :, :NC_SCORE_OUT].reshape(batch_size, -1, 1)
        box = fused[:, :, NC_SCORE_OUT:NC_SCORE_OUT + NC_BBOX_OUT].reshape(batch_size, -1, 4)
        prob = fused[:, :, NC_SCORE_OUT + NC_BBOX_OUT:
                     NC_SCORE_OUT + NC_BBOX_OUT + NC_SCORE_OUT].reshape(batch_size, -1, 1)
        N = cls.shape[1]

        if N > nms_pre:
            # torch quirk preserved: rank_inds.view(-1)[:nms_pre] == batch-0's
            # top-nms_pre indices, applied to every batch element.
            _, rank_inds = jax.lax.top_k(prob[0, :, 0], nms_pre)
            cls = jnp.take(cls, rank_inds, axis=1)
            box = jnp.take(box, rank_inds, axis=1)
            prob = jnp.take(prob, rank_inds, axis=1)
        else:
            # untruncated branch: full flattened descending sort indices (B*N,)
            rank_inds = jnp.argsort(-prob[:, :, 0], axis=1).reshape(-1)

        rpn_rank_inds.append(rank_inds)
        rpn_cls_scores.append(cls)
        rpn_cls_probs.append(prob)
        rpn_bbox_preds.append(box)
        level_ids.append(jnp.full((cls.shape[1],), i, dtype=jnp.int32))

    rpn_cls_score_alls = jnp.concatenate(rpn_cls_scores, axis=1)
    rpn_cls_prob_alls = jnp.concatenate(rpn_cls_probs, axis=1)
    rpn_bbox_pred_alls = jnp.concatenate(rpn_bbox_preds, axis=1)
    ids = jnp.concatenate(level_ids)

    # TODO(synk): _ProposalLayer_FPN is an external module (anchor gen + bbox
    # decode + NMS); rois is returned as the raw proposal-layer inputs.
    rois = (rpn_cls_prob_alls, rpn_bbox_pred_alls, im_info, rpn_shapes, rpn_rank_inds, ids)

    rpn_loss_cls = jnp.zeros((1,), jnp.float32)
    rpn_loss_box = jnp.zeros((1,), jnp.float32)
    rpn_loss_cls_neg = jnp.zeros((1,), jnp.float32)
    return rois, rpn_loss_cls, rpn_loss_box, rpn_loss_cls_neg, rpn_cls_score_alls


# ----------------------------- params -----------------------------
def init_params(key, din):
    ks = jax.random.split(key, 6)
    # RPN_Conv: Conv2d(din, 256, 3, 1, 1)  -> (9, Cin, 256), tap-major (dy*3+dx)
    wconv = jax.random.normal(ks[0], (9, din, MID_CH), jnp.float32) * 0.01
    bconv = jax.random.normal(ks[1], (1, MID_CH), jnp.float32) * 0.01
    # RPN_cls_score: Conv2d(256, A, 1)
    wcls = jax.random.normal(ks[2], (MID_CH, NC_SCORE_OUT), jnp.float32) * 0.01
    bcls = jax.random.normal(ks[3], (1, NC_SCORE_OUT), jnp.float32) * 0.01
    # RPN_bbox_pred: Conv2d(256, 4A, 1)
    wbox = jax.random.normal(ks[4], (MID_CH, NC_BBOX_OUT), jnp.float32) * 0.01
    bbox_b = jax.random.normal(ks[5], (1, NC_BBOX_OUT), jnp.float32) * 0.01

    # im2col conv weight: (9*Cin, 256), rows tap-major / Cin-inner, bf16 for the MXU.
    wconv_r = wconv.reshape(9 * din, MID_CH).astype(jnp.bfloat16)

    # fused, zero-padded head weight/bias: [cls | box | pad] -> 128 lanes.
    wheads = jnp.zeros((MID_CH, HEAD_PAD), jnp.float32)
    wheads = wheads.at[:, :NC_SCORE_OUT].set(wcls)
    wheads = wheads.at[:, NC_SCORE_OUT:NC_SCORE_OUT + NC_BBOX_OUT].set(wbox)
    wheads = wheads.astype(jnp.bfloat16)
    bheads = jnp.zeros((1, HEAD_PAD), jnp.float32)
    bheads = bheads.at[:, :NC_SCORE_OUT].set(bcls)
    bheads = bheads.at[:, NC_SCORE_OUT:NC_SCORE_OUT + NC_BBOX_OUT].set(bbox_b)

    return (wconv_r, bconv, wheads, bheads)


# ----------------------------- main -----------------------------
if __name__ == "__main__":
    key = jax.random.PRNGKey(0)
    k_feat2, k_feat3, k_par = jax.random.split(key, 3)

    B, DIN = 2, 16
    feat_p2 = jax.random.normal(k_feat2, (B, DIN, 16, 16), jnp.float32)   # NCHW
    feat_p3 = jax.random.normal(k_feat3, (B, DIN, 8, 8), jnp.float32)     # NCHW
    im_info = jnp.array([[128.0, 128.0, 1.0]] * B, jnp.float32)

    params = init_params(k_par, DIN)

    rois, loss_cls, loss_box, loss_cls_neg, cls_all = rpn_fpn_forward(
        [feat_p2, feat_p3], im_info, params)

    jax.block_until_ready(cls_all)
    jax.block_until_ready(rois[0])

    # light sanity checks on shapes
    n0 = min(16 * 16 * A, NMS_PRE)
    n1_raw = 8 * 8 * A
    n1 = n1_raw if n1_raw <= NMS_PRE else NMS_PRE
    assert cls_all.shape == (B, n0 + n1, 1), cls_all.shape
    assert rois[1].shape == (B, n0 + n1, 4), rois[1].shape

    print("KERNEL_OK")
</pallas_src>

<mosaic_0001>
module attributes {stable_mosaic.version = 11 : i64} {
  func.func @_rpn_level_kernel(%arg0: i32, %arg1: memref<1x18x18x16xf32, #tpu.memory_space<vmem>>, %arg2: memref<144x256xbf16, #tpu.memory_space<vmem>>, %arg3: memref<1x256xf32, #tpu.memory_space<vmem>>, %arg4: memref<256x128xbf16, #tpu.memory_space<vmem>>, %arg5: memref<1x128xf32, #tpu.memory_space<vmem>>, %arg6: memref<1x256x128xf32, #tpu.memory_space<vmem>>) attributes {dimension_semantics = [#tpu.dimension_semantics<parallel>], iteration_bounds = array<i64: 2>, scalar_prefetch = 0 : i64, scratch_operands = 0 : i64, tpu.core_type = #tpu.core_type<tc>, window_params = [{transform_indices = @transform_0, window_bounds = array<i64: 1, 18, 18, 16>}, {pipeline_mode = #tpu.pipeline_mode<synchronous>, transform_indices = @transform_1, window_bounds = array<i64: 144, 256>}, {pipeline_mode = #tpu.pipeline_mode<synchronous>, transform_indices = @transform_2, window_bounds = array<i64: 1, 256>}, {pipeline_mode = #tpu.pipeline_mode<synchronous>, transform_indices = @transform_3, window_bounds = array<i64: 256, 128>}, {pipeline_mode = #tpu.pipeline_mode<synchronous>, transform_indices = @transform_4, window_bounds = array<i64: 1, 128>}, {transform_indices = @transform_5, window_bounds = array<i64: 1, 256, 128>}]} {
    %c0 = arith.constant 0 : index
    %c0_0 = arith.constant 0 : index
    %c0_1 = arith.constant 0 : index
    %c0_2 = arith.constant 0 : index
    %0 = vector.load %arg1[%c0, %c0_0, %c0_1, %c0_2] : memref<1x18x18x16xf32, #tpu.memory_space<vmem>>, vector<1x18x18x16xf32>
    %1 = vector.shape_cast %0 : vector<1x18x18x16xf32> to vector<18x18x16xf32>
    %2 = vector.extract_strided_slice %1 {offsets = [0, 0, 0], sizes = [16, 16, 16], strides = [1, 1, 1]} : vector<18x18x16xf32> to vector<16x16x16xf32>
    %3 = vector.shape_cast %2 : vector<16x16x16xf32> to vector<256x16xf32>
    %4 = vector.extract_strided_slice %1 {offsets = [0, 1, 0], sizes = [16, 16, 16], strides = [1, 1, 1]} : vector<18x18x16xf32> to vector<16x16x16xf32>
    %5 = vector.shape_cast %4 : vector<16x16x16xf32> to vector<256x16xf32>
    %6 = vector.extract_strided_slice %1 {offsets = [0, 2, 0], sizes = [16, 16, 16], strides = [1, 1, 1]} : vector<18x18x16xf32> to vector<16x16x16xf32>
    %7 = vector.shape_cast %6 : vector<16x16x16xf32> to vector<256x16xf32>
    %8 = vector.extract_strided_slice %1 {offsets = [1, 0, 0], sizes = [16, 16, 16], strides = [1, 1, 1]} : vector<18x18x16xf32> to vector<16x16x16xf32>
    %9 = vector.shape_cast %8 : vector<16x16x16xf32> to vector<256x16xf32>
    %10 = vector.extract_strided_slice %1 {offsets = [1, 1, 0], sizes = [16, 16, 16], strides = [1, 1, 1]} : vector<18x18x16xf32> to vector<16x16x16xf32>
    %11 = vector.shape_cast %10 : vector<16x16x16xf32> to vector<256x16xf32>
    %12 = vector.extract_strided_slice %1 {offsets = [1, 2, 0], sizes = [16, 16, 16], strides = [1, 1, 1]} : vector<18x18x16xf32> to vector<16x16x16xf32>
    %13 = vector.shape_cast %12 : vector<16x16x16xf32> to vector<256x16xf32>
    %14 = vector.extract_strided_slice %1 {offsets = [2, 0, 0], sizes = [16, 16, 16], strides = [1, 1, 1]} : vector<18x18x16xf32> to vector<16x16x16xf32>
    %15 = vector.shape_cast %14 : vector<16x16x16xf32> to vector<256x16xf32>
    %16 = vector.extract_strided_slice %1 {offsets = [2, 1, 0], sizes = [16, 16, 16], strides = [1, 1, 1]} : vector<18x18x16xf32> to vector<16x16x16xf32>
    %17 = vector.shape_cast %16 : vector<16x16x16xf32> to vector<256x16xf32>
    %18 = vector.extract_strided_slice %1 {offsets = [2, 2, 0], sizes = [16, 16, 16], strides = [1, 1, 1]} : vector<18x18x16xf32> to vector<16x16x16xf32>
    %19 = vector.shape_cast %18 : vector<16x16x16xf32> to vector<256x16xf32>
    %20 = tpu.concatenate %3, %5, %7, %9, %11, %13, %15, %17, %19 in 1 : vector<256x16xf32>, vector<256x16xf32>, vector<256x16xf32>, vector<256x16xf32>, vector<256x16xf32>, vector<256x16xf32>, vector<256x16xf32>, vector<256x16xf32>, vector<256x16xf32> -> vector<256x144xf32>
    %21 = arith.truncf %20 : vector<256x144xf32> to vector<256x144xbf16>
    %c0_3 = arith.constant 0 : index
    %c0_4 = arith.constant 0 : index
    %22 = vector.load %arg2[%c0_3, %c0_4] : memref<144x256xbf16, #tpu.memory_space<vmem>>, vector<144x256xbf16>
    %cst = arith.constant dense<0.000000e+00> : vector<256x256xf32>
    %23 = tpu.matmul %21, %22, %cst {dimension_numbers = #tpu.dot_dimension_numbers<[1], [0], [0], [1], [0, 0, 1, 1], [], []>} : vector<256x144xbf16>, vector<144x256xbf16>, vector<256x256xf32> -> vector<256x256xf32>
    %c0_5 = arith.constant 0 : index
    %c0_6 = arith.constant 0 : index
    %24 = vector.load %arg3[%c0_5, %c0_6] : memref<1x256xf32, #tpu.memory_space<vmem>>, vector<1x256xf32>
    %25 = vector.shape_cast %24 : vector<1x256xf32> to vector<256xf32>
    %26 = vector.shape_cast %25 : vector<256xf32> to vector<1x256xf32>
    %27 = vector.broadcast %26 : vector<1x256xf32> to vector<256x256xf32>
    %28 = arith.addf %23, %27 : vector<256x256xf32>
    %cst_7 = arith.constant 0.000000e+00 : f32
    %29 = vector.broadcast %cst_7 : f32 to vector<256x256xf32>
    %30 = arith.maximumf %28, %29 : vector<256x256xf32>
    %31 = arith.truncf %30 : vector<256x256xf32> to vector<256x256xbf16>
    %c0_8 = arith.constant 0 : index
    %c0_9 = arith.constant 0 : index
    %32 = vector.load %arg4[%c0_8, %c0_9] : memref<256x128xbf16, #tpu.memory_space<vmem>>, vector<256x128xbf16>
    %cst_10 = arith.constant dense<0.000000e+00> : vector<256x128xf32>
    %33 = tpu.matmul %31, %32, %cst_10 {dimension_numbers = #tpu.dot_dimension_numbers<[1], [0], [0], [1], [0, 0, 1, 1], [], []>} : vector<256x256xbf16>, vector<256x128xbf16>, vector<256x128xf32> -> vector<256x128xf32>
    %c0_11 = arith.constant 0 : index
    %c0_12 = arith.constant 0 : index
    %34 = vector.load %arg5[%c0_11, %c0_12] : memref<1x128xf32, #tpu.memory_space<vmem>>, vector<1x128xf32>
    %35 = vector.shape_cast %34 : vector<1x128xf32> to vector<128xf32>
    %36 = vector.shape_cast %35 : vector<128xf32> to vector<1x128xf32>
    %37 = vector.broadcast %36 : vector<1x128xf32> to vector<256x128xf32>
    %38 = arith.addf %33, %37 : vector<256x128xf32>
    %39 = vector.extract_strided_slice %38 {offsets = [0, 0], sizes = [256, 3], strides = [1, 1]} : vector<256x128xf32> to vector<256x3xf32>
    %40 = arith.negf %39 : vector<256x3xf32>
    %41 = math.exp %40 : vector<256x3xf32>
    %cst_13 = arith.constant 1.000000e+00 : f32
    %42 = vector.broadcast %cst_13 : f32 to vector<256x3xf32>
    %43 = arith.addf %42, %41 : vector<256x3xf32>
    %44 = arith.divf %42, %43 : vector<256x3xf32>
    %45 = vector.extract_strided_slice %38 {offsets = [0, 0], sizes = [256, 15], strides = [1, 1]} : vector<256x128xf32> to vector<256x15xf32>
    %46 = vector.extract_strided_slice %38 {offsets = [0, 18], sizes = [256, 110], strides = [1, 1]} : vector<256x128xf32> to vector<256x110xf32>
    %47 = tpu.concatenate %45, %44, %46 in 1 : vector<256x15xf32>, vector<256x3xf32>, vector<256x110xf32> -> vector<256x128xf32>
    %c0_14 = arith.constant 0 : index
    %c0_15 = arith.constant 0 : index
    %c0_16 = arith.constant 0 : index
    %48 = vector.load %arg6[%c0_14, %c0_15, %c0_16] : memref<1x256x128xf32, #tpu.memory_space<vmem>>, vector<1x256x128xf32>
    %49 = vector.shape_cast %48 : vector<1x256x128xf32> to vector<256x128xf32>
    %50 = vector.shape_cast %47 : vector<256x128xf32> to vector<1x256x128xf32>
    tpu.vector_store %arg6[%c0_14, %c0_15, %c0_16], %50 {strides = array<i32>} : memref<1x256x128xf32, #tpu.memory_space<vmem>>, vector<1x256x128xf32>,
    return
  }
  func.func @transform_0(%arg0: i32) -> (i32, i32, i32, i32) {
    %c0_i32 = arith.constant 0 : i32
    %c0_i32_0 = arith.constant 0 : i32
    %c0_i32_1 = arith.constant 0 : i32
    %c0_i32_2 = arith.constant 0 : i32
    return %arg0, %c0_i32, %c0_i32_0, %c0_i32_1 : i32, i32, i32, i32
  }
  func.func @transform_1(%arg0: i32) -> (i32, i32) {
    %c0_i32 = arith.constant 0 : i32
    %c0_i32_0 = arith.constant 0 : i32
    %c0_i32_1 = arith.constant 0 : i32
    return %c0_i32, %c0_i32_0 : i32, i32
  }
  func.func @transform_2(%arg0: i32) -> (i32, i32) {
    %c0_i32 = arith.constant 0 : i32
    %c0_i32_0 = arith.constant 0 : i32
    %c0_i32_1 = arith.constant 0 : i32
    return %c0_i32, %c0_i32_0 : i32, i32
  }
  func.func @transform_3(%arg0: i32) -> (i32, i32) {
    %c0_i32 = arith.constant 0 : i32
    %c0_i32_0 = arith.constant 0 : i32
    %c0_i32_1 = arith.constant 0 : i32
    return %c0_i32, %c0_i32_0 : i32, i32
  }
  func.func @transform_4(%arg0: i32) -> (i32, i32) {
    %c0_i32 = arith.constant 0 : i32
    %c0_i32_0 = arith.constant 0 : i32
    %c0_i32_1 = arith.constant 0 : i32
    return %c0_i32, %c0_i32_0 : i32, i32
  }
  func.func @transform_5(%arg0: i32) -> (i32, i32, i32) {
    %c0_i32 = arith.constant 0 : i32
    %c0_i32_0 = arith.constant 0 : i32
    %c0_i32_1 = arith.constant 0 : i32
    return %arg0, %c0_i32, %c0_i32_0 : i32, i32, i32
  }
}

</mosaic_0001>

<bundles_post_ra>
// kernel: tpu_custom_call.1
= control target key start
LH: loop header
LB: loop body
LE: loop exit
PB: predicated region body
PF: predicated region fallthrough
CT: control target
= control target key end

     0   :  { %10 = vsyncpa [#allocation3], 0  ;;  %s5310_s0 = inlined_call_operand.vmem [shape: f32[2,18,18,16], index: 0, kind: input, shape index: {}]   ;;  %s5311_s1 = inlined_call_operand.vmem [shape: bf16[144,256], index: 1, kind: input, shape index: {}]   ;;  %s5312_s2 = inlined_call_operand.vmem [shape: f32[1,256], index: 2, kind: input, shape index: {}]   ;;  %s5313_s3 = inlined_call_operand.vmem [shape: bf16[256,128], index: 3, kind: input, shape index: {}]   ;;  %s5314_s4 = inlined_call_operand.vmem [shape: f32[1,128], index: 4, kind: input, shape index: {}]   ;;  %s5315_s5 = inlined_call_operand.hbm [shape: f32[2,256,128], index: 5, kind: output, shape index: {}]  }
   0x1   :  { %12 = vsyncpa [#allocation3 + $0x1], 0  ;;  %s3841_s18 = smov 0   ;;  %s3843_s19 = smov 0  }
   0x2   :  { %s3845_s20 = smov 0   ;;  %s3847_s21 = smov 0  }
   0x3 LB: > { %s3862_s22 = sadd.s32 4294967295, %s3798_s21   ;;  %s2728_s23 = sadd.s32 4294967294, %s3798_s21   ;;  %s3798_s21 = sphi %s3847_s21, %s5321_s21   ;;  %s3794_s20 = sphi %s3845_s20, %s5320_s20   ;;  %s3790_s19 = sphi %s3843_s19, %s5319_s19   ;;  %s3786_s18 = sphi %s3841_s18, %s5318_s18  }
   0x4   : > { %s3866_s24 = sadd.s32 1, %s3798_s21   ;;  %s135_s25 = sadd.s32 1, %s3794_s20 }
   0x5   : > { %s132_s26 = ssub.s32 %s3798_s21, %s3866_s24  ;;  %p145_p0 = scmp.ne.s32.totalorder %s3794_s20, %s3790_s19 }
   0x6   : > { %p133_p1 = scmp.eq.s32.totalorder %s132_s26, 0  ;;  %p146_p2 = scmp.eq.s32.totalorder %s3862_s22, 1 }
   0x7   : > { %p151_p3 = scmp.ne.s32.totalorder %s3790_s19, %s3786_s18  ;;  %p152_p4 = scmp.eq.s32.totalorder %s2728_s23, 1 }
   0x8   : > { %s3877_s27 = scalar_select %p133_p1, %s3794_s20, %s135_s25  }
   0x9   : > { %p3879_p5 = por %p146_p2, %p145_p0  ;;  %p3883_p6 = por %p152_p4, %p151_p3 }
   0xa   : > { %p2731_p7 = scmp.ge.s32.totalorder %s3798_s21, 1  ;;  %p190_p8 = scmp.lt.s32.totalorder %s3798_s21, 3 }
   0xc   : > { %p191_p9 = pnand %p2731_p7, %p190_p8 }
   0xd   : > { %p218_p10 = scmp.lt.s32.totalorder (!%p191_p9), %s3862_s22, 1  ;;  %s3800_s8 = smov (!%p191_p9), 48  }
   0xe   : > { %194 = sbr.rel (%p191_p9) target bundleno = 944 (0x3b0), region = 40  ;;  %s3801_s11 = smov (!%p191_p9), 16  }
   0xf   : > { %s3803_s13 = smov (!%p191_p9), 32   ;;  %s3804_s14 = smov (!%p191_p9), 64  }
  0x10   : > { %s3805_s6 = smov (!%p191_p9), 80   ;;  %s3806_s16 = smov (!%p191_p9), 112  }
  0x11   : > { %s2822_s26 = sshll.u32 (!%p191_p9), %s3862_s22, 12  ;;  %s3808_s17 = smov (!%p191_p9), [#allocation2]  }
  0x12   : > { %s5259_s10 = scalar_lea.hbm (!%p191_p9), %s5315_s5, %s2822_s26  ;;  %s3742_s23 = sshll.u32 (!%p191_p9), %s3808_s17, 4  ;;  %s3743_s23 = int_to_ptr.vmem [resolvable:$false] %s3742_s23 }
  0x13   : > { %v3545_v0 = vld [vmem:[%s5311_s1 + $0x74] ss:$8 sps:$4 sm:$0xff]   ;;  %v3547_v1 = vld [vmem:[%s5311_s1 + $0x70] ss:$8 sps:$4 sm:$0xff]   ;;  %s219_s9 = scalar_select %p218_p10, %s3862_s22, 1  ;;  %vm326_vm0 = vcmask 1046528  }
  0x14   : > { %v3548_v2 = vld [vmem:[%s5311_s1 + $0x64] ss:$8 sps:$4 sm:$0xff]   ;;  %1649 = vmatprep.subr.bf16.mxu0 %v3545_v0  ;;  %v3550_v3 = vld [vmem:[%s5311_s1 + $0x60] ss:$8 sps:$4 sm:$0xff]   ;;  %v3551_v4 = vld [vmem:[%s5311_s1 + $0x54] ss:$8 sps:$4 sm:$0xff]  }
  0x15   : > { %s2935_s12 = smul.u32 432, %s219_s9  ;;  %1650 = vmatpush1.bf16.msra.mxu0 %v3547_v1  ;;  %v3553_v5 = vld [vmem:[%s5311_s1 + $0x50] ss:$8 sps:$4 sm:$0xff]   ;;  %vm407_vm1 = vcmask 1045504   ;;  %v3554_v9 = vld [vmem:[%s5311_s1 + $0x44] ss:$8 sps:$4 sm:$0xff]  }
  0x16   : > { %1651 = vmatprep.subr.bf16.mxu0 %v3548_v2  ;;  %v3556_v34 = vld [vmem:[%s5311_s1 + $0x40] ss:$8 sps:$4 sm:$0xff]   ;;  %v3557_v53 = vld [vmem:[%s5311_s1 + $0x34] ss:$8 sps:$4 sm:$0xff]   ;;  %v3559_v54 = vld [vmem:[%s5311_s1 + $0x30] ss:$8 sps:$4 sm:$0xff]  }
  0x17   : > { %s3909_s25 = scalar_lea.vmem %s5310_s0, %s2935_s12  ;;  %s3802_s12 = smov 96   ;;  %v3560_v56 = vld [vmem:[%s5311_s1 + $0x24] ss:$8 sps:$4 sm:$0xff]   ;;  %v3562_v63 = vld [vmem:[%s5311_s1 + $0x20] ss:$8 sps:$4 sm:$0xff]   ;;  %vm1218_vm2 = vcmask 130048  }
  0x18   : > { %v3915_v6 = vld [vmem:[%s3909_s25 + $0x18] sm:$0xff]  ;;  %v3918_v7 = vld [vmem:[%s3909_s25 + $0x20] sm:$0xff]  ;;  %v3929_v11 = vld [vmem:[%s3909_s25 + $0x8] sm:$0xff]  ;;  %vm1251_vm3 = vcmask 261120   ;;  %vm1284_vm4 = vcmask 392192   ;;  %vm1317_vm5 = vcmask 523264  }
  0x19   : > { %v3921_v8 = vld [vmem:[%s3909_s25] sm:$0xff]  ;;  %v2985_v10 = vpack.i.bf16 %v3918_v7, %v3915_v6  ;;  %v226_v12 = vld [vmem:[%s3909_s25 + $0x10] sm:$0x3]  ;;  %1652 = vmatpush1.bf16.msra.mxu0 %v3550_v3  ;;  %v328_v16 = vrot.slane %v3929_v11, 1  ;;  %v3939_v19 = vld [vmem:[%s3909_s25 + $0x38] sm:$0xff]  ;;  %v409_v20 = vrot.slane %v3929_v11, 2 }
  0x1a   : > { %v327_v13 = vrot.slane %v3921_v8, 1  ;;  %v3934_v14 = vld [vmem:[%s3909_s25 + $0x30] sm:$0xff]  ;;  %v408_v15 = vrot.slane %v3921_v8, 2  ;;  %v330_v17 = vrot.slane %v226_v12, 1  ;;  %v411_v18 = vrot.slane %v226_v12, 2  ;;  %1653 = vmatprep.subr.bf16.mxu0 %v3551_v4  ;;  %v3967_v45 = vld [vmem:[%s3909_s25 + $0x48] sm:$0xff] }
  0x1b   : > { %2986 = vrot.lane.b32.xlu1 %v2985_v10, %s3800_s8  ;;  %v2990_v21 = vpack.i.bf16 %v3939_v19, %v3934_v14  ;;  %v229_v22 = vld [vmem:[%s3909_s25 + $0x28] sm:$0x3]  ;;  %v332_v23 = vrot.slane %v3915_v6, 1  ;;  %v333_v24 = vrot.slane %v3918_v7, 1  ;;  %v413_v25 = vrot.slane %v3915_v6, 2  ;;  %v3974_v49 = vld [vmem:[%s3909_s25 + $0x50] sm:$0xff] }
  0x1c   : > { %v329_v26 = vsel %vm326_vm0, %v327_v13, %v328_v16  ;;  %v331_v27 = vsel %vm326_vm0, %v328_v16, %v330_v17  ;;  %v410_v28 = vsel %vm407_vm1, %v408_v15, %v409_v20  ;;  %v412_v29 = vsel %vm407_vm1, %v409_v20, %v411_v18  ;;  %v232_v33 = vld [vmem:[%s3909_s25 + $0x40] sm:$0x3]  ;;  %v235_v55 = vld [vmem:[%s3909_s25 + $0x58] sm:$0x3]  ;;  %v3563_v0 = vld [vmem:[%s5311_s1 + $0x14] ss:$8 sps:$4 sm:$0xff]  }
  0x1d   : > { %v2995_v30 = vpack.i.bf16 %v331_v27, %v329_v26  ;;  %v334_v31 = vsel %vm326_vm0, %v332_v23, %v333_v24  ;;  %v335_v32 = vrot.slane %v229_v22, 1  ;;  %1654 = vmatpush1.bf16.msra.mxu0 %v3553_v5  ;;  %v414_v35 = vrot.slane %v3918_v7, 2  ;;  %v3565_v4 = vld [vmem:[%s5311_s1 + $0x10] ss:$8 sps:$4 sm:$0xff]   ;;  %v3566_v5 = vld [vmem:[%s5311_s1 + $0x4] ss:$8 sps:$4 sm:$0xff]  }
  0x1e   : > { %v416_v36 = vrot.slane %v229_v22, 2  ;;  %1655 = vmatprep.subr.bf16.mxu0 %v3554_v9  ;;  %v3000_v37 = vpack.i.bf16 %v412_v29, %v410_v28  ;;  %v337_v39 = vrot.slane %v3934_v14, 1  ;;  %v338_v40 = vrot.slane %v3939_v19, 1  ;;  %v3568_v10 = vld [vmem:[%s5311_s1] ss:$8 sps:$4 sm:$0xff]  }
  0x1f   : > { %2996 = vrot.lane.b32.xlu0 %v2995_v30, %s3801_s11  ;;  %2991 = vrot.lane.b32.xlu1 %v2990_v21, %s3802_s12  ;;  %v336_v38 = vsel %vm326_vm0, %v333_v24, %v335_v32  ;;  %v415_v42 = vsel %vm407_vm1, %v413_v25, %v414_v35  ;;  %v340_v44 = vrot.slane %v232_v33, 1  ;;  %v418_v47 = vrot.slane %v3934_v14, 2  ;;  %v3569_v12 = vld [vmem:[%s5311_s1 + $0x84] ss:$8 sps:$4 sm:$0xff]   ;;  %v3571_v15 = vld [vmem:[%s5311_s1 + $0x80] ss:$8 sps:$4 sm:$0xff]  }
  0x20   : > { %v3005_v41 = vpack.i.bf16 %v336_v38, %v334_v31  ;;  %v417_v43 = vsel %vm407_vm1, %v414_v35, %v416_v36  ;;  %v419_v48 = vrot.slane %v3939_v19, 2  ;;  %v339_v50 = vsel %vm326_vm0, %v337_v39, %v338_v40  ;;  %v4032_v16 = vld [vmem:[%s3909_s25 + $0x60] sm:$0xff]  ;;  %v238_v17 = vld [vmem:[%s3909_s25 + $0x70] sm:$0x3]  ;;  %v4040_v22 = vld [vmem:[%s3909_s25 + $0x68] sm:$0xff] }
  0x21   : > { %1656 = vmatpush1.bf16.msra.mxu0 %v3556_v34  ;;  %v3010_v46 = vpack.i.bf16 %v417_v43, %v415_v42  ;;  %v341_v51 = vsel %vm326_vm0, %v338_v40, %v340_v44  ;;  %v421_v52 = vrot.slane %v232_v33, 2  ;;  %v342_v58 = vrot.slane %v3967_v45, 1  ;;  %v239_v35 = vld [vmem:[%s3909_s25 + $0x78] sm:$0xff]  ;;  %v240_v36 = vld [vmem:[%s3909_s25 + $0x80] sm:$0xff] }
  0x22   : > { %1657 = vmatprep.subr.bf16.mxu0 %v3557_v53  ;;  %v3015_v57 = vpack.i.bf16 %v341_v51, %v339_v50  ;;  %v3992_v59 = vsel %vm407_vm1, %v418_v47, %v419_v48  ;;  %v343_v61 = vrot.slane %v3974_v49, 1  ;;  %v345_v62 = vrot.slane %v235_v55, 1 }
  0x23   : > { %3001 = vrot.lane.b32.xlu0 %v3000_v37, %s3803_s13  ;;  %3006 = vrot.lane.b32.xlu1 %v3005_v41, %s3804_s14  ;;  %v3995_v60 = vsel %vm407_vm1, %v419_v48, %v421_v52  ;;  %v3045_v13 = vpack.i.bf16 %v3974_v49, %v3967_v45  ;;  %v423_v18 = vrot.slane %v3967_v45, 2  ;;  %v424_v20 = vrot.slane %v3974_v49, 2  ;;  %v241_v37 = vld [vmem:[%s3909_s25 + $0x88] sm:$0x3] }
  0x24   : > { %v3040_v1 = vpack.i.bf16 %v3995_v60, %v3992_v59  ;;  %v344_v2 = vsel %vm326_vm0, %v342_v58, %v343_v61  ;;  %v346_v3 = vsel %vm326_vm0, %v343_v61, %v345_v62  ;;  %v347_v23 = vrot.slane %v4032_v16, 1  ;;  %v244_v61 = vld [vmem:[%s3909_s25 + $0xa0] sm:$0x3] }
  0x25   : > { %1658 = vmatpush1.bf16.msra.mxu0 %v3559_v54  ;;  %v3050_v9 = vpack.i.bf16 %v346_v3, %v344_v2  ;;  %v3080_v24 = vpack.i.bf16 %v4040_v22, %v4032_v16  ;;  %v348_v25 = vrot.slane %v4040_v22, 1  ;;  %v350_v26 = vrot.slane %v238_v17, 1 }
  0x26   : > { %1659 = vmatprep.subr.bf16.mxu0 %v3560_v56  ;;  %v4049_v27 = vsel %vm407_vm1, %v423_v18, %v424_v20  ;;  %v428_v30 = vrot.slane %v4032_v16, 2  ;;  %v429_v31 = vrot.slane %v4040_v22, 2  ;;  %v431_v34 = vrot.slane %v238_v17, 2  ;;  %v245_v18 = vld [vmem:[%s3909_s25 + $0xa8] sm:$0xff] }
  0x27   : > { %3011 = vrot.lane.b32.xlu0 %v3010_v46, %s3805_s6  ;;  %3021 = vrot.lane.b32.xlu1 %v3005_v41, %s3801_s11  ;;  %v349_v32 = vsel %vm326_vm0, %v347_v23, %v348_v25  ;;  %v351_v33 = vsel %vm326_vm0, %v348_v25, %v350_v26  ;;  %v352_v40 = vrot.slane %v239_v35, 1  ;;  %v353_v42 = vrot.slane %v240_v36, 1 }
  0x28   : > { %v3085_v38 = vpack.i.bf16 %v351_v33, %v349_v32  ;;  %v4068_v39 = vsel %vm407_vm1, %v428_v30, %v429_v31  ;;  %v4071_v41 = vsel %vm407_vm1, %v429_v31, %v431_v34  ;;  %v355_v43 = vrot.slane %v241_v37, 1 }
  0x29   : > { %1660 = vmatpush1.bf16.msra.mxu0 %v3562_v63  ;;  %v1450_v44 = vpack.c.bf16 %v3995_v60, %v3992_v59  ;;  %v354_v47 = vsel %vm326_vm0, %v352_v40, %v353_v42  ;;  %v1454_v52 = vpack.c.bf16 %v4071_v41, %v4068_v39  ;;  %v433_v53 = vrot.slane %v239_v35, 2  ;;  %v242_v59 = vld [vmem:[%s3909_s25 + $0x90] sm:$0xff]  ;;  %v243_v60 = vld [vmem:[%s3909_s25 + $0x98] sm:$0xff] }
  0x2a   : > { %1661 = vmatprep.subr.bf16.mxu0 %v3563_v0  ;;  %v356_v48 = vsel %vm326_vm0, %v353_v42, %v355_v43  ;;  %v434_v54 = vrot.slane %v240_v36, 2  ;;  %v3115_v56 = vpack.i.bf16 %v240_v36, %v239_v35  ;;  %v438_v63 = vrot.slane %v242_v59, 2  ;;  %v248_v42 = vld [vmem:[%s3909_s25 + $0xc0] sm:$0xff]  ;;  %v249_v43 = vld [vmem:[%s3909_s25 + $0xc8] sm:$0xff] }
  0x2b   : > { %3016 = vrot.lane.b32.xlu0 %v3015_v57, %s3806_s16  ;;  %3031 = vrot.lane.b32.xlu1 %v2990_v21, %s3800_s8  ;;  %v426_v21 = vrot.slane %v235_v55, 2  ;;  %v3120_v51 = vpack.i.bf16 %v356_v48, %v354_v47  ;;  %v436_v55 = vrot.slane %v241_v37, 2  ;;  %v439_v0 = vrot.slane %v243_v60, 2 }
  0x2c   : > { %2752 = vmatprep.mubr.msk.bf16.mxu0 %vm1218_vm2, %v1450_v44  ;;  %v3150_v2 = vpack.i.bf16 %v243_v60, %v242_v59  ;;  %v250_v44 = vld [vmem:[%s3909_s25 + $0xd0] sm:$0x3]  ;;  %v449_v47 = vrot.slane %v249_v43, 2  ;;  %vm1350_vm6 = vcmask 654336   ;;  %vm1383_vm7 = vcmask 785408  }
  0x2d   : > { %1662 = vmatpush1.bf16.msra.mxu0 %v3565_v4  ;;  %v4052_v28 = vsel %vm407_vm1, %v424_v20, %v426_v21  ;;  %v4094_v58 = vsel %vm407_vm1, %v434_v54, %v436_v55  ;;  %v4106_v3 = vsel %vm407_vm1, %v438_v63, %v439_v0  ;;  %v246_v20 = vld [vmem:[%s3909_s25 + $0xb0] sm:$0xff]  ;;  %v247_v21 = vld [vmem:[%s3909_s25 + $0xb8] sm:$0x3]  ;;  %v451_v48 = vrot.slane %v250_v44, 2 }
  0x2e   : > { %1663 = vmatprep.subr.bf16.mxu0 %v3566_v5  ;;  %v3075_v29 = vpack.i.bf16 %v4052_v28, %v4049_v27  ;;  %v1452_v50 = vpack.c.bf16 %v4052_v28, %v4049_v27  ;;  %v357_v5 = vrot.slane %v242_v59, 1  ;;  %v363_v25 = vrot.slane %v246_v20, 1 }
  0x2f   : > { %3026 = vrot.lane.b32.xlu0 %v3010_v46, %s3803_s13  ;;  %3041 = vrot.lane.b32.xlu1 %v3040_v1, %s3805_s6  ;;  %v3110_v46 = vpack.i.bf16 %v4071_v41, %v4068_v39  ;;  %v365_v26 = vrot.slane %v247_v21, 1  ;;  %v444_v30 = vrot.slane %v246_v20, 2  ;;  %v446_v31 = vrot.slane %v247_v21, 2 }
  0x30   : > { %v3185_v40 = vpack.i.bf16 %v246_v20, %v245_v18  ;;  %v367_v55 = vrot.slane %v248_v42, 1  ;;  %v370_v59 = vrot.slane %v250_v44, 1  ;;  %vm1416_vm8 = vcmask 916480  }
  0x31   : > { %1664 = vmatpush1.bf16.msra.mxu0 %v3568_v10  ;;  %v360_v10 = vrot.slane %v244_v61, 1  ;;  %v366_v34 = vsel %vm326_vm0, %v363_v25, %v365_v26  ;;  %v4134_v36 = vsel %vm407_vm1, %v444_v30, %v446_v31  ;;  %vm2554_vm9 = vcmask 121856  }
  0x32   : > { %1679 = vmatprep.subr.bf16.mxu0 %v3569_v12  ;;  %vm2587_vm10 = vcmask 146432  }
  0x33   : > { %3036 = vrot.lane.b32.xlu0 %v3015_v57, %s3804_s14  ;;  %3051 = vrot.lane.b32.xlu1 %v3050_v9, %s3806_s16 }
  0x35   : > { %1680 = vmatpush2.bf16.msra.mxu0 %v3571_v15 }
  0x37   : > { %3046 = vrot.lane.b32.xlu0 %v3045_v13, %s3802_s12  ;;  %3061 = vrot.lane.b32.xlu1 %v3040_v1, %s3803_s13  ;;  %v441_v1 = vrot.slane %v244_v61, 2 }
  0x39   : > { %v4109_v4 = vsel %vm407_vm1, %v439_v0, %v441_v1  ;;  %v251_v1 = vld [vmem:[%s3909_s25 + $0xd8] sm:$0xff] }
  0x3a   : > { %v1458_v12 = vpack.c.bf16 %v4109_v4, %v4106_v3  ;;  %v3180_v32 = vpack.i.bf16 %v4109_v4, %v4106_v3  ;;  %v3572_v4 = vld [vmem:[%s5313_s3 + $0x78] sm:$0xff]  }
  0x3b   : > { %3056 = vrot.lane.b32.xlu0 %v3015_v57, %s3801_s11  ;;  %3071 = vrot.lane.b32.xlu1 %v3050_v9, %s3804_s14  ;;  %v4091_v57 = vsel %vm407_vm1, %v433_v53, %v434_v54  ;;  %v4153_v54 = vsel %vm407_vm1, %v449_v47, %v451_v48 }
  0x3c   : > { %v1456_v62 = vpack.c.bf16 %v4094_v58, %v4091_v57  ;;  %2823 = vmatprep.subr.bf16.mxu1 %v3572_v4  ;;  %v3716_v4 = vld [vmem:[%s3909_s25 + $0x80] sm:$0xff] }
  0x3f   : > { %3066 = vrot.lane.b32.xlu0 %v3045_v13, %s3800_s8  ;;  %3081 = vrot.lane.b32.xlu1 %v3080_v24, %s3802_s12  ;;  %v3145_v13 = vpack.i.bf16 %v4094_v58, %v4091_v57 }
  0x43   : > { %3076 = vrot.lane.b32.xlu0 %v3075_v29, %s3805_s6  ;;  %3091 = vrot.lane.b32.xlu1 %v3050_v9, %s3801_s11  ;;  %v358_v9 = vrot.slane %v243_v60, 1 }
  0x45   : > { %v359_v15 = vsel %vm326_vm0, %v357_v5, %v358_v9  ;;  %v361_v17 = vsel %vm326_vm0, %v358_v9, %v360_v10  ;;  %v253_v5 = vld [vmem:[%s3909_s25 + $0xe8] sm:$0x3]  ;;  %v372_v10 = vrot.slane %v251_v1, 1 }
  0x46   : > { %v3155_v23 = vpack.i.bf16 %v361_v17, %v359_v15  ;;  %v375_v15 = vrot.slane %v253_v5, 1  ;;  %v453_v17 = vrot.slane %v251_v1, 2  ;;  %v456_v20 = vrot.slane %v253_v5, 2 }
  0x47   : > { %3086 = vrot.lane.b32.xlu0 %v3085_v38, %s3806_s16  ;;  %3101 = vrot.lane.b32.xlu1 %v3080_v24, %s3800_s8  ;;  %v362_v24 = vrot.slane %v245_v18, 1 }
  0x49   : > { %v364_v33 = vsel %vm326_vm0, %v362_v24, %v363_v25 }
  0x4b   : > { %3096 = vrot.lane.b32.xlu0 %v3075_v29, %s3803_s13  ;;  %3111 = vrot.lane.b32.xlu1 %v3110_v46, %s3805_s6  ;;  %v443_v29 = vrot.slane %v245_v18, 2 }
  0x4d   : > { %v4131_v35 = vsel %vm407_vm1, %v443_v29, %v444_v30 }
  0x4e   : > { %v1460_v37 = vpack.c.bf16 %v4134_v36, %v4131_v35  ;;  %v3215_v61 = vpack.i.bf16 %v4134_v36, %v4131_v35  ;;  %v4547_v36 = vld [vmem:[%s3909_s25 + $0x190] sm:$0x3] }
  0x4f   : > { %3106 = vrot.lane.b32.xlu0 %v3085_v38, %s3804_s14  ;;  %3121 = vrot.lane.b32.xlu1 %v3120_v51, %s3806_s16 }
  0x53   : > { %3116 = vrot.lane.b32.xlu0 %v3115_v56, %s3802_s12  ;;  %3131 = vrot.lane.b32.xlu1 %v3110_v46, %s3803_s13  ;;  %v448_v46 = vrot.slane %v248_v42, 2 }
  0x55   : > { %v4150_v53 = vsel %vm407_vm1, %v448_v46, %v449_v47 }
  0x56   : > { %v1462_v60 = vpack.c.bf16 %v4153_v54, %v4150_v53  ;;  %v3250_v21 = vpack.i.bf16 %v4153_v54, %v4150_v53  ;;  %v3586_v54 = vld [vmem:[%s5313_s3 + $0x40] sm:$0xff]  }
  0x57   : > { %3126 = vrot.lane.b32.xlu0 %v3085_v38, %s3801_s11  ;;  %3141 = vrot.lane.b32.xlu1 %v3120_v51, %s3804_s14  ;;  %v3190_v38 = vpack.i.bf16 %v366_v34, %v364_v33  ;;  %v255_v33 = vld [vmem:[%s3909_s25 + $0xf8] sm:$0xff]  ;;  %v256_v34 = vld [vmem:[%s3909_s25 + $0x100] sm:$0x3] }
  0x5b   : > { %3136 = vrot.lane.b32.xlu0 %v3115_v56, %s3800_s8  ;;  %3151 = vrot.lane.b32.xlu1 %v3150_v2, %s3802_s12  ;;  %v368_v56 = vrot.slane %v249_v43, 1 }
  0x5d   : > { %v369_v63 = vsel %vm326_vm0, %v367_v55, %v368_v56  ;;  %v371_v0 = vsel %vm326_vm0, %v368_v56, %v370_v59  ;;  %v4198_v55 = vld [vmem:[%s3909_s25 + $0x108] sm:$0xff] }
  0x5e   : > { %v3225_v9 = vpack.i.bf16 %v371_v0, %v369_v63  ;;  %v459_v0 = vrot.slane %v255_v33, 2 }
  0x5f   : > { %3146 = vrot.lane.b32.xlu0 %v3145_v13, %s3805_s6  ;;  %3161 = vrot.lane.b32.xlu1 %v3120_v51, %s3801_s11  ;;  %v3220_v51 = vpack.i.bf16 %v249_v43, %v248_v42  ;;  %v378_v42 = vrot.slane %v255_v33, 1  ;;  %v380_v43 = vrot.slane %v256_v34, 1 }
  0x63   : > { %3156 = vrot.lane.b32.xlu0 %v3155_v23, %s3806_s16  ;;  %3171 = vrot.lane.b32.xlu1 %v3150_v2, %s3800_s8  ;;  %v252_v2 = vld [vmem:[%s3909_s25 + $0xe0] sm:$0xff] }
  0x64   : > { %v454_v18 = vrot.slane %v252_v2, 2  ;;  %v3255_v31 = vpack.i.bf16 %v252_v2, %v251_v1  ;;  %v461_v1 = vrot.slane %v256_v34, 2 }
  0x66   : > { %v4175_v25 = vsel %vm407_vm1, %v453_v17, %v454_v18  ;;  %v4178_v26 = vsel %vm407_vm1, %v454_v18, %v456_v20  ;;  %v4208_v20 = vld [vmem:[%s3909_s25 + $0x110] sm:$0xff] }
  0x67   : > { %3166 = vrot.lane.b32.xlu0 %v3145_v13, %s3803_s13  ;;  %3181 = vrot.lane.b32.xlu1 %v3180_v32, %s3805_s6  ;;  %v373_v13 = vrot.slane %v252_v2, 1  ;;  %v1464_v29 = vpack.c.bf16 %v4178_v26, %v4175_v25 }
  0x69   : > { %v376_v24 = vsel %vm326_vm0, %v373_v13, %v375_v15 }
  0x6b   : > { %3176 = vrot.lane.b32.xlu0 %v3155_v23, %s3804_s14  ;;  %3191 = vrot.lane.b32.xlu1 %v3190_v38, %s3806_s16 }
  0x6f   : > { %3186 = vrot.lane.b32.xlu0 %v3185_v40, %s3802_s12  ;;  %3201 = vrot.lane.b32.xlu1 %v3180_v32, %s3803_s13  ;;  %v254_v32 = vld [vmem:[%s3909_s25 + $0xf0] sm:$0xff] }
  0x70   : > { %v3290_v44 = vpack.i.bf16 %v255_v33, %v254_v32  ;;  %v458_v63 = vrot.slane %v254_v32, 2 }
  0x73   : > { %3196 = vrot.lane.b32.xlu0 %v3155_v23, %s3801_s11  ;;  %3211 = vrot.lane.b32.xlu1 %v3190_v38, %s3804_s14  ;;  %v374_v23 = vsel %vm326_vm0, %v372_v10, %v373_v13  ;;  %v382_v10 = vrot.slane %v4198_v55, 1 }
  0x74   : > { %v3260_v30 = vpack.i.bf16 %v376_v24, %v374_v23 }
  0x77   : > { %3206 = vrot.lane.b32.xlu0 %v3185_v40, %s3800_s8  ;;  %3221 = vrot.lane.b32.xlu1 %v3220_v51, %s3802_s12  ;;  %v377_v40 = vrot.slane %v254_v32, 1 }
  0x79   : > { %v379_v48 = vsel %vm326_vm0, %v377_v40, %v378_v42  ;;  %v4222_v40 = vsel %vm407_vm1, %v458_v63, %v459_v0 }
  0x7b   : > { %3216 = vrot.lane.b32.xlu0 %v3215_v61, %s3805_s6  ;;  %3231 = vrot.lane.b32.xlu1 %v3190_v38, %s3801_s11 }
  0x7f   : > { %3226 = vrot.lane.b32.xlu0 %v3225_v9, %s3806_s16  ;;  %3241 = vrot.lane.b32.xlu1 %v3220_v51, %s3800_s8  ;;  %v381_v51 = vsel %vm326_vm0, %v378_v42, %v380_v43  ;;  %v4225_v42 = vsel %vm407_vm1, %v459_v0, %v461_v1 }
  0x80   : > { %v3320_v63 = vpack.i.bf16 %v4225_v42, %v4222_v40 }
  0x83   : > { %3236 = vrot.lane.b32.xlu0 %v3215_v61, %s3803_s13  ;;  %3251 = vrot.lane.b32.xlu1 %v3250_v21, %s3805_s6  ;;  %v3285_v61 = vpack.i.bf16 %v4178_v26, %v4175_v25 }
  0x87   : > { %3246 = vrot.lane.b32.xlu0 %v3225_v9, %s3804_s14  ;;  %3261 = vrot.lane.b32.xlu1 %v3260_v30, %s3806_s16 }
  0x8b   : > { %3256 = vrot.lane.b32.xlu0 %v3255_v31, %s3802_s12  ;;  %3271 = vrot.lane.b32.xlu1 %v3250_v21, %s3803_s13  ;;  %v4211_v21 = vld [vmem:[%s3909_s25 + $0x118] sm:$0x3] }
  0x8d   : > { %v2987_v38 = vpop.permute.xlu1 %2986 }
  0x8e   : > { %v2989_v23 = vunpack.i.h.bf16 %v2987_v38  ;;  %v2988_v24 = vunpack.i.l.bf16 %v2987_v38 }
  0x8f   : > { %3266 = vrot.lane.b32.xlu0 %v3225_v9, %s3801_s11  ;;  %3281 = vrot.lane.b32.xlu1 %v3260_v30, %s3804_s14  ;;  %v4204_v9 = vpack.i.bf16 %v381_v51, %v379_v48 }
  0x91   : > { %v2997_v46 = vpop.permute.xlu0 %2996  ;;  %v4193_v47 = vpop.permute.xlu1 %2991 }
  0x92   : > { %v2999_v56 = vunpack.i.h.bf16 %v2997_v46  ;;  %v2998_v59 = vunpack.i.l.bf16 %v2997_v46  ;;  %v383_v46 = vrot.slane %v4208_v20, 1 }
  0x93   : > { %3276 = vrot.lane.b32.xlu0 %v3255_v31, %s3800_s8  ;;  %3291 = vrot.lane.b32.xlu1 %v3290_v44, %s3802_s12 }
  0x94   : > { %v1220_v31 = vsel %vm1218_vm2, %v3929_v11, %v2999_v56  ;;  %v1219_v32 = vsel %vm1218_vm2, %v3921_v8, %v2998_v59 }
  0x95   : > { %v3002_v2 = vpop.permute.xlu0 %3001  ;;  %v3007_v5 = vpop.permute.xlu1 %3006 }
  0x96   : > { %v3004_v13 = vunpack.i.h.bf16 %v3002_v2  ;;  %v3003_v15 = vunpack.i.l.bf16 %v3002_v2  ;;  %v3009_v17 = vunpack.i.h.bf16 %v3007_v5  ;;  %v3008_v18 = vunpack.i.l.bf16 %v3007_v5 }
  0x97   : > { %3286 = vrot.lane.b32.xlu0 %v3285_v61, %s3805_s6  ;;  %3301 = vrot.lane.b32.xlu1 %v3260_v30, %s3801_s11  ;;  %v385_v30 = vrot.slane %v4211_v21, 1  ;;  %v2994_v2 = vunpack.i.h.bf16 %v4193_v47  ;;  %v2993_v5 = vunpack.i.l.bf16 %v4193_v47 }
  0x98   : > { %v1252_v33 = vsel %vm1251_vm3, %v1219_v32, %v3003_v15  ;;  %v1253_v34 = vsel %vm1251_vm3, %v1220_v31, %v3004_v13 }
  0x99   : > { %v1285_v38 = vsel %vm1284_vm4, %v1252_v33, %v2988_v24  ;;  %v1286_v11 = vsel %vm1284_vm4, %v1253_v34, %v2989_v23  ;;  %v3012_v43 = vpop.permute.xlu0 %3011  ;;  %v3022_v8 = vpop.permute.xlu1 %3021 }
  0x9a   : > { %v1318_v48 = vsel %vm1317_vm5, %v1285_v38, %v3008_v18  ;;  %v1319_v51 = vsel %vm1317_vm5, %v1286_v11, %v3009_v17  ;;  %v3014_v56 = vunpack.i.h.bf16 %v3012_v43  ;;  %v3013_v59 = vunpack.i.l.bf16 %v3012_v43 }
  0x9b   : > { %3296 = vrot.lane.b32.xlu0 %v4204_v9, %s3806_s16  ;;  %3311 = vrot.lane.b32.xlu1 %v3290_v44, %s3800_s8  ;;  %v384_v17 = vsel %vm326_vm0, %v382_v10, %v383_v46  ;;  %v386_v18 = vsel %vm326_vm0, %v383_v46, %v385_v30  ;;  %v3024_v24 = vunpack.i.h.bf16 %v3022_v8  ;;  %v3023_v31 = vunpack.i.l.bf16 %v3022_v8 }
  0x9c   : > { %v1351_v0 = vsel %vm1350_vm6, %v1318_v48, %v3013_v59  ;;  %v1352_v1 = vsel %vm1350_vm6, %v1319_v51, %v3014_v56  ;;  %v4250_v38 = vpack.i.bf16 %v386_v18, %v384_v17  ;;  %v4272_v17 = vld [vmem:[%s3909_s25 + $0x120] sm:$0xff] }
  0x9d   : > { %v3017_v13 = vpop.permute.xlu0 %3016  ;;  %v3032_v15 = vpop.permute.xlu1 %3031  ;;  %v1384_v32 = vsel %vm1383_vm7, %v1351_v0, %v2993_v5  ;;  %v1385_v33 = vsel %vm1383_vm7, %v1352_v1, %v2994_v2  ;;  %v1222_v8 = vsel %vm1218_vm2, %v3918_v7, %v3024_v24  ;;  %v1221_v48 = vsel %vm1218_vm2, %v3915_v6, %v3023_v31 }
  0x9e   : > { %v3019_v44 = vunpack.i.h.bf16 %v3017_v13  ;;  %v3018_v23 = vunpack.i.l.bf16 %v3017_v13  ;;  %v3034_v51 = vunpack.i.h.bf16 %v3032_v15  ;;  %v3033_v56 = vunpack.i.l.bf16 %v3032_v15 }
  0x9f   : > { %3306 = vrot.lane.b32.xlu0 %v3285_v61, %s3803_s13  ;;  %3321 = vrot.lane.b32.xlu1 %v3320_v63, %s3805_s6  ;;  %v3325_v61 = vpack.i.bf16 %v4208_v20, %v4198_v55  ;;  %v463_v1 = vrot.slane %v4198_v55, 2  ;;  %v464_v13 = vrot.slane %v4208_v20, 2  ;;  %v466_v15 = vrot.slane %v4211_v21, 2 }
  0xa0   : > { %v1417_v47 = vsel %vm1416_vm8, %v1384_v32, %v3018_v23  ;;  %v1418_v34 = vsel %vm1416_vm8, %v1385_v33, %v3019_v44  ;;  %v4281_v23 = vld [vmem:[%s3909_s25 + $0x130] sm:$0x3]  ;;  %v387_v33 = vrot.slane %v4272_v17, 1 }
  0xa1   : > { %v3027_v10 = vpop.permute.xlu0 %3026  ;;  %v1449_v11 = vpack.c.bf16 %v1418_v34, %v1417_v47  ;;  %v3042_v43 = vpop.permute.xlu1 %3041 }
  0xa2   : > { %v3029_v46 = vunpack.i.h.bf16 %v3027_v10  ;;  %v3028_v30 = vunpack.i.l.bf16 %v3027_v10  ;;  %v3044_v27 = vunpack.i.h.bf16 %v3042_v43  ;;  %v3043_v28 = vunpack.i.l.bf16 %v3042_v43 }
  0xa3   : > { %3316 = vrot.lane.b32.xlu0 %v4204_v9, %s3804_s14  ;;  %1682 = vmatmul.mubr.bf16.vlgmr.msra.gmra.mxu0 %v1449_v11  ;;  %v390_v11 = vrot.slane %v4281_v23, 1 }
  0xa4   : > { %v1255_v59 = vsel %vm1251_vm3, %v1222_v8, %v3029_v46  ;;  %v1254_v0 = vsel %vm1251_vm3, %v1221_v48, %v3028_v30  ;;  %3331 = vrot.lane.b32.xlu1 %v4250_v38, %s3806_s16  ;;  %2753 = vmatprep.mubr.msk.bf16.mxu0 %vm1218_vm2, %v1452_v50  ;;  %v4278_v50 = vld [vmem:[%s3909_s25 + $0x128] sm:$0xff]  ;;  %v4297_v30 = vsel %vm407_vm1, %v464_v13, %v466_v15 }
  0xa5   : > { %v3037_v6 = vpop.permute.xlu0 %3036  ;;  %v3052_v7 = vpop.permute.xlu1 %3051  ;;  %v1287_v18 = vsel %vm1284_vm4, %v1254_v0, %v3033_v56  ;;  %v1288_v44 = vsel %vm1284_vm4, %v1255_v59, %v3034_v51  ;;  %v388_v10 = vrot.slane %v4278_v50, 1  ;;  %v3360_v51 = vpack.i.bf16 %v4278_v50, %v4272_v17 }
  0xa6   : > { %v3039_v2 = vunpack.i.h.bf16 %v3037_v6  ;;  %v3038_v5 = vunpack.i.l.bf16 %v3037_v6  ;;  %v3054_v24 = vunpack.i.h.bf16 %v3052_v7  ;;  %v3053_v31 = vunpack.i.l.bf16 %v3052_v7 }
  0xa7   : > { %3326 = vrot.lane.b32.xlu0 %v3325_v61, %s3802_s12  ;;  %v389_v15 = vsel %vm326_vm0, %v387_v33, %v388_v10  ;;  %v4333_v33 = vld [vmem:[%s3909_s25 + $0x148] sm:$0x3] }
  0xa8   : > { %v1320_v55 = vsel %vm1317_vm5, %v1287_v18, %v3038_v5  ;;  %v1321_v20 = vsel %vm1317_vm5, %v1288_v44, %v3039_v2  ;;  %3341 = vrot.lane.b32.xlu1 %v3320_v63, %s3803_s13  ;;  %v4294_v63 = vsel %vm407_vm1, %v463_v1, %v464_v13  ;;  %v391_v18 = vsel %vm326_vm0, %v388_v10, %v390_v11 }
  0xa9   : > { %v3047_v21 = vpop.permute.xlu0 %3046  ;;  %v3062_v32 = vpop.permute.xlu1 %3061  ;;  %v1353_v43 = vsel %vm1350_vm6, %v1320_v55, %v3043_v28  ;;  %v1354_v46 = vsel %vm1350_vm6, %v1321_v20, %v3044_v27  ;;  %v3355_v2 = vpack.i.bf16 %v4297_v30, %v4294_v63  ;;  %v469_v20 = vrot.slane %v4278_v50, 2 }
  0xaa   : > { %v3049_v47 = vunpack.i.h.bf16 %v3047_v21  ;;  %v3048_v34 = vunpack.i.l.bf16 %v3047_v21  ;;  %v3064_v5 = vunpack.i.h.bf16 %v3062_v32  ;;  %v3063_v13 = vunpack.i.l.bf16 %v3062_v32  ;;  %v4330_v32 = vld [vmem:[%s3909_s25 + $0x140] sm:$0xff] }
  0xab   : > { %3336 = vrot.lane.b32.xlu0 %v4204_v9, %s3801_s11  ;;  %v471_v21 = vrot.slane %v4281_v23, 2 }
  0xac   : > { %3351 = vrot.lane.b32.xlu1 %v4250_v38, %s3804_s14  ;;  %v1386_v8 = vsel %vm1383_vm7, %v1353_v43, %v3048_v34  ;;  %v1387_v48 = vsel %vm1383_vm7, %v1354_v46, %v3049_v47  ;;  %v393_v46 = vrot.slane %v4330_v32, 1 }
  0xad   : > { %v3057_v56 = vpop.permute.xlu0 %3056  ;;  %v1419_v59 = vsel %vm1416_vm8, %v1386_v8, %v3053_v31  ;;  %v1420_v9 = vsel %vm1416_vm8, %v1387_v48, %v3054_v24  ;;  %v3072_v0 = vpop.permute.xlu1 %3071  ;;  %v4327_v31 = vpack.i.bf16 %v391_v18, %v389_v15  ;;  %v4347_v43 = vsel %vm407_vm1, %v469_v20, %v471_v21 }
  0xae   : > { %v3059_v6 = vunpack.i.h.bf16 %v3057_v56  ;;  %v3058_v7 = vunpack.i.l.bf16 %v3057_v56  ;;  %v1451_v1 = vpack.c.bf16 %v1420_v9, %v1419_v59  ;;  %v395_v8 = vrot.slane %v4333_v33, 1 }
  0xaf   : > { %3346 = vrot.lane.b32.xlu0 %v3325_v61, %s3800_s8  ;;  %v468_v61 = vrot.slane %v4272_v17, 2  ;;  %v3073_v17 = vunpack.i.l.bf16 %v3072_v0 }
  0xb0   : > { %v1224_v44 = vsel %vm1218_vm2, %v3939_v19, %v3059_v6  ;;  %v1223_v27 = vsel %vm1218_vm2, %v3934_v14, %v3058_v7  ;;  %1692 = vmatmul.mubr.bf16.gmra.mxu0 %v1451_v1  ;;  %3361 = vrot.lane.b32.xlu1 %v3360_v51, %s3802_s12  ;;  %v4325_v19 = vld [vmem:[%s3909_s25 + $0x138] sm:$0xff]  ;;  %v396_v18 = vsel %vm326_vm0, %v393_v46, %v395_v8 }
  0xb1   : > { %v3067_v28 = vpop.permute.xlu0 %3066  ;;  %v3082_v55 = vpop.permute.xlu1 %3081  ;;  %2754 = vmatprep.mubr.msk.bf16.mxu0 %vm1218_vm2, %v1454_v52  ;;  %v1256_v39 = vsel %vm1251_vm3, %v1223_v27, %v3063_v13  ;;  %v1257_v41 = vsel %vm1251_vm3, %v1224_v44, %v3064_v5  ;;  %v3074_v52 = vunpack.i.h.bf16 %v3072_v0  ;;  %v392_v47 = vrot.slane %v4325_v19, 1 }
  0xb2   : > { %v3069_v24 = vunpack.i.h.bf16 %v3067_v28  ;;  %v3068_v14 = vunpack.i.l.bf16 %v3067_v28  ;;  %v4344_v11 = vsel %vm407_vm1, %v468_v61, %v469_v20  ;;  %v3084_v9 = vunpack.i.h.bf16 %v3082_v55 }
  0xb3   : > { %3356 = vrot.lane.b32.xlu0 %v3355_v2, %s3805_s6  ;;  %v3083_v0 = vunpack.i.l.bf16 %v3082_v55  ;;  %v3390_v1 = vpack.i.bf16 %v4347_v43, %v4344_v11  ;;  %v394_v15 = vsel %vm326_vm0, %v392_v47, %v393_v46  ;;  %v473_v8 = vrot.slane %v4325_v19, 2 }
  0xb4   : > { %v1289_v50 = vsel %vm1284_vm4, %v1256_v39, %v3068_v14  ;;  %v1290_v23 = vsel %vm1284_vm4, %v1257_v41, %v3069_v24  ;;  %3371 = vrot.lane.b32.xlu1 %v4250_v38, %s3801_s11  ;;  %v4368_v24 = vpack.i.bf16 %v396_v18, %v394_v15 }
  0xb5   : > { %v3077_v34 = vpop.permute.xlu0 %3076  ;;  %v3092_v10 = vpop.permute.xlu1 %3091  ;;  %v1322_v59 = vsel %vm1317_vm5, %v1289_v50, %v3073_v17  ;;  %v1323_v38 = vsel %vm1317_vm5, %v1290_v23, %v3074_v52 }
  0xb6   : > { %v3079_v48 = vunpack.i.h.bf16 %v3077_v34  ;;  %v3078_v56 = vunpack.i.l.bf16 %v3077_v34  ;;  %v3094_v28 = vunpack.i.h.bf16 %v3092_v10  ;;  %v3093_v55 = vunpack.i.l.bf16 %v3092_v10 }
  0xb7   : > { %3366 = vrot.lane.b32.xlu0 %v4327_v31, %s3806_s16 }
  0xb8   : > { %v1355_v6 = vsel %vm1350_vm6, %v1322_v59, %v3078_v56  ;;  %v1356_v7 = vsel %vm1350_vm6, %v1323_v38, %v3079_v48  ;;  %3381 = vrot.lane.b32.xlu1 %v3360_v51, %s3800_s8  ;;  %v1226_v50 = vsel %vm1218_vm2, %v3974_v49, %v3094_v28  ;;  %v1225_v23 = vsel %vm1218_vm2, %v3967_v45, %v3093_v55 }
  0xb9   : > { %v3087_v5 = vpop.permute.xlu0 %3086  ;;  %v3102_v13 = vpop.permute.xlu1 %3101  ;;  %v1388_v61 = vsel %vm1383_vm7, %v1355_v6, %v3083_v0  ;;  %v1389_v20 = vsel %vm1383_vm7, %v1356_v7, %v3084_v9  ;;  %v474_v59 = vrot.slane %v4330_v32, 2  ;;  %v476_v38 = vrot.slane %v4333_v33, 2  ;;  %v4390_v9 = vld [vmem:[%s3909_s25 + $0x150] sm:$0xff]  ;;  %v4399_v7 = vld [vmem:[%s3909_s25 + $0x160] sm:$0x3] }
  0xba   : > { %v3089_v44 = vunpack.i.h.bf16 %v3087_v5  ;;  %v3088_v27 = vunpack.i.l.bf16 %v3087_v5  ;;  %v3104_v47 = vunpack.i.h.bf16 %v3102_v13  ;;  %v3103_v34 = vunpack.i.l.bf16 %v3102_v13 }
  0xbb   : > { %3376 = vrot.lane.b32.xlu0 %v3355_v2, %s3803_s13  ;;  %v3395_v2 = vpack.i.bf16 %v4330_v32, %v4325_v19  ;;  %v397_v18 = vrot.slane %v4390_v9, 1  ;;  %v400_v55 = vrot.slane %v4399_v7, 1 }
  0xbc   : > { %v1421_v51 = vsel %vm1416_vm8, %v1388_v61, %v3088_v27  ;;  %v1422_v21 = vsel %vm1416_vm8, %v1389_v20, %v3089_v44  ;;  %3391 = vrot.lane.b32.xlu1 %v3390_v1, %s3805_s6 }
  0xbd   : > { %v3097_v14 = vpop.permute.xlu0 %3096  ;;  %v1453_v39 = vpack.c.bf16 %v1422_v21, %v1421_v51  ;;  %v3112_v41 = vpop.permute.xlu1 %3111  ;;  %v4415_v51 = vsel %vm407_vm1, %v474_v59, %v476_v38 }
  0xbe   : > { %v3099_v52 = vunpack.i.h.bf16 %v3097_v14  ;;  %v3098_v17 = vunpack.i.l.bf16 %v3097_v14  ;;  %v3114_v57 = vunpack.i.h.bf16 %v3112_v41  ;;  %v3113_v58 = vunpack.i.l.bf16 %v3112_v41 }
  0xbf   : > { %3386 = vrot.lane.b32.xlu0 %v4327_v31, %s3804_s14  ;;  %1702 = vmatmul.mubr.bf16.gmra.mxu0 %v1453_v39 }
  0xc0   : > { %v1259_v10 = vsel %vm1251_vm3, %v1226_v50, %v3099_v52  ;;  %v1258_v46 = vsel %vm1251_vm3, %v1225_v23, %v3098_v17  ;;  %3401 = vrot.lane.b32.xlu1 %v4368_v24, %s3806_s16  ;;  %2755 = vmatprep.mubr.msk.bf16.mxu0 %vm1218_vm2, %v1456_v62  ;;  %v4396_v62 = vld [vmem:[%s3909_s25 + $0x158] sm:$0xff] }
  0xc1   : > { %v3107_v45 = vpop.permute.xlu0 %3106  ;;  %v3122_v49 = vpop.permute.xlu1 %3121  ;;  %v1291_v0 = vsel %vm1284_vm4, %v1258_v46, %v3103_v34  ;;  %v1292_v6 = vsel %vm1284_vm4, %v1259_v10, %v3104_v47  ;;  %v398_v28 = vrot.slane %v4396_v62, 1  ;;  %v3430_v39 = vpack.i.bf16 %v4396_v62, %v4390_v9 }
  0xc2   : > { %v3109_v48 = vunpack.i.h.bf16 %v3107_v45  ;;  %v3108_v56 = vunpack.i.l.bf16 %v3107_v45  ;;  %v3124_v5 = vunpack.i.h.bf16 %v3122_v49  ;;  %v3123_v13 = vunpack.i.l.bf16 %v3122_v49 }
  0xc3   : > { %3396 = vrot.lane.b32.xlu0 %v3395_v2, %s3802_s12  ;;  %v399_v45 = vsel %vm326_vm0, %v397_v18, %v398_v28  ;;  %v401_v49 = vsel %vm326_vm0, %v398_v28, %v400_v55 }
  0xc4   : > { %v1324_v19 = vsel %vm1317_vm5, %v1291_v0, %v3108_v56  ;;  %v1325_v32 = vsel %vm1317_vm5, %v1292_v6, %v3109_v48  ;;  %3411 = vrot.lane.b32.xlu1 %v3390_v1, %s3803_s13  ;;  %v4412_v1 = vsel %vm407_vm1, %v473_v8, %v474_v59  ;;  %v478_v56 = vrot.slane %v4390_v9, 2  ;;  %v4453_v9 = vld [vmem:[%s3909_s25 + $0x178] sm:$0x3] }
  0xc5   : > { %v3117_v33 = vpop.permute.xlu0 %3116  ;;  %v3132_v15 = vpop.permute.xlu1 %3131  ;;  %v1357_v61 = vsel %vm1350_vm6, %v1324_v19, %v3113_v58  ;;  %v1358_v20 = vsel %vm1350_vm6, %v1325_v32, %v3114_v57  ;;  %v4427_v34 = vpack.i.bf16 %v4415_v51, %v4412_v1  ;;  %v481_v0 = vrot.slane %v4399_v7, 2  ;;  %v4450_v58 = vld [vmem:[%s3909_s25 + $0x170] sm:$0xff] }
  0xc6   : > { %v3119_v44 = vunpack.i.h.bf16 %v3117_v33  ;;  %v3118_v27 = vunpack.i.l.bf16 %v3117_v33  ;;  %v3134_v10 = vunpack.i.h.bf16 %v3132_v15  ;;  %v3133_v46 = vunpack.i.l.bf16 %v3132_v15 }
  0xc7   : > { %3406 = vrot.lane.b32.xlu0 %v4327_v31, %s3801_s11  ;;  %v4444_v57 = vpack.i.bf16 %v401_v49, %v399_v45  ;;  %v405_v28 = vrot.slane %v4453_v9, 1  ;;  %v484_v35 = vrot.slane %v4450_v58, 2 }
  0xc8   : > { %3421 = vrot.lane.b32.xlu1 %v4368_v24, %s3804_s14  ;;  %v1390_v21 = vsel %vm1383_vm7, %v1357_v61, %v3118_v27  ;;  %v1391_v14 = vsel %vm1383_vm7, %v1358_v20, %v3119_v44  ;;  %v403_v27 = vrot.slane %v4450_v58, 1 }
  0xc9   : > { %v3127_v41 = vpop.permute.xlu0 %3126  ;;  %v1423_v52 = vsel %vm1416_vm8, %v1390_v21, %v3123_v13  ;;  %v1424_v31 = vsel %vm1416_vm8, %v1391_v14, %v3124_v5  ;;  %v3142_v17 = vpop.permute.xlu1 %3141  ;;  %v3573_v5 = vld [vmem:[%s5313_s3 + $0x38] sm:$0xff]  }
  0xca   : > { %v3129_v50 = vunpack.i.h.bf16 %v3127_v41  ;;  %v3128_v23 = vunpack.i.l.bf16 %v3127_v41  ;;  %v1455_v47 = vpack.c.bf16 %v1424_v31, %v1423_v52  ;;  %v3144_v32 = vunpack.i.h.bf16 %v3142_v17  ;;  %2824 = vmatpush3.bf16.msra.mxu1 %v3573_v5  ;;  %v3574_v41 = vld [vmem:[%s5313_s3 + $0x70] sm:$0xff]  }
  0xcb   : > { %3416 = vrot.lane.b32.xlu0 %v3395_v2, %s3800_s8  ;;  %v479_v2 = vrot.slane %v4396_v62, 2  ;;  %v3143_v3 = vunpack.i.l.bf16 %v3142_v17  ;;  %2825 = vmatprep.subr.bf16.mxu1 %v3574_v41 }
  0xcc   : > { %v1228_v8 = vsel %vm1218_vm2, %v4040_v22, %v3129_v50  ;;  %v1227_v48 = vsel %vm1218_vm2, %v4032_v16, %v3128_v23  ;;  %1712 = vmatmul.mubr.bf16.gmra.mxu0 %v1455_v47  ;;  %3431 = vrot.lane.b32.xlu1 %v3430_v39, %s3802_s12  ;;  %v4447_v16 = vld [vmem:[%s3909_s25 + $0x168] sm:$0xff]  ;;  %v3575_v50 = vld [vmem:[%s5313_s3 + $0x30] sm:$0xff]  }
  0xcd   : > { %v3137_v59 = vpop.permute.xlu0 %3136  ;;  %v3152_v38 = vpop.permute.xlu1 %3151  ;;  %2756 = vmatprep.mubr.msk.bf16.mxu0 %vm1218_vm2, %v1458_v12  ;;  %v1260_v62 = vsel %vm1251_vm3, %v1227_v48, %v3133_v46  ;;  %v1261_v19 = vsel %vm1251_vm3, %v1228_v8, %v3134_v10  ;;  %v4467_v33 = vsel %vm407_vm1, %v478_v56, %v479_v2  ;;  %v4473_v18 = vsel %vm407_vm1, %v479_v2, %v481_v0  ;;  %v3576_v2 = vld [vmem:[%s5313_s3 + $0x68] sm:$0xff]  }
  0xce   : > { %v3139_v22 = vunpack.i.h.bf16 %v3137_v59  ;;  %v3138_v6 = vunpack.i.l.bf16 %v3137_v59  ;;  %v402_v44 = vrot.slane %v4447_v16, 1  ;;  %v3154_v21 = vunpack.i.h.bf16 %v3152_v38  ;;  %2826 = vmatpush3.bf16.msra.mxu1 %v3575_v50 }
  0xcf   : > { %3426 = vrot.lane.b32.xlu0 %v4427_v34, %s3805_s6  ;;  %v3153_v14 = vunpack.i.l.bf16 %v3152_v38  ;;  %v4490_v17 = vpack.i.bf16 %v4473_v18, %v4467_v33  ;;  %v406_v46 = vsel %vm326_vm0, %v403_v27, %v405_v28  ;;  %2827 = vmatprep.subr.bf16.mxu1 %v3576_v2 }
  0xd0   : > { %v1293_v12 = vsel %vm1284_vm4, %v1260_v62, %v3138_v6  ;;  %v1294_v7 = vsel %vm1284_vm4, %v1261_v19, %v3139_v22  ;;  %3441 = vrot.lane.b32.xlu1 %v4368_v24, %s3801_s11  ;;  %v404_v10 = vsel %vm326_vm0, %v402_v44, %v403_v27  ;;  %v3578_v44 = vld [vmem:[%s5313_s3 + $0x60] sm:$0xff]  }
  0xd1   : > { %v3147_v13 = vpop.permute.xlu0 %3146  ;;  %v3162_v15 = vpop.permute.xlu1 %3161  ;;  %v1326_v61 = vsel %vm1317_vm5, %v1293_v12, %v3143_v3  ;;  %v1327_v20 = vsel %vm1317_vm5, %v1294_v7, %v3144_v32  ;;  %v4508_v0 = vpack.i.bf16 %v406_v46, %v404_v10  ;;  %v4515_v3 = vpack.i.bf16 %v4450_v58, %v4447_v16  ;;  %v3717_v7 = vld [vmem:[%s3909_s25 + $0x78] sm:$0xff] }
  0xd2   : > { %v3149_v24 = vunpack.i.h.bf16 %v3147_v13  ;;  %v3148_v55 = vunpack.i.l.bf16 %v3147_v13  ;;  %v3164_v8 = vunpack.i.h.bf16 %v3162_v15 }
  0xd3   : > { %3436 = vrot.lane.b32.xlu0 %v4444_v57, %s3806_s16 }
  0xd4   : > { %v1359_v52 = vsel %vm1350_vm6, %v1326_v61, %v3148_v55  ;;  %v1360_v31 = vsel %vm1350_vm6, %v1327_v20, %v3149_v24  ;;  %3451 = vrot.lane.b32.xlu1 %v3430_v39, %s3800_s8  ;;  %v3163_v39 = vunpack.i.l.bf16 %v3162_v15  ;;  %v1230_v12 = vsel %vm1218_vm2, %v3716_v4, %v3164_v8  ;;  %v3579_v24 = vld [vmem:[%s5313_s3 + $0x20] sm:$0xff]   ;;  %v3583_v4 = vld [vmem:[%s5313_s3 + $0x10] sm:$0xff]  }
  0xd5   : > { %v3157_v23 = vpop.permute.xlu0 %3156  ;;  %v3172_v47 = vpop.permute.xlu1 %3171  ;;  %v1392_v48 = vsel %vm1383_vm7, %v1359_v52, %v3153_v14  ;;  %v1393_v56 = vsel %vm1383_vm7, %v1360_v31, %v3154_v21  ;;  %v486_v61 = vrot.slane %v4453_v9, 2  ;;  %v4539_v21 = vld [vmem:[%s3909_s25 + $0x180] sm:$0xff]  ;;  %v4542_v14 = vld [vmem:[%s3909_s25 + $0x188] sm:$0xff]  ;;  %v483_v31 = vrot.slane %v4447_v16, 2 }
  0xd6   : > { %v3159_v45 = vunpack.i.h.bf16 %v3157_v23  ;;  %v3158_v49 = vunpack.i.l.bf16 %v3157_v23  ;;  %v1229_v5 = vsel %vm1218_vm2, %v3717_v7, %v3163_v39  ;;  %v3174_v13 = vunpack.i.h.bf16 %v3172_v47 }
  0xd7   : > { %3446 = vrot.lane.b32.xlu0 %v4427_v34, %s3803_s13  ;;  %v3577_v34 = vld [vmem:[%s5313_s3 + $0x28] sm:$0xff]   ;;  %v3173_v15 = vunpack.i.l.bf16 %v3172_v47  ;;  %v3580_v47 = vld [vmem:[%s5313_s3 + $0x58] sm:$0xff]   ;;  %v491_v10 = vrot.slane %v4539_v21, 1  ;;  %v492_v46 = vrot.slane %v4542_v14, 1 }
  0xd8   : > { %v1425_v59 = vsel %vm1416_vm8, %v1392_v48, %v3158_v49  ;;  %v1426_v38 = vsel %vm1416_vm8, %v1393_v56, %v3159_v45  ;;  %3461 = vrot.lane.b32.xlu1 %v4490_v17, %s3805_s6  ;;  %2828 = vmatpush3.bf16.msra.mxu1 %v3577_v34  ;;  %v3581_v45 = vld [vmem:[%s5313_s3 + $0x18] sm:$0xff]   ;;  %v494_v56 = vrot.slane %v4547_v36, 1  ;;  %v4571_v34 = vsel %vm407_vm1, %v483_v31, %v484_v35 }
  0xd9   : > { %v3167_v22 = vpop.permute.xlu0 %3166  ;;  %v1457_v6 = vpack.c.bf16 %v1426_v38, %v1425_v59  ;;  %v3182_v62 = vpop.permute.xlu1 %3181  ;;  %2829 = vmatprep.subr.bf16.mxu1 %v3578_v44  ;;  %v496_v44 = vrot.slane %v4539_v21, 2 }
  0xda   : > { %v3169_v19 = vunpack.i.h.bf16 %v3167_v22  ;;  %v3168_v32 = vunpack.i.l.bf16 %v3167_v22  ;;  %v3184_v9 = vunpack.i.h.bf16 %v3182_v62  ;;  %v3183_v23 = vunpack.i.l.bf16 %v3182_v62 }
  0xdb   : > { %3456 = vrot.lane.b32.xlu0 %v4444_v57, %s3804_s14  ;;  %1722 = vmatmul.mubr.bf16.gmra.mxu0 %v1457_v6  ;;  %v4574_v22 = vsel %vm407_vm1, %v484_v35, %v486_v61  ;;  %v3582_v6 = vld [vmem:[%s5313_s3 + $0x50] sm:$0xff]  }
  0xdc   : > { %v1263_v27 = vsel %vm1251_vm3, %v1230_v12, %v3169_v19  ;;  %v1262_v28 = vsel %vm1251_vm3, %v1229_v5, %v3168_v32  ;;  %3471 = vrot.lane.b32.xlu1 %v4508_v0, %s3806_s16  ;;  %2757 = vmatprep.mubr.msk.bf16.mxu0 %vm1218_vm2, %v1460_v37  ;;  %v493_v32 = vsel %vm326_vm0, %v491_v10, %v492_v46  ;;  %v4628_v10 = vld [vmem:[%s3909_s25 + $0x198] sm:$0xff] }
  0xdd   : > { %v3177_v55 = vpop.permute.xlu0 %3176  ;;  %v3192_v20 = vpop.permute.xlu1 %3191  ;;  %2830 = vmatpush3.bf16.msra.mxu1 %v3579_v24  ;;  %v1295_v37 = vsel %vm1284_vm4, %v1262_v28, %v3173_v15  ;;  %v1296_v50 = vsel %vm1284_vm4, %v1263_v27, %v3174_v13  ;;  %v495_v15 = vsel %vm326_vm0, %v492_v46, %v494_v56  ;;  %v277_v46 = vld [vmem:[%s3909_s25 + $0x1a8] sm:$0x3] }
  0xde   : > { %v3179_v41 = vunpack.i.h.bf16 %v3177_v55  ;;  %v3178_v52 = vunpack.i.l.bf16 %v3177_v55  ;;  %v3194_v8 = vunpack.i.h.bf16 %v3192_v20  ;;  %v3193_v39 = vunpack.i.l.bf16 %v3192_v20  ;;  %2831 = vmatprep.subr.bf16.mxu1 %v3580_v47  ;;  %v4622_v47 = vld [vmem:[%s3909_s25 + $0x1a0] sm:$0xff] }
  0xdf   : > { %3466 = vrot.lane.b32.xlu0 %v4515_v3, %s3802_s12  ;;  %v497_v55 = vrot.slane %v4542_v14, 2  ;;  %v505_v56 = vrot.slane %v4622_v47, 1 }
  0xe0   : > { %v1328_v16 = vsel %vm1317_vm5, %v1295_v37, %v3178_v52  ;;  %v1329_v58 = vsel %vm1317_vm5, %v1296_v50, %v3179_v41  ;;  %3481 = vrot.lane.b32.xlu1 %v4490_v17, %s3803_s13  ;;  %v4600_v41 = vpack.i.bf16 %v4574_v22, %v4571_v34  ;;  %v3718_v52 = vld [vmem:[%s3909_s25 + $0x98] sm:$0xff]  ;;  %v3585_v37 = vld [vmem:[%s5313_s3 + $0x8] sm:$0xff]  }
  0xe1   : > { %v3187_v49 = vpop.permute.xlu0 %3186  ;;  %v3202_v48 = vpop.permute.xlu1 %3201  ;;  %2832 = vmatpush3.bf16.msra.mxu1 %v3581_v45  ;;  %v1361_v17 = vsel %vm1350_vm6, %v1328_v16, %v3183_v23  ;;  %v1362_v38 = vsel %vm1350_vm6, %v1329_v58, %v3184_v9  ;;  %v4615_v23 = vpack.i.bf16 %v495_v15, %v493_v32 }
  0xe2   : > { %v3189_v2 = vunpack.i.h.bf16 %v3187_v49  ;;  %v3188_v59 = vunpack.i.l.bf16 %v3187_v49  ;;  %2833 = vmatprep.subr.bf16.mxu1 %v3582_v6  ;;  %v3204_v61 = vunpack.i.h.bf16 %v3202_v48  ;;  %v3203_v20 = vunpack.i.l.bf16 %v3202_v48 }
  0xe3   : > { %3476 = vrot.lane.b32.xlu0 %v4444_v57, %s3801_s11  ;;  %v4585_v57 = vpack.i.bf16 %v4542_v14, %v4539_v21  ;;  %v3584_v21 = vld [vmem:[%s5313_s3 + $0x48] sm:$0xff]   ;;  %v3719_v14 = vld [vmem:[%s3909_s25 + $0x90] sm:$0xff]  ;;  %v504_v6 = vrot.slane %v4628_v10, 1 }
  0xe4   : > { %3491 = vrot.lane.b32.xlu1 %v4508_v0, %s3804_s14  ;;  %v1394_v62 = vsel %vm1383_vm7, %v1361_v17, %v3188_v59  ;;  %v1395_v19 = vsel %vm1383_vm7, %v1362_v38, %v3189_v2  ;;  %v3587_v2 = vld [vmem:[%s5313_s3] sm:$0xff]   ;;  %v510_v38 = vrot.slane %v4622_v47, 2 }
  0xe5   : > { %v3197_v12 = vpop.permute.xlu0 %3196  ;;  %v1427_v7 = vsel %vm1416_vm8, %v1394_v62, %v3193_v39  ;;  %v1428_v5 = vsel %vm1416_vm8, %v1395_v19, %v3194_v8  ;;  %v3212_v13 = vpop.permute.xlu1 %3211  ;;  %2834 = vmatpush3.bf16.msra.mxu1 %v3583_v4  ;;  %v509_v62 = vrot.slane %v4628_v10, 2  ;;  %v507_v19 = vrot.slane %v277_v46, 1 }
  0xe6   : > { %v3199_v27 = vunpack.i.h.bf16 %v3197_v12  ;;  %v3198_v28 = vunpack.i.l.bf16 %v3197_v12  ;;  %v1459_v24 = vpack.c.bf16 %v1428_v5, %v1427_v7  ;;  %2835 = vmatprep.subr.bf16.mxu1 %v3584_v21  ;;  %v3214_v8 = vunpack.i.h.bf16 %v3212_v13 }
  0xe7   : > { %3486 = vrot.lane.b32.xlu0 %v4515_v3, %s3800_s8  ;;  %v499_v3 = vrot.slane %v4547_v36, 2  ;;  %v4625_v36 = vsel %vm407_vm1, %v496_v44, %v497_v55  ;;  %v3213_v53 = vunpack.i.l.bf16 %v3212_v13  ;;  %v512_v13 = vrot.slane %v277_v46, 2 }
  0xe8   : > { %v1232_v31 = vsel %vm1218_vm2, %v3718_v52, %v3199_v27  ;;  %v1231_v35 = vsel %vm1218_vm2, %v3719_v14, %v3198_v28  ;;  %1732 = vmatmul.mubr.bf16.gmra.mxu0 %v1459_v24  ;;  %3501 = vrot.lane.b32.xlu1 %v4585_v57, %s3802_s12 }
  0xe9   : > { %v3207_v50 = vpop.permute.xlu0 %3206  ;;  %v3222_v9 = vpop.permute.xlu1 %3221  ;;  %2758 = vmatprep.mubr.msk.bf16.mxu0 %vm1218_vm2, %v1462_v60  ;;  %2836 = vmatpush3.bf16.msra.mxu1 %v3585_v37  ;;  %v1264_v45 = vsel %vm1251_vm3, %v1231_v35, %v3203_v20  ;;  %v1265_v49 = vsel %vm1251_vm3, %v1232_v31, %v3204_v61  ;;  %v4643_v48 = vsel %vm407_vm1, %v497_v55, %v499_v3 }
  0xea   : > { %v3209_v16 = vunpack.i.h.bf16 %v3207_v50  ;;  %v3208_v58 = vunpack.i.l.bf16 %v3207_v50  ;;  %2837 = vmatprep.subr.bf16.mxu1 %v3586_v54  ;;  %v3224_v4 = vunpack.i.h.bf16 %v3222_v9  ;;  %v3223_v5 = vunpack.i.l.bf16 %v3222_v9  ;;  %v3720_v54 = vld [vmem:[%s3909_s25 + $0xb0] sm:$0xff] }
  0xeb   : > { %3496 = vrot.lane.b32.xlu0 %v4600_v41, %s3805_s6  ;;  %v3530_v27 = vpack.i.bf16 %v4643_v48, %v4625_v36  ;;  %v506_v55 = vsel %vm326_vm0, %v504_v6, %v505_v56  ;;  %v508_v61 = vsel %vm326_vm0, %v505_v56, %v507_v19  ;;  %v4665_v20 = vsel %vm407_vm1, %v509_v62, %v510_v38 }
  0xec   : > { %v1297_v60 = vsel %vm1284_vm4, %v1264_v45, %v3208_v58  ;;  %v1298_v39 = vsel %vm1284_vm4, %v1265_v49, %v3209_v16  ;;  %3511 = vrot.lane.b32.xlu1 %v4508_v0, %s3801_s11  ;;  %v4668_v21 = vsel %vm407_vm1, %v510_v38, %v512_v13  ;;  %v3540_v16 = vpack.i.bf16 %v508_v61, %v506_v55 }
  0xed   : > { %v3217_v59 = vpop.permute.xlu0 %3216  ;;  %v3232_v17 = vpop.permute.xlu1 %3231  ;;  %2838 = vmatpush3.bf16.msra.mxu1 %v3587_v2  ;;  %v1330_v12 = vsel %vm1317_vm5, %v1297_v60, %v3213_v53  ;;  %v1331_v7 = vsel %vm1317_vm5, %v1298_v39, %v3214_v8  ;;  %v1480_v37 = vpack.c.bf16 %v4668_v21, %v4665_v20  ;;  %v3535_v53 = vpack.i.bf16 %v4622_v47, %v4628_v10  ;;  %v3721_v60 = vld [vmem:[%s3909_s25 + $0xa8] sm:$0xff] }
  0xee   : > { %v3219_v0 = vunpack.i.h.bf16 %v3217_v59  ;;  %v3218_v32 = vunpack.i.l.bf16 %v3217_v59  ;;  %v3234_v14 = vunpack.i.h.bf16 %v3232_v17  ;;  %v3233_v3 = vunpack.i.l.bf16 %v3232_v17 }
  0xef   : > { %3506 = vrot.lane.b32.xlu0 %v4615_v23, %s3806_s16 }
  0xf0   : > { %v1363_v15 = vsel %vm1350_vm6, %v1330_v12, %v3218_v32  ;;  %v1364_v44 = vsel %vm1350_vm6, %v1331_v7, %v3219_v0  ;;  %3521 = vrot.lane.b32.xlu1 %v4585_v57, %s3800_s8  ;;  %v1233_v39 = vsel %vm1218_vm2, %v3721_v60, %v3233_v3  ;;  %s3744_s8 = scalar_lea.vmem %s3743_s23, 8192 }
  0xf1   : > { %v3227_v28 = vpop.permute.xlu0 %3226  ;;  %v3242_v24 = vpop.permute.xlu1 %3241  ;;  %v1396_v57 = vsel %vm1383_vm7, %v1363_v15, %v3223_v5  ;;  %v1397_v35 = vsel %vm1383_vm7, %v1364_v44, %v3224_v4 }
  0xf2   : > { %v3229_v52 = vunpack.i.h.bf16 %v3227_v28  ;;  %v3228_v31 = vunpack.i.l.bf16 %v3227_v28  ;;  %v3244_v56 = vunpack.i.h.bf16 %v3242_v24  ;;  %v3243_v2 = vunpack.i.l.bf16 %v3242_v24 }
  0xf3   : > { %3516 = vrot.lane.b32.xlu0 %v4600_v41, %s3803_s13  ;;  %v1234_v41 = vsel %vm1218_vm2, %v3720_v54, %v3234_v14  ;;  %s3807_s13 = smov 15  }
  0xf4   : > { %v1429_v50 = vsel %vm1416_vm8, %v1396_v57, %v3228_v31  ;;  %v1430_v9 = vsel %vm1416_vm8, %v1397_v35, %v3229_v52  ;;  %3531 = vrot.lane.b32.xlu1 %v3530_v27, %s3805_s6  ;;  %v1466_v52 = vpack.c.bf16 %v4225_v42, %v4222_v40 }
  0xf5   : > { %v3237_v58 = vpop.permute.xlu0 %3236  ;;  %v1461_v46 = vpack.c.bf16 %v1430_v9, %v1429_v50  ;;  %v3252_v45 = vpop.permute.xlu1 %3251  ;;  %v3722_v50 = vld [vmem:[%s3909_s25 + $0xc8] sm:$0xff] }
  0xf6   : > { %v3239_v49 = vunpack.i.h.bf16 %v3237_v58  ;;  %v3238_v8 = vunpack.i.l.bf16 %v3237_v58  ;;  %v3254_v19 = vunpack.i.h.bf16 %v3252_v45  ;;  %v3253_v0 = vunpack.i.l.bf16 %v3252_v45 }
  0xf7   : > { %3526 = vrot.lane.b32.xlu0 %v4615_v23, %s3804_s14  ;;  %1742 = vmatmul.mubr.bf16.gmra.mxu0 %v1461_v46  ;;  %s215_s14 = sand.u32 1, %s3790_s19  }
  0xf8   : > { %v1267_v59 = vsel %vm1251_vm3, %v1234_v41, %v3239_v49  ;;  %v1266_v17 = vsel %vm1251_vm3, %v1233_v39, %v3238_v8  ;;  %3541 = vrot.lane.b32.xlu1 %v3540_v16, %s3806_s16  ;;  %2759 = vmatprep.mubr.msk.bf16.mxu0 %vm1218_vm2, %v1464_v29  ;;  %v3723_v16 = vld [vmem:[%s3909_s25 + $0xc0] sm:$0xff]  ;;  %s2732_s6 = sshll.u32 %s215_s14, 8  ;;  %s5270_s22 = scalar_lea.sflag [#allocation3], %s215_s14 }
  0xf9   : > { %v3247_v47 = vpop.permute.xlu0 %3246  ;;  %v3262_v10 = vpop.permute.xlu1 %3261  ;;  %v1299_v62 = vsel %vm1284_vm4, %v1266_v17, %v3243_v2  ;;  %v1300_v23 = vsel %vm1284_vm4, %v1267_v59, %v3244_v56  ;;  %s5047_s16 = scalar_lea.vmem [#allocation2], %s2732_s6 }
  0xfa   : > { %v3249_v38 = vunpack.i.h.bf16 %v3247_v47  ;;  %v3248_v6 = vunpack.i.l.bf16 %v3247_v47  ;;  %v3264_v25 = vunpack.i.h.bf16 %v3262_v10  ;;  %v3263_v26 = vunpack.i.l.bf16 %v3262_v10  ;;  %s2666_s30 = sshll.u32 %s5047_s16, 4  ;;  %s5261_s30 = int_to_ptr.vmem [resolvable:$true] %s2666_s30 }
  0xfb   : > { %3536 = vrot.lane.b32.xlu0 %v3535_v53, %s3802_s12  ;;  %s3738_s15 = scalar_lea.vmem %s5261_s30, 4096  ;;  %p3745_p0 = scmp.lt.s32.totalorder %s5261_s30, %s3743_s23 }
  0xfc   : > { %v1332_v32 = vsel %vm1317_vm5, %v1299_v62, %v3248_v6  ;;  %v1333_v4 = vsel %vm1317_vm5, %v1300_v23, %v3249_v38  ;;  %p3739_p11 = scmp.ne.s32.totalorder %s5261_s30, %s3738_s15  ;;  %p3746_p1 = scmp.lt.s32.totalorder %s3744_s8, %s3738_s15 }
  0xfd   : > { %v3257_v12 = vpop.permute.xlu0 %3256  ;;  %v3272_v29 = vpop.permute.xlu1 %3271  ;;  %v1365_v13 = vsel %vm1350_vm6, %v1332_v32, %v3253_v0  ;;  %v1366_v15 = vsel %vm1350_vm6, %v1333_v4, %v3254_v19 }
  0xfe   : > { %v3259_v7 = vunpack.i.h.bf16 %v3257_v12  ;;  %v3258_v5 = vunpack.i.l.bf16 %v3257_v12  ;;  %v3274_v35 = vunpack.i.h.bf16 %v3272_v29  ;;  %v3273_v3 = vunpack.i.l.bf16 %v3272_v29  ;;  %p3740_p12 = pnand %p3739_p11, %p3879_p5  ;;  %p3747_p2 = por %p3746_p1, %p3745_p0 }
 0x100   : > { %v1398_v44 = vsel %vm1383_vm7, %v1365_v13, %v3258_v5  ;;  %v1399_v27 = vsel %vm1383_vm7, %v1366_v15, %v3259_v7  ;;  %v1468_v5 = vpack.c.bf16 %v4297_v30, %v4294_v63  ;;  %p3741_p13 = pneg %p3740_p12 }
 0x101   : > { %v3267_v28 = vpop.permute.xlu0 %3266  ;;  %v1431_v24 = vsel %vm1416_vm8, %v1398_v44, %v3263_v26  ;;  %v1432_v55 = vsel %vm1416_vm8, %v1399_v27, %v3264_v25  ;;  %v3282_v61 = vpop.permute.xlu1 %3281 }
 0x102   : > { %v3269_v31 = vunpack.i.h.bf16 %v3267_v28  ;;  %v3268_v14 = vunpack.i.l.bf16 %v3267_v28  ;;  %v1463_v57 = vpack.c.bf16 %v1432_v55, %v1431_v24  ;;  %v3284_v53 = vunpack.i.h.bf16 %v3282_v61  ;;  %v3724_v24 = vld [vmem:[%s3909_s25 + $0xe0] sm:$0xff]  ;;  %p3748_p3 = pnand %p3747_p2, %p3741_p13 }
 0x103   : > { %v3283_v54 = vunpack.i.l.bf16 %v3282_v61  ;;  %v3725_v61 = vld [vmem:[%s3909_s25 + $0xd8] sm:$0xff] }
 0x104   : > { %v1236_v9 = vsel %vm1218_vm2, %v3722_v50, %v3269_v31  ;;  %v1235_v58 = vsel %vm1218_vm2, %v3723_v16, %v3268_v14  ;;  %1752 = vmatmul.mubr.bf16.gmra.mxu0 %v1463_v57 }
 0x105   : > { %v3277_v46 = vpop.permute.xlu0 %3276  ;;  %v3292_v45 = vpop.permute.xlu1 %3291  ;;  %2760 = vmatprep.mubr.msk.bf16.mxu0 %vm1218_vm2, %v1466_v52  ;;  %v1268_v40 = vsel %vm1251_vm3, %v1235_v58, %v3273_v3  ;;  %v1269_v42 = vsel %vm1251_vm3, %v1236_v9, %v3274_v35 }
 0x106   : > { %v3279_v49 = vunpack.i.h.bf16 %v3277_v46  ;;  %v3278_v8 = vunpack.i.l.bf16 %v3277_v46  ;;  %v3294_v10 = vunpack.i.h.bf16 %v3292_v45  ;;  %v3293_v38 = vunpack.i.l.bf16 %v3292_v45 }
 0x108   : > { %v1301_v41 = vsel %vm1284_vm4, %v1268_v40, %v3278_v8  ;;  %v1302_v60 = vsel %vm1284_vm4, %v1269_v42, %v3279_v49 }
 0x109   : > { %v3287_v39 = vpop.permute.xlu0 %3286  ;;  %v3302_v56 = vpop.permute.xlu1 %3301  ;;  %v1334_v17 = vsel %vm1317_vm5, %v1301_v41, %v3283_v54  ;;  %v1335_v47 = vsel %vm1317_vm5, %v1302_v60, %v3284_v53 }
 0x10a   : > { %v3289_v2 = vunpack.i.h.bf16 %v3287_v39  ;;  %v3288_v59 = vunpack.i.l.bf16 %v3287_v39  ;;  %v3304_v25 = vunpack.i.h.bf16 %v3302_v56  ;;  %v3303_v26 = vunpack.i.l.bf16 %v3302_v56 }
 0x10c   : > { %v1367_v6 = vsel %vm1350_vm6, %v1334_v17, %v3288_v59  ;;  %v1368_v62 = vsel %vm1350_vm6, %v1335_v47, %v3289_v2  ;;  %v1238_v55 = vsel %vm1218_vm2, %v3724_v24, %v3304_v25  ;;  %v1237_v52 = vsel %vm1218_vm2, %v3725_v61, %v3303_v26 }
 0x10d   : > { %v3297_v23 = vpop.permute.xlu0 %3296  ;;  %v3312_v19 = vpop.permute.xlu1 %3311  ;;  %v1400_v4 = vsel %vm1383_vm7, %v1367_v6, %v3293_v38  ;;  %v1401_v12 = vsel %vm1383_vm7, %v1368_v62, %v3294_v10  ;;  %v1470_v10 = vpack.c.bf16 %v4347_v43, %v4344_v11 }
 0x10e   : > { %v3299_v0 = vunpack.i.h.bf16 %v3297_v23  ;;  %v3298_v32 = vunpack.i.l.bf16 %v3297_v23  ;;  %v3314_v31 = vunpack.i.h.bf16 %v3312_v19  ;;  %v3313_v14 = vunpack.i.l.bf16 %v3312_v19 }
 0x110   : > { %v1433_v29 = vsel %vm1416_vm8, %v1400_v4, %v3298_v32  ;;  %v1434_v7 = vsel %vm1416_vm8, %v1401_v12, %v3299_v0  ;;  %v3726_v32 = vld [vmem:[%s3909_s25 + $0xf8] sm:$0xff]  ;;  %v3727_v12 = vld [vmem:[%s3909_s25 + $0xf0] sm:$0xff] }
 0x111   : > { %v3307_v13 = vpop.permute.xlu0 %3306  ;;  %v1465_v15 = vpack.c.bf16 %v1434_v7, %v1433_v29  ;;  %v3322_v44 = vpop.permute.xlu1 %3321 }
 0x112   : > { %v3309_v27 = vunpack.i.h.bf16 %v3307_v13  ;;  %v3308_v28 = vunpack.i.l.bf16 %v3307_v13  ;;  %v3324_v58 = vunpack.i.h.bf16 %v3322_v44  ;;  %v3323_v46 = vunpack.i.l.bf16 %v3322_v44 }
 0x113   : > { %1762 = vmatmul.mubr.bf16.gmra.mxu0 %v1465_v15 }
 0x114   : > { %v1271_v57 = vsel %vm1251_vm3, %v1238_v55, %v3309_v27  ;;  %v1270_v35 = vsel %vm1251_vm3, %v1237_v52, %v3308_v28  ;;  %2761 = vmatprep.mubr.msk.bf16.mxu0 %vm1218_vm2, %v1468_v5 }
 0x115   : > { %v3317_v63 = vpop.permute.xlu0 %3316  ;;  %v1303_v9 = vsel %vm1284_vm4, %v1270_v35, %v3313_v14  ;;  %v1304_v16 = vsel %vm1284_vm4, %v1271_v57, %v3314_v31 }
 0x116   : > { %v3319_v30 = vunpack.i.h.bf16 %v3317_v63  ;;  %v3318_v3 = vunpack.i.l.bf16 %v3317_v63  ;;  %v3332_v50 = vpop.permute.xlu1 %3331 }
 0x117   : > { %v3334_v40 = vunpack.i.h.bf16 %v3332_v50  ;;  %v3333_v42 = vunpack.i.l.bf16 %v3332_v50 }
 0x118   : > { %v1336_v45 = vsel %vm1317_vm5, %v1303_v9, %v3318_v3  ;;  %v1337_v49 = vsel %vm1317_vm5, %v1304_v16, %v3319_v30 }
 0x119   : > { %v3327_v8 = vpop.permute.xlu0 %3326  ;;  %v1369_v60 = vsel %vm1350_vm6, %v1336_v45, %v3323_v46  ;;  %v1370_v39 = vsel %vm1350_vm6, %v1337_v49, %v3324_v58 }
 0x11a   : > { %v3329_v53 = vunpack.i.h.bf16 %v3327_v8  ;;  %v3328_v54 = vunpack.i.l.bf16 %v3327_v8  ;;  %v3342_v41 = vpop.permute.xlu1 %3341 }
 0x11b   : > { %v3344_v19 = vunpack.i.h.bf16 %v3342_v41  ;;  %v3343_v0 = vunpack.i.l.bf16 %v3342_v41 }
 0x11c   : > { %v1402_v56 = vsel %vm1383_vm7, %v1369_v60, %v3328_v54  ;;  %v1403_v2 = vsel %vm1383_vm7, %v1370_v39, %v3329_v53  ;;  %v3728_v39 = vld [vmem:[%s3909_s25 + $0x110] sm:$0xff] }
 0x11d   : > { %v3337_v59 = vpop.permute.xlu0 %3336  ;;  %v1435_v17 = vsel %vm1416_vm8, %v1402_v56, %v3333_v42  ;;  %v1436_v47 = vsel %vm1416_vm8, %v1403_v2, %v3334_v40  ;;  %v1472_v40 = vpack.c.bf16 %v4415_v51, %v4412_v1  ;;  %v3729_v2 = vld [vmem:[%s3909_s25 + $0x108] sm:$0xff] }
 0x11e   : > { %v3339_v38 = vunpack.i.h.bf16 %v3337_v59  ;;  %v3338_v6 = vunpack.i.l.bf16 %v3337_v59  ;;  %v1467_v62 = vpack.c.bf16 %v1436_v47, %v1435_v17  ;;  %v3352_v23 = vpop.permute.xlu1 %3351 }
 0x11f   : > { %v3354_v13 = vunpack.i.h.bf16 %v3352_v23  ;;  %v3353_v15 = vunpack.i.l.bf16 %v3352_v23 }
 0x120   : > { %v1240_v4 = vsel %vm1218_vm2, %v3726_v32, %v3339_v38  ;;  %v1239_v25 = vsel %vm1218_vm2, %v3727_v12, %v3338_v6  ;;  %1772 = vmatmul.mubr.bf16.gmra.mxu0 %v1467_v62 }
 0x121   : > { %v3347_v26 = vpop.permute.xlu0 %3346  ;;  %2762 = vmatprep.mubr.msk.bf16.mxu0 %vm1218_vm2, %v1470_v10  ;;  %v1272_v11 = vsel %vm1251_vm3, %v1239_v25, %v3343_v0  ;;  %v1273_v43 = vsel %vm1251_vm3, %v1240_v4, %v3344_v19 }
 0x122   : > { %v3349_v29 = vunpack.i.h.bf16 %v3347_v26  ;;  %v3348_v7 = vunpack.i.l.bf16 %v3347_v26  ;;  %v3362_v5 = vpop.permute.xlu1 %3361 }
 0x123   : > { %v3364_v14 = vunpack.i.h.bf16 %v3362_v5  ;;  %v3363_v57 = vunpack.i.l.bf16 %v3362_v5 }
 0x124   : > { %v1305_v44 = vsel %vm1284_vm4, %v1272_v11, %v3348_v7  ;;  %v1306_v27 = vsel %vm1284_vm4, %v1273_v43, %v3349_v29 }
 0x125   : > { %v3357_v28 = vpop.permute.xlu0 %3356  ;;  %v1338_v52 = vsel %vm1317_vm5, %v1305_v44, %v3353_v15  ;;  %v1339_v31 = vsel %vm1317_vm5, %v1306_v27, %v3354_v13 }
 0x126   : > { %v3359_v24 = vunpack.i.h.bf16 %v3357_v28  ;;  %v3358_v55 = vunpack.i.l.bf16 %v3357_v28  ;;  %v3372_v61 = vpop.permute.xlu1 %3371 }
 0x127   : > { %v3374_v46 = vunpack.i.h.bf16 %v3372_v61  ;;  %v3373_v45 = vunpack.i.l.bf16 %v3372_v61 }
 0x128   : > { %v1371_v35 = vsel %vm1350_vm6, %v1338_v52, %v3358_v55  ;;  %v1372_v63 = vsel %vm1350_vm6, %v1339_v31, %v3359_v24  ;;  %v1474_v55 = vpack.c.bf16 %v4473_v18, %v4467_v33 }
 0x129   : > { %v3367_v30 = vpop.permute.xlu0 %3366  ;;  %v1404_v16 = vsel %vm1383_vm7, %v1371_v35, %v3363_v57  ;;  %v1405_v58 = vsel %vm1383_vm7, %v1372_v63, %v3364_v14  ;;  %v1242_v56 = vsel %vm1218_vm2, %v3728_v39, %v3374_v46  ;;  %v1241_v59 = vsel %vm1218_vm2, %v3729_v2, %v3373_v45  ;;  %v3730_v63 = vld [vmem:[%s3909_s25 + $0x128] sm:$0xff] }
 0x12a   : > { %v3369_v3 = vunpack.i.h.bf16 %v3367_v30  ;;  %v3368_v50 = vunpack.i.l.bf16 %v3367_v30  ;;  %v3382_v9 = vpop.permute.xlu1 %3381 }
 0x12b   : > { %v3384_v17 = vunpack.i.h.bf16 %v3382_v9  ;;  %v3383_v47 = vunpack.i.l.bf16 %v3382_v9 }
 0x12c   : > { %v1437_v49 = vsel %vm1416_vm8, %v1404_v16, %v3368_v50  ;;  %v1438_v8 = vsel %vm1416_vm8, %v1405_v58, %v3369_v3  ;;  %v3731_v3 = vld [vmem:[%s3909_s25 + $0x120] sm:$0xff] }
 0x12d   : > { %v3377_v42 = vpop.permute.xlu0 %3376  ;;  %v1469_v53 = vpack.c.bf16 %v1438_v8, %v1437_v49 }
 0x12e   : > { %v3379_v54 = vunpack.i.h.bf16 %v3377_v42  ;;  %v3378_v41 = vunpack.i.l.bf16 %v3377_v42  ;;  %v3392_v60 = vpop.permute.xlu1 %3391 }
 0x12f   : > { %1782 = vmatmul.mubr.bf16.gmra.mxu0 %v1469_v53  ;;  %v3394_v0 = vunpack.i.h.bf16 %v3392_v60  ;;  %v3393_v32 = vunpack.i.l.bf16 %v3392_v60 }
 0x130   : > { %v1275_v10 = vsel %vm1251_vm3, %v1242_v56, %v3379_v54  ;;  %v1274_v38 = vsel %vm1251_vm3, %v1241_v59, %v3378_v41  ;;  %2763 = vmatprep.mubr.msk.bf16.mxu0 %vm1218_vm2, %v1472_v40 }
 0x131   : > { %v3387_v1 = vpop.permute.xlu0 %3386  ;;  %v1307_v23 = vsel %vm1284_vm4, %v1274_v38, %v3383_v47  ;;  %v1308_v19 = vsel %vm1284_vm4, %v1275_v10, %v3384_v17 }
 0x132   : > { %v3389_v51 = vunpack.i.h.bf16 %v3387_v1  ;;  %v3388_v6 = vunpack.i.l.bf16 %v3387_v1  ;;  %v3402_v62 = vpop.permute.xlu1 %3401 }
 0x133   : > { %v3404_v26 = vunpack.i.h.bf16 %v3402_v62  ;;  %v3403_v29 = vunpack.i.l.bf16 %v3402_v62 }
 0x134   : > { %v1340_v4 = vsel %vm1317_vm5, %v1307_v23, %v3388_v6  ;;  %v1341_v12 = vsel %vm1317_vm5, %v1308_v19, %v3389_v51 }
 0x135   : > { %v3397_v25 = vpop.permute.xlu0 %3396  ;;  %v1373_v43 = vsel %vm1350_vm6, %v1340_v4, %v3393_v32  ;;  %v1374_v13 = vsel %vm1350_vm6, %v1341_v12, %v3394_v0  ;;  %v1476_v32 = vpack.c.bf16 %v4574_v22, %v4571_v34 }
 0x136   : > { %v3399_v7 = vunpack.i.h.bf16 %v3397_v25  ;;  %v3398_v5 = vunpack.i.l.bf16 %v3397_v25  ;;  %v3412_v11 = vpop.permute.xlu1 %3411 }
 0x137   : > { %v3414_v57 = vunpack.i.h.bf16 %v3412_v11  ;;  %v3413_v35 = vunpack.i.l.bf16 %v3412_v11  ;;  %v3733_v11 = vld [vmem:[%s3909_s25 + $0x138] sm:$0xff] }
 0x138   : > { %v1406_v15 = vsel %vm1383_vm7, %v1373_v43, %v3398_v5  ;;  %v1407_v44 = vsel %vm1383_vm7, %v1374_v13, %v3399_v7  ;;  %v3732_v7 = vld [vmem:[%s3909_s25 + $0x140] sm:$0xff] }
 0x139   : > { %v3407_v27 = vpop.permute.xlu0 %3406  ;;  %v1439_v28 = vsel %vm1416_vm8, %v1406_v15, %v3403_v29  ;;  %v1440_v24 = vsel %vm1416_vm8, %v1407_v44, %v3404_v26 }
 0x13a   : > { %v3409_v61 = vunpack.i.h.bf16 %v3407_v27  ;;  %v3408_v52 = vunpack.i.l.bf16 %v3407_v27  ;;  %v1471_v31 = vpack.c.bf16 %v1440_v24, %v1439_v28  ;;  %v3422_v14 = vpop.permute.xlu1 %3421 }
 0x13b   : > { %v3424_v45 = vunpack.i.h.bf16 %v3422_v14  ;;  %v3423_v49 = vunpack.i.l.bf16 %v3422_v14 }
 0x13c   : > { %v1244_v30 = vsel %vm1218_vm2, %v3730_v63, %v3409_v61  ;;  %v1243_v50 = vsel %vm1218_vm2, %v3731_v3, %v3408_v52  ;;  %1792 = vmatmul.mubr.bf16.gmra.mxu0 %v1471_v31 }
 0x13d   : > { %v3417_v9 = vpop.permute.xlu0 %3416  ;;  %2764 = vmatprep.mubr.msk.bf16.mxu0 %vm1218_vm2, %v1474_v55  ;;  %v1276_v33 = vsel %vm1251_vm3, %v1243_v50, %v3413_v35  ;;  %v1277_v18 = vsel %vm1251_vm3, %v1244_v30, %v3414_v57 }
 0x13e   : > { %v3419_v16 = vunpack.i.h.bf16 %v3417_v9  ;;  %v3418_v58 = vunpack.i.l.bf16 %v3417_v9  ;;  %v3432_v46 = vpop.permute.xlu1 %3431 }
 0x13f   : > { %v3434_v56 = vunpack.i.h.bf16 %v3432_v46  ;;  %v3433_v2 = vunpack.i.l.bf16 %v3432_v46 }
 0x140   : > { %v1309_v8 = vsel %vm1284_vm4, %v1276_v33, %v3418_v58  ;;  %v1310_v40 = vsel %vm1284_vm4, %v1277_v18, %v3419_v16 }
 0x141   : > { %v3427_v42 = vpop.permute.xlu0 %3426  ;;  %v1342_v60 = vsel %vm1317_vm5, %v1309_v8, %v3423_v49  ;;  %v1343_v39 = vsel %vm1317_vm5, %v1310_v40, %v3424_v45  ;;  %v1478_v8 = vpack.c.bf16 %v4643_v48, %v4625_v36 }
 0x142   : > { %v3429_v53 = vunpack.i.h.bf16 %v3427_v42  ;;  %v3428_v54 = vunpack.i.l.bf16 %v3427_v42  ;;  %v3442_v41 = vpop.permute.xlu1 %3441 }
 0x143   : > { %v3444_v62 = vunpack.i.h.bf16 %v3442_v41  ;;  %v3443_v23 = vunpack.i.l.bf16 %v3442_v41 }
 0x144   : > { %v1375_v59 = vsel %vm1350_vm6, %v1342_v60, %v3428_v54  ;;  %v1376_v17 = vsel %vm1350_vm6, %v1343_v39, %v3429_v53  ;;  %v3734_v39 = vld [vmem:[%s3909_s25 + $0x158] sm:$0xff] }
 0x145   : > { %v3437_v47 = vpop.permute.xlu0 %3436  ;;  %v1408_v51 = vsel %vm1383_vm7, %v1375_v59, %v3433_v2  ;;  %v1409_v6 = vsel %vm1383_vm7, %v1376_v17, %v3434_v56  ;;  %v1246_v5 = vsel %vm1218_vm2, %v3732_v7, %v3444_v62  ;;  %v1245_v43 = vsel %vm1218_vm2, %v3733_v11, %v3443_v23  ;;  %v3735_v2 = vld [vmem:[%s3909_s25 + $0x150] sm:$0xff] }
 0x146   : > { %v3439_v10 = vunpack.i.h.bf16 %v3437_v47  ;;  %v3438_v38 = vunpack.i.l.bf16 %v3437_v47  ;;  %v3452_v1 = vpop.permute.xlu1 %3451  ;;  %v1501_v47 = vlaneseq }
 0x147   : > { %v3454_v13 = vunpack.i.h.bf16 %v3452_v1  ;;  %v3453_v15 = vunpack.i.l.bf16 %v3452_v1 }
 0x148   : > { %v1441_v19 = vsel %vm1416_vm8, %v1408_v51, %v3438_v38  ;;  %v1442_v0 = vsel %vm1416_vm8, %v1409_v6, %v3439_v10 }
 0x149   : > { %v3447_v4 = vpop.permute.xlu0 %3446  ;;  %v1473_v12 = vpack.c.bf16 %v1442_v0, %v1441_v19  ;;  %v1502_v0 = vshrl.u32 %v1501_v47, 7 }
 0x14a   : > { %v3449_v25 = vunpack.i.h.bf16 %v3447_v4  ;;  %v3448_v26 = vunpack.i.l.bf16 %v3447_v4  ;;  %v3462_v29 = vpop.permute.xlu1 %3461 }
 0x14b   : > { %1802 = vmatmul.mubr.bf16.gmra.mxu0 %v1473_v12  ;;  %v3464_v52 = vunpack.i.h.bf16 %v3462_v29  ;;  %v3463_v31 = vunpack.i.l.bf16 %v3462_v29 }
 0x14c   : > { %v1279_v44 = vsel %vm1251_vm3, %v1246_v5, %v3449_v25  ;;  %v1278_v27 = vsel %vm1251_vm3, %v1245_v43, %v3448_v26  ;;  %2765 = vmatprep.mubr.msk.bf16.mxu0 %vm1218_vm2, %v1476_v32  ;;  %v1507_v43 = vsub.s32 1, %v1502_v0 }
 0x14d   : > { %v3457_v34 = vpop.permute.xlu0 %3456  ;;  %v1311_v55 = vsel %vm1284_vm4, %v1278_v27, %v3453_v15  ;;  %v1312_v61 = vsel %vm1284_vm4, %v1279_v44, %v3454_v13  ;;  %v1503_v15 = vsub.s32 0, %v1502_v0 }
 0x14e   : > { %v3459_v22 = vunpack.i.h.bf16 %v3457_v34  ;;  %v3458_v28 = vunpack.i.l.bf16 %v3457_v34  ;;  %v3472_v24 = vpop.permute.xlu1 %3471  ;;  %v1499_v34 = vld [vmem:[%s5312_s2] sm:$0x3] }
 0x14f   : > { %v3474_v63 = vunpack.i.h.bf16 %v3472_v24  ;;  %v3473_v30 = vunpack.i.l.bf16 %v3472_v24 }
 0x150   : > { %v1344_v14 = vsel %vm1317_vm5, %v1311_v55, %v3458_v28  ;;  %v1345_v57 = vsel %vm1317_vm5, %v1312_v61, %v3459_v22 }
 0x151   : > { %v3467_v35 = vpop.permute.xlu0 %3466  ;;  %v1377_v16 = vsel %vm1350_vm6, %v1344_v14, %v3463_v31  ;;  %v1378_v58 = vsel %vm1350_vm6, %v1345_v57, %v3464_v52  ;;  %v4839_v31 = vrot.slane %v1499_v34, %v1507_v43 }
 0x152   : > { %v3469_v3 = vunpack.i.h.bf16 %v3467_v35  ;;  %v3468_v50 = vunpack.i.l.bf16 %v3467_v35  ;;  %v3482_v9 = vpop.permute.xlu1 %3481  ;;  %v4843_v35 = vrot.slane %v1499_v34, %v1503_v15 }
 0x153   : > { %v3484_v41 = vunpack.i.h.bf16 %v3482_v9  ;;  %v3483_v60 = vunpack.i.l.bf16 %v3482_v9 }
 0x154   : > { %v1410_v46 = vsel %vm1383_vm7, %v1377_v16, %v3468_v50  ;;  %v1411_v33 = vsel %vm1383_vm7, %v1378_v58, %v3469_v3  ;;  %v3736_v58 = vld [vmem:[%s3909_s25 + $0x170] sm:$0xff] }
 0x155   : > { %v3477_v18 = vpop.permute.xlu0 %3476  ;;  %v1443_v45 = vsel %vm1416_vm8, %v1410_v46, %v3473_v30  ;;  %v1444_v49 = vsel %vm1416_vm8, %v1411_v33, %v3474_v63  ;;  %v3737_v33 = vld [vmem:[%s3909_s25 + $0x168] sm:$0xff] }
 0x156   : > { %v3479_v40 = vunpack.i.h.bf16 %v3477_v18  ;;  %v3478_v42 = vunpack.i.l.bf16 %v3477_v18  ;;  %v1475_v53 = vpack.c.bf16 %v1444_v49, %v1443_v45  ;;  %v3492_v54 = vpop.permute.xlu1 %3491 }
 0x157   : > { %v3494_v51 = vunpack.i.h.bf16 %v3492_v54  ;;  %v3493_v6 = vunpack.i.l.bf16 %v3492_v54 }
 0x158   : > { %v1248_v56 = vsel %vm1218_vm2, %v3734_v39, %v3479_v40  ;;  %v1247_v59 = vsel %vm1218_vm2, %v3735_v2, %v3478_v42  ;;  %1812 = vmatmul.mubr.bf16.gmra.mxu0 %v1475_v53 }
 0x159   : > { %v3487_v17 = vpop.permute.xlu0 %3486  ;;  %2766 = vmatprep.mubr.msk.bf16.mxu0 %vm1218_vm2, %v1478_v8  ;;  %v1280_v48 = vsel %vm1251_vm3, %v1247_v59, %v3483_v60  ;;  %v1281_v1 = vsel %vm1251_vm3, %v1248_v56, %v3484_v41 }
 0x15a   : > { %v3489_v10 = vunpack.i.h.bf16 %v3487_v17  ;;  %v3488_v38 = vunpack.i.l.bf16 %v3487_v17  ;;  %v3502_v36 = vpop.permute.xlu1 %3501 }
 0x15b   : > { %v3504_v29 = vunpack.i.h.bf16 %v3502_v36  ;;  %v3503_v7 = vunpack.i.l.bf16 %v3502_v36 }
 0x15c   : > { %v1313_v62 = vsel %vm1284_vm4, %v1280_v48, %v3488_v38  ;;  %v1314_v23 = vsel %vm1284_vm4, %v1281_v1, %v3489_v10 }
 0x15d   : > { %v3497_v19 = vpop.permute.xlu0 %3496  ;;  %v1346_v25 = vsel %vm1317_vm5, %v1313_v62, %v3493_v6  ;;  %v1347_v26 = vsel %vm1317_vm5, %v1314_v23, %v3494_v51 }
 0x15e   : > { %v3499_v32 = vunpack.i.h.bf16 %v3497_v19  ;;  %v3498_v4 = vunpack.i.l.bf16 %v3497_v19  ;;  %v3512_v12 = vpop.permute.xlu1 %3511 }
 0x15f   : > { %v3514_v55 = vunpack.i.h.bf16 %v3512_v12  ;;  %v3513_v61 = vunpack.i.l.bf16 %v3512_v12 }
 0x160   : > { %v1379_v5 = vsel %vm1350_vm6, %v1346_v25, %v3498_v4  ;;  %v1380_v11 = vsel %vm1350_vm6, %v1347_v26, %v3499_v32 }
 0x161   : > { %v3507_v13 = vpop.permute.xlu0 %3506  ;;  %v1412_v28 = vsel %vm1383_vm7, %v1379_v5, %v3503_v7  ;;  %v1413_v24 = vsel %vm1383_vm7, %v1380_v11, %v3504_v29  ;;  %v1250_v46 = vsel %vm1218_vm2, %v3736_v58, %v3514_v55  ;;  %v1249_v18 = vsel %vm1218_vm2, %v3737_v33, %v3513_v61 }
 0x162   : > { %v3509_v44 = vunpack.i.h.bf16 %v3507_v13  ;;  %v3508_v27 = vunpack.i.l.bf16 %v3507_v13  ;;  %v3522_v22 = vpop.permute.xlu1 %3521 }
 0x163   : > { %v1683_v52 = vpop.f32.mrf.mxu0  ;;  %v3524_v45 = vunpack.i.h.bf16 %v3522_v22  ;;  %v3523_v49 = vunpack.i.l.bf16 %v3522_v22 }
 0x164   : > { %v1445_v14 = vsel %vm1416_vm8, %v1412_v28, %v3508_v27  ;;  %v1446_v57 = vsel %vm1416_vm8, %v1413_v24, %v3509_v44  ;;  %v1684_v41 = vadd.f32 %v1683_v52, %v4843_v35 }
 0x165   : > { %v3517_v63 = vpop.permute.xlu0 %3516  ;;  %v1685_v30 = vpop.f32.mrf.mxu0  ;;  %v1477_v3 = vpack.c.bf16 %v1446_v57, %v1445_v14 }
 0x166   : > { %v3519_v50 = vunpack.i.h.bf16 %v3517_v63  ;;  %v3518_v9 = vunpack.i.l.bf16 %v3517_v63  ;;  %v3532_v16 = vpop.permute.xlu1 %3531  ;;  %v1686_v53 = vadd.f32 %v1685_v30, %v4839_v31  ;;  %v1842_v51 = vmax.f32 %v1684_v41, 0.0 }
 0x167   : > { %v1687_v8 = vpop.f32.mrf.mxu0  ;;  %1822 = vmatmul.mubr.bf16.gmra.mxu0 %v1477_v3  ;;  %v3534_v17 = vunpack.i.h.bf16 %v3532_v16  ;;  %v3533_v48 = vunpack.i.l.bf16 %v3532_v16 }
 0x168   : > { %v1283_v40 = vsel %vm1251_vm3, %v1250_v46, %v3519_v50  ;;  %v1282_v42 = vsel %vm1251_vm3, %v1249_v18, %v3518_v9  ;;  %v1688_v54 = vadd.f32 %v1687_v8, %v4843_v35  ;;  %2767 = vmatprep.mubr.msk.bf16.mxu0 %vm1218_vm2, %v1480_v37  ;;  %v1843_v1 = vmax.f32 %v1686_v53, 0.0 }
 0x169   : > { %v3527_v60 = vpop.permute.xlu0 %3526  ;;  %v1689_v39 = vpop.f32.mrf.mxu0  ;;  %v1315_v10 = vsel %vm1284_vm4, %v1282_v42, %v3523_v49  ;;  %v1316_v38 = vsel %vm1284_vm4, %v1283_v40, %v3524_v45 }
 0x16a   : > { %v3529_v56 = vunpack.i.h.bf16 %v3527_v60  ;;  %v3528_v2 = vunpack.i.l.bf16 %v3527_v60  ;;  %v1690_v59 = vadd.f32 %v1689_v39, %v4839_v31  ;;  %v3542_v47 = vpop.permute.xlu1 %3541  ;;  %v1844_v36 = vmax.f32 %v1688_v54, 0.0 }
 0x16b   : > { %v3544_v62 = vunpack.i.h.bf16 %v3542_v47  ;;  %v3543_v23 = vunpack.i.l.bf16 %v3542_v47 }
 0x16c   : > { %v1348_v20 = vsel %vm1317_vm5, %v1315_v10, %v3528_v2  ;;  %v1349_v21 = vsel %vm1317_vm5, %v1316_v38, %v3529_v56  ;;  %v1845_v37 = vmax.f32 %v1690_v59, 0.0  ;;  %v1906_v4 = vpack.c.bf16 %v1844_v36, %v1842_v51 }
 0x16d   : > { %v3537_v6 = vpop.permute.xlu0 %3536  ;;  %v1381_v12 = vsel %vm1350_vm6, %v1348_v20, %v3533_v48  ;;  %v1382_v25 = vsel %vm1350_vm6, %v1349_v21, %v3534_v17 }
 0x16e   : > { %v3539_v19 = vunpack.i.h.bf16 %v3537_v6  ;;  %v3538_v0 = vunpack.i.l.bf16 %v3537_v6  ;;  %v1907_v32 = vpack.c.bf16 %v1845_v37, %v1843_v1 }
 0x170   : > { %v1414_v26 = vsel %vm1383_vm7, %v1381_v12, %v3538_v0  ;;  %v1415_v29 = vsel %vm1383_vm7, %v1382_v25, %v3539_v19  ;;  %v1693_v7 = vpop.f32.mrf.mxu0  ;;  %2105 = vmatprep.mubr.bf16.mxu1 %v1907_v32 }
 0x171   : > { %2106 = vmatmul.mubr.bf16.vlgmr.msra.gmra.mxu1 %v1906_v4  ;;  %v1447_v5 = vsel %vm1416_vm8, %v1414_v26, %v3543_v23  ;;  %v1448_v11 = vsel %vm1416_vm8, %v1415_v29, %v3544_v62  ;;  %v1694_v34 = vadd.f32 %v1693_v7, %v4843_v35 }
 0x172   : > { %v1695_v43 = vpop.f32.mrf.mxu0  ;;  %v1479_v13 = vpack.c.bf16 %v1448_v11, %v1447_v5 }
 0x173   : > { %v1696_v44 = vadd.f32 %v1695_v43, %v4839_v31  ;;  %v1846_v52 = vmax.f32 %v1694_v34, 0.0 }
 0x174   : > { %v1697_v15 = vpop.f32.mrf.mxu0  ;;  %1832 = vmatmul.mubr.bf16.gmra.mxu0 %v1479_v13 }
 0x175   : > { %v1698_v27 = vadd.f32 %v1697_v15, %v4843_v35  ;;  %v1847_v55 = vmax.f32 %v1696_v44, 0.0 }
 0x176   : > { %v1699_v22 = vpop.f32.mrf.mxu0 }
 0x177   : > { %v1700_v28 = vadd.f32 %v1699_v22, %v4839_v31  ;;  %v1848_v24 = vmax.f32 %v1698_v27, 0.0 }
 0x179   : > { %v1849_v61 = vmax.f32 %v1700_v28, 0.0  ;;  %v1908_v57 = vpack.c.bf16 %v1848_v24, %v1846_v52 }
 0x17b   : > { %v1909_v14 = vpack.c.bf16 %v1849_v61, %v1847_v55 }
 0x17d   : > { %2113 = vmatprep.mubr.bf16.mxu1 %v1909_v14 }
 0x17e   : > { %2114 = vmatmul.mubr.bf16.gmra.mxu1 %v1908_v57 }
 0x17f   : > { %v1703_v63 = vpop.f32.mrf.mxu0 }
 0x180   : > { %v1704_v16 = vadd.f32 %v1703_v63, %v4843_v35 }
 0x181   : > { %v1705_v30 = vpop.f32.mrf.mxu0 }
 0x182   : > { %v1706_v50 = vadd.f32 %v1705_v30, %v4839_v31  ;;  %v1850_v49 = vmax.f32 %v1704_v16, 0.0 }
 0x183   : > { %v1707_v3 = vpop.f32.mrf.mxu0 }
 0x184   : > { %v1708_v9 = vadd.f32 %v1707_v3, %v4843_v35  ;;  %v1851_v18 = vmax.f32 %v1706_v50, 0.0 }
 0x185   : > { %v1709_v58 = vpop.f32.mrf.mxu0 }
 0x186   : > { %v1710_v46 = vadd.f32 %v1709_v58, %v4839_v31  ;;  %v1852_v33 = vmax.f32 %v1708_v9, 0.0 }
 0x188   : > { %v1853_v45 = vmax.f32 %v1710_v46, 0.0  ;;  %v1910_v40 = vpack.c.bf16 %v1852_v33, %v1850_v49 }
 0x18a   : > { %v1911_v8 = vpack.c.bf16 %v1853_v45, %v1851_v18 }
 0x18c   : > { %v1713_v42 = vpop.f32.mrf.mxu0  ;;  %2121 = vmatprep.mubr.bf16.mxu1 %v1911_v8 }
 0x18d   : > { %2122 = vmatmul.mubr.bf16.gmra.mxu1 %v1910_v40  ;;  %v1714_v39 = vadd.f32 %v1713_v42, %v4843_v35 }
 0x18e   : > { %v1715_v53 = vpop.f32.mrf.mxu0 }
 0x18f   : > { %v1716_v41 = vadd.f32 %v1715_v53, %v4839_v31  ;;  %v1854_v10 = vmax.f32 %v1714_v39, 0.0 }
 0x190   : > { %v1717_v54 = vpop.f32.mrf.mxu0 }
 0x191   : > { %v1718_v60 = vadd.f32 %v1717_v54, %v4843_v35  ;;  %v1855_v17 = vmax.f32 %v1716_v41, 0.0 }
 0x192   : > { %v1719_v56 = vpop.f32.mrf.mxu0 }
 0x193   : > { %v1720_v2 = vadd.f32 %v1719_v56, %v4839_v31  ;;  %v1856_v59 = vmax.f32 %v1718_v60, 0.0 }
 0x195   : > { %v1857_v47 = vmax.f32 %v1720_v2, 0.0  ;;  %v1912_v36 = vpack.c.bf16 %v1856_v59, %v1854_v10 }
 0x197   : > { %v1913_v38 = vpack.c.bf16 %v1857_v47, %v1855_v17 }
 0x199   : > { %2129 = vmatprep.mubr.bf16.mxu1 %v1913_v38 }
 0x19a   : > { %2130 = vmatmul.mubr.bf16.gmra.mxu1 %v1912_v36 }
 0x19b   : > { %v1723_v48 = vpop.f32.mrf.mxu0 }
 0x19c   : > { %v1724_v51 = vadd.f32 %v1723_v48, %v4843_v35 }
 0x19d   : > { %v1725_v1 = vpop.f32.mrf.mxu0 }
 0x19e   : > { %v1726_v21 = vadd.f32 %v1725_v1, %v4839_v31  ;;  %v1858_v32 = vmax.f32 %v1724_v51, 0.0 }
 0x19f   : > { %v1727_v20 = vpop.f32.mrf.mxu0 }
 0x1a0   : > { %v1728_v37 = vadd.f32 %v1727_v20, %v4843_v35  ;;  %v1859_v19 = vmax.f32 %v1726_v21, 0.0 }
 0x1a1   : > { %v1729_v6 = vpop.f32.mrf.mxu0 }
 0x1a2   : > { %v1730_v62 = vadd.f32 %v1729_v6, %v4839_v31  ;;  %v1860_v23 = vmax.f32 %v1728_v37, 0.0 }
 0x1a4   : > { %v1861_v0 = vmax.f32 %v1730_v62, 0.0  ;;  %v1914_v12 = vpack.c.bf16 %v1860_v23, %v1858_v32 }
 0x1a6   : > { %v1915_v4 = vpack.c.bf16 %v1861_v0, %v1859_v19 }
 0x1a8   : > { %v1733_v25 = vpop.f32.mrf.mxu0  ;;  %2137 = vmatprep.mubr.bf16.mxu1 %v1915_v4 }
 0x1a9   : > { %2138 = vmatmul.mubr.bf16.gmra.mxu1 %v1914_v12  ;;  %v1734_v11 = vadd.f32 %v1733_v25, %v4843_v35 }
 0x1aa   : > { %v1735_v26 = vpop.f32.mrf.mxu0 }
 0x1ab   : > { %v1736_v7 = vadd.f32 %v1735_v26, %v4839_v31  ;;  %v1862_v34 = vmax.f32 %v1734_v11, 0.0 }
 0x1ac   : > { %v1737_v29 = vpop.f32.mrf.mxu0 }
 0x1ad   : > { %v1738_v5 = vadd.f32 %v1737_v29, %v4843_v35  ;;  %v1863_v44 = vmax.f32 %v1736_v7, 0.0 }
 0x1ae   : > { %v1739_v43 = vpop.f32.mrf.mxu0 }
 0x1af   : > { %v1740_v13 = vadd.f32 %v1739_v43, %v4839_v31  ;;  %v1864_v15 = vmax.f32 %v1738_v5, 0.0 }
 0x1b1   : > { %v1865_v27 = vmax.f32 %v1740_v13, 0.0  ;;  %v1916_v28 = vpack.c.bf16 %v1864_v15, %v1862_v34 }
 0x1b3   : > { %v1917_v22 = vpack.c.bf16 %v1865_v27, %v1863_v44 }
 0x1b5   : > { %2145 = vmatprep.mubr.bf16.mxu1 %v1917_v22 }
 0x1b6   : > { %2146 = vmatmul.mubr.bf16.gmra.mxu1 %v1916_v28 }
 0x1b7   : > { %v1743_v24 = vpop.f32.mrf.mxu0 }
 0x1b8   : > { %v1744_v57 = vadd.f32 %v1743_v24, %v4843_v35 }
 0x1b9   : > { %v1745_v55 = vpop.f32.mrf.mxu0 }
 0x1ba   : > { %v1746_v52 = vadd.f32 %v1745_v55, %v4839_v31  ;;  %v1866_v16 = vmax.f32 %v1744_v57, 0.0 }
 0x1bb   : > { %v1747_v61 = vpop.f32.mrf.mxu0 }
 0x1bc   : > { %v1748_v14 = vadd.f32 %v1747_v61, %v4843_v35  ;;  %v1867_v50 = vmax.f32 %v1746_v52, 0.0 }
 0x1bd   : > { %v1749_v63 = vpop.f32.mrf.mxu0 }
 0x1be   : > { %v1750_v30 = vadd.f32 %v1749_v63, %v4839_v31  ;;  %v1868_v3 = vmax.f32 %v1748_v14, 0.0 }
 0x1c0   : > { %v1869_v9 = vmax.f32 %v1750_v30, 0.0  ;;  %v1918_v46 = vpack.c.bf16 %v1868_v3, %v1866_v16 }
 0x1c2   : > { %v1919_v58 = vpack.c.bf16 %v1869_v9, %v1867_v50 }
 0x1c4   : > { %v1753_v33 = vpop.f32.mrf.mxu0  ;;  %2153 = vmatprep.mubr.bf16.mxu1 %v1919_v58 }
 0x1c5   : > { %2154 = vmatmul.mubr.bf16.gmra.mxu1 %v1918_v46  ;;  %v1754_v40 = vadd.f32 %v1753_v33, %v4843_v35 }
 0x1c6   : > { %v1755_v18 = vpop.f32.mrf.mxu0 }
 0x1c7   : > { %v1756_v49 = vadd.f32 %v1755_v18, %v4839_v31  ;;  %v1870_v39 = vmax.f32 %v1754_v40, 0.0 }
 0x1c8   : > { %v1757_v45 = vpop.f32.mrf.mxu0 }
 0x1c9   : > { %v1758_v8 = vadd.f32 %v1757_v45, %v4843_v35  ;;  %v1871_v41 = vmax.f32 %v1756_v49, 0.0 }
 0x1ca   : > { %v1759_v42 = vpop.f32.mrf.mxu0 }
 0x1cb   : > { %v1760_v53 = vadd.f32 %v1759_v42, %v4839_v31  ;;  %v1872_v54 = vmax.f32 %v1758_v8, 0.0 }
 0x1cd   : > { %v1873_v60 = vmax.f32 %v1760_v53, 0.0  ;;  %v1920_v2 = vpack.c.bf16 %v1872_v54, %v1870_v39 }
 0x1cf   : > { %v1921_v56 = vpack.c.bf16 %v1873_v60, %v1871_v41 }
 0x1d1   : > { %2161 = vmatprep.mubr.bf16.mxu1 %v1921_v56 }
 0x1d2   : > { %2162 = vmatmul.mubr.bf16.gmra.mxu1 %v1920_v2 }
 0x1d3   : > { %v1763_v59 = vpop.f32.mrf.mxu0 }
 0x1d4   : > { %v1764_v36 = vadd.f32 %v1763_v59, %v4843_v35 }
 0x1d5   : > { %v1765_v17 = vpop.f32.mrf.mxu0 }
 0x1d6   : > { %v1766_v10 = vadd.f32 %v1765_v17, %v4839_v31  ;;  %v1874_v51 = vmax.f32 %v1764_v36, 0.0 }
 0x1d7   : > { %v1767_v47 = vpop.f32.mrf.mxu0 }
 0x1d8   : > { %v1768_v38 = vadd.f32 %v1767_v47, %v4843_v35  ;;  %v1875_v21 = vmax.f32 %v1766_v10, 0.0 }
 0x1d9   : > { %v1769_v48 = vpop.f32.mrf.mxu0 }
 0x1da   : > { %v1770_v1 = vadd.f32 %v1769_v48, %v4839_v31  ;;  %v1876_v20 = vmax.f32 %v1768_v38, 0.0 }
 0x1dc   : > { %v1877_v37 = vmax.f32 %v1770_v1, 0.0  ;;  %v1922_v62 = vpack.c.bf16 %v1876_v20, %v1874_v51 }
 0x1de   : > { %v1923_v6 = vpack.c.bf16 %v1877_v37, %v1875_v21 }
 0x1e0   : > { %v1773_v23 = vpop.f32.mrf.mxu0  ;;  %2169 = vmatprep.mubr.bf16.mxu1 %v1923_v6 }
 0x1e1   : > { %2170 = vmatmul.mubr.bf16.gmra.mxu1 %v1922_v62  ;;  %v1774_v12 = vadd.f32 %v1773_v23, %v4843_v35 }
 0x1e2   : > { %v1775_v19 = vpop.f32.mrf.mxu0 }
 0x1e3   : > { %v1776_v32 = vadd.f32 %v1775_v19, %v4839_v31  ;;  %v1878_v11 = vmax.f32 %v1774_v12, 0.0 }
 0x1e4   : > { %v1777_v0 = vpop.f32.mrf.mxu0 }
 0x1e5   : > { %v1778_v4 = vadd.f32 %v1777_v0, %v4843_v35  ;;  %v1879_v7 = vmax.f32 %v1776_v32, 0.0 }
 0x1e6   : > { %v1779_v25 = vpop.f32.mrf.mxu0 }
 0x1e7   : > { %v1780_v26 = vadd.f32 %v1779_v25, %v4839_v31  ;;  %v1880_v29 = vmax.f32 %v1778_v4, 0.0 }
 0x1e9   : > { %v1881_v5 = vmax.f32 %v1780_v26, 0.0  ;;  %v1924_v13 = vpack.c.bf16 %v1880_v29, %v1878_v11 }
 0x1eb   : > { %v1925_v43 = vpack.c.bf16 %v1881_v5, %v1879_v7 }
 0x1ed   : > { %2177 = vmatprep.mubr.bf16.mxu1 %v1925_v43 }
 0x1ee   : > { %2178 = vmatmul.mubr.bf16.gmra.mxu1 %v1924_v13 }
 0x1ef   : > { %v1783_v15 = vpop.f32.mrf.mxu0 }
 0x1f0   : > { %v1784_v28 = vadd.f32 %v1783_v15, %v4843_v35 }
 0x1f1   : > { %v1785_v44 = vpop.f32.mrf.mxu0 }
 0x1f2   : > { %v1786_v34 = vadd.f32 %v1785_v44, %v4839_v31  ;;  %v1882_v57 = vmax.f32 %v1784_v28, 0.0 }
 0x1f3   : > { %v1787_v27 = vpop.f32.mrf.mxu0 }
 0x1f4   : > { %v1788_v22 = vadd.f32 %v1787_v27, %v4843_v35  ;;  %v1883_v52 = vmax.f32 %v1786_v34, 0.0 }
 0x1f5   : > { %v1789_v24 = vpop.f32.mrf.mxu0 }
 0x1f6   : > { %v1790_v55 = vadd.f32 %v1789_v24, %v4839_v31  ;;  %v1884_v61 = vmax.f32 %v1788_v22, 0.0 }
 0x1f8   : > { %v1885_v14 = vmax.f32 %v1790_v55, 0.0  ;;  %v1926_v30 = vpack.c.bf16 %v1884_v61, %v1882_v57 }
 0x1fa   : > { %v1927_v63 = vpack.c.bf16 %v1885_v14, %v1883_v52  ;;  %v4928_v52 = vld [vmem:[%s5314_s4] ss:$0 sm:$0xff] }
 0x1fc   : > { %v1793_v3 = vpop.f32.mrf.mxu0  ;;  %2185 = vmatprep.mubr.bf16.mxu1 %v1927_v63 }
 0x1fd   : > { %2186 = vmatmul.mubr.bf16.gmra.mxu1 %v1926_v30  ;;  %v1794_v46 = vadd.f32 %v1793_v3, %v4843_v35 }
 0x1fe   : > { %v1795_v50 = vpop.f32.mrf.mxu0 }
 0x1ff   : > { %v1796_v16 = vadd.f32 %v1795_v50, %v4839_v31  ;;  %v1886_v40 = vmax.f32 %v1794_v46, 0.0 }
 0x200   : > { %v1797_v9 = vpop.f32.mrf.mxu0 }
 0x201   : > { %v1798_v58 = vadd.f32 %v1797_v9, %v4843_v35  ;;  %v1887_v49 = vmax.f32 %v1796_v16, 0.0 }
 0x202   : > { %v1799_v33 = vpop.f32.mrf.mxu0 }
 0x203   : > { %v1800_v18 = vadd.f32 %v1799_v33, %v4839_v31  ;;  %v1888_v45 = vmax.f32 %v1798_v58, 0.0 }
 0x205   : > { %v1889_v8 = vmax.f32 %v1800_v18, 0.0  ;;  %v1928_v53 = vpack.c.bf16 %v1888_v45, %v1886_v40 }
 0x207   : > { %v1929_v42 = vpack.c.bf16 %v1889_v8, %v1887_v49 }
 0x209   : > { %2193 = vmatprep.mubr.bf16.mxu1 %v1929_v42 }
 0x20a   : > { %2194 = vmatmul.mubr.bf16.gmra.mxu1 %v1928_v53 }
 0x20b   : > { %v1803_v54 = vpop.f32.mrf.mxu0 }
 0x20c   : > { %v1804_v2 = vadd.f32 %v1803_v54, %v4843_v35 }
 0x20d   : > { %v1805_v41 = vpop.f32.mrf.mxu0 }
 0x20e   : > { %v1806_v39 = vadd.f32 %v1805_v41, %v4839_v31  ;;  %v1890_v36 = vmax.f32 %v1804_v2, 0.0 }
 0x20f   : > { %v1807_v60 = vpop.f32.mrf.mxu0 }
 0x210   : > { %v1808_v56 = vadd.f32 %v1807_v60, %v4843_v35  ;;  %v1891_v10 = vmax.f32 %v1806_v39, 0.0 }
 0x211   : > { %v1809_v59 = vpop.f32.mrf.mxu0 }
 0x212   : > { %v1810_v17 = vadd.f32 %v1809_v59, %v4839_v31  ;;  %v1892_v47 = vmax.f32 %v1808_v56, 0.0 }
 0x214   : > { %v1893_v38 = vmax.f32 %v1810_v17, 0.0  ;;  %v1930_v1 = vpack.c.bf16 %v1892_v47, %v1890_v36 }
 0x216   : > { %v1931_v48 = vpack.c.bf16 %v1893_v38, %v1891_v10 }
 0x218   : > { %v1813_v20 = vpop.f32.mrf.mxu0  ;;  %2201 = vmatprep.mubr.bf16.mxu1 %v1931_v48 }
 0x219   : > { %2202 = vmatmul.mubr.bf16.gmra.mxu1 %v1930_v1  ;;  %v1814_v62 = vadd.f32 %v1813_v20, %v4843_v35 }
 0x21a   : > { %v1815_v21 = vpop.f32.mrf.mxu0 }
 0x21b   : > { %v1816_v51 = vadd.f32 %v1815_v21, %v4839_v31  ;;  %v1894_v12 = vmax.f32 %v1814_v62, 0.0 }
 0x21c   : > { %v1817_v37 = vpop.f32.mrf.mxu0 }
 0x21d   : > { %v1818_v6 = vadd.f32 %v1817_v37, %v4843_v35  ;;  %v1895_v32 = vmax.f32 %v1816_v51, 0.0 }
 0x21e   : > { %v1819_v23 = vpop.f32.mrf.mxu0 }
 0x21f   : > { %v1820_v19 = vadd.f32 %v1819_v23, %v4839_v31  ;;  %v1896_v0 = vmax.f32 %v1818_v6, 0.0 }
 0x221   : > { %v1897_v4 = vmax.f32 %v1820_v19, 0.0  ;;  %v1932_v26 = vpack.c.bf16 %v1896_v0, %v1894_v12 }
 0x223   : > { %v1933_v25 = vpack.c.bf16 %v1897_v4, %v1895_v32 }
 0x225   : > { %2209 = vmatprep.mubr.bf16.mxu1 %v1933_v25 }
 0x226   : > { %2210 = vmatmul.mubr.bf16.gmra.mxu1 %v1932_v26 }
 0x227   : > { %v1823_v29 = vpop.f32.mrf.mxu0 }
 0x228   : > { %v1824_v13 = vadd.f32 %v1823_v29, %v4843_v35 }
 0x229   : > { %v1825_v7 = vpop.f32.mrf.mxu0 }
 0x22a   : > { %v1826_v11 = vadd.f32 %v1825_v7, %v4839_v31  ;;  %v1898_v28 = vmax.f32 %v1824_v13, 0.0 }
 0x22b   : > { %v1827_v5 = vpop.f32.mrf.mxu0 }
 0x22c   : > { %v1828_v43 = vadd.f32 %v1827_v5, %v4843_v35  ;;  %v1899_v34 = vmax.f32 %v1826_v11, 0.0 }
 0x22d   : > { %v1829_v15 = vpop.f32.mrf.mxu0 }
 0x22e   : > { %v1830_v44 = vadd.f32 %v1829_v15, %v4839_v31  ;;  %v1900_v27 = vmax.f32 %v1828_v43, 0.0 }
 0x230   : > { %v1901_v22 = vmax.f32 %v1830_v44, 0.0  ;;  %v1934_v61 = vpack.c.bf16 %v1900_v27, %v1898_v28 }
 0x231   : > { %v2839_v24 = vpop.f32.mrf.mxu1 }
 0x232   : > { %v1935_v55 = vpack.c.bf16 %v1901_v22, %v1899_v34 }
 0x233   : > { %v2840_v14 = vpop.f32.mrf.mxu1 }
 0x234   : > { %v2841_v57 = vadd.f32 %v2840_v14, %v2839_v24  ;;  %v1833_v63 = vpop.f32.mrf.mxu0  ;;  %2217 = vmatprep.mubr.bf16.mxu1 %v1935_v55 }
 0x235   : > { %v2842_v30 = vpop.f32.mrf.mxu1  ;;  %2218 = vmatmul.mubr.bf16.gmra.mxu1 %v1934_v61  ;;  %v1834_v45 = vadd.f32 %v1833_v63, %v4843_v35 }
 0x236   : > { %v4931_v3 = vadd.f32 %v2841_v57, %v4928_v52  ;;  %v1835_v50 = vpop.f32.mrf.mxu0 }
 0x237   : > { %v2843_v9 = vpop.f32.mrf.mxu1  ;;  %v1836_v33 = vadd.f32 %v1835_v50, %v4839_v31  ;;  %v1902_v60 = vmax.f32 %v1834_v45, 0.0 }
 0x238   : > { %v2785_v16 = vmul.f32 -1.442695, %v4931_v3  ;;  %v2844_v58 = vadd.f32 %v2843_v9, %v2842_v30  ;;  %v1837_v46 = vpop.f32.mrf.mxu0 }
 0x239   : > { %v1838_v18 = vadd.f32 %v1837_v46, %v4843_v35  ;;  %v1903_v54 = vmax.f32 %v1836_v33, 0.0 }
 0x23a   : > { %3588 = vpow2.f32 %v2785_v16  ;;  %v4938_v49 = vadd.f32 %v2844_v58, %v4928_v52  ;;  %v1839_v8 = vpop.f32.mrf.mxu0 }
 0x23b   : > { %v1840_v40 = vadd.f32 %v1839_v8, %v4839_v31  ;;  %v1904_v53 = vmax.f32 %v1838_v18, 0.0 }
 0x23c   : > { %v2786_v42 = vmul.f32 -1.442695, %v4938_v49 }
 0x23d   : > { %v1905_v41 = vmax.f32 %v1840_v40, 0.0  ;;  %v1936_v2 = vpack.c.bf16 %v1904_v53, %v1902_v60 }
 0x23e   : > { %3590 = vpow2.f32 %v2786_v42  ;;  %v2845_v39 = vpop.f32.mrf.mxu1 }
 0x23f   : > { %v1937_v56 = vpack.c.bf16 %v1905_v41, %v1903_v54 }
 0x240   : > { %v2846_v59 = vpop.f32.mrf.mxu1 }
 0x241   : > { %v2847_v17 = vadd.f32 %v2846_v59, %v2845_v39  ;;  %2225 = vmatprep.mubr.bf16.mxu1 %v1937_v56 }
 0x242   : > { %v2848_v35 = vpop.f32.mrf.mxu1  ;;  %2226 = vmatmul.mubr.bf16.gmra.mxu1 %v1936_v2 }
 0x243   : > { %v4943_v47 = vadd.f32 %v2847_v17, %v4928_v52 }
 0x244   : > { %v2849_v10 = vpop.f32.mrf.mxu1 }
 0x245   : > { %v2787_v31 = vmul.f32 -1.442695, %v4943_v47  ;;  %v2850_v38 = vadd.f32 %v2849_v10, %v2848_v35 }
 0x247   : > { %v3589_v36 = vpop.eup %3588  ;;  %3592 = vpow2.f32 %v2787_v31  ;;  %v4947_v48 = vadd.f32 %v2850_v38, %v4928_v52 }
 0x248   : > { %v2330_v1 = vadd.f32 1.0, %v3589_v36 }
 0x249   : > { %v2788_v20 = vmul.f32 -1.442695, %v4947_v48 }
 0x24a   : > { %3594 = vrcp.f32 %v2330_v1 }
 0x24b   : > { %v3591_v21 = vpop.eup %3590  ;;  %3596 = vpow2.f32 %v2788_v20 }
 0x24c   : > { %v2331_v37 = vadd.f32 1.0, %v3591_v21 }
 0x24d   : > { %v2851_v51 = vpop.f32.mrf.mxu1 }
 0x24e   : > { %3598 = vrcp.f32 %v2331_v37 }
 0x24f   : > { %v2852_v6 = vpop.f32.mrf.mxu1 }
 0x250   : > { %v2853_v62 = vadd.f32 %v2852_v6, %v2851_v51 }
 0x251   : > { %v2854_v23 = vpop.f32.mrf.mxu1 }
 0x252   : > { %v4951_v19 = vadd.f32 %v2853_v62, %v4928_v52 }
 0x253   : > { %v2855_v0 = vpop.f32.mrf.mxu1 }
 0x254   : > { %v3593_v32 = vpop.eup %3592  ;;  %v2789_v4 = vmul.f32 -1.442695, %v4951_v19  ;;  %v2856_v12 = vadd.f32 %v2855_v0, %v2854_v23 }
 0x255   : > { %v2332_v25 = vadd.f32 1.0, %v3593_v32 }
 0x256   : > { %3600 = vpow2.f32 %v2789_v4  ;;  %v4955_v26 = vadd.f32 %v2856_v12, %v4928_v52 }
 0x257   : > { %v3595_v29 = vpop.eup %3594  ;;  %3602 = vrcp.f32 %v2332_v25 }
 0x258   : > { %v3597_v7 = vpop.eup %3596  ;;  %v2790_v5 = vmul.f32 -1.442695, %v4955_v26  ;;  %2458 = vrot.lane.b32.xlu0 %v3595_v29, %s3807_s13 }
 0x259   : > { %v2333_v11 = vadd.f32 1.0, %v3597_v7 }
 0x25a   : > { %3604 = vpow2.f32 %v2790_v5  ;;  %v2857_v43 = vpop.f32.mrf.mxu1 }
 0x25b   : > { %v3599_v13 = vpop.eup %3598  ;;  %3606 = vrcp.f32 %v2333_v11 }
 0x25c   : > { %v2858_v15 = vpop.f32.mrf.mxu1  ;;  %2460 = vrot.lane.b32.xlu1 %v3599_v13, %s3807_s13 }
 0x25d   : > { %v2859_v44 = vadd.f32 %v2858_v15, %v2857_v43 }
 0x25e   : > { %v2860_v27 = vpop.f32.mrf.mxu1 }
 0x25f   : > { %v4961_v34 = vadd.f32 %v2859_v44, %v4928_v52 }
 0x260   : > { %v2861_v22 = vpop.f32.mrf.mxu1 }
 0x261   : > { %v2791_v28 = vmul.f32 -1.442695, %v4961_v34  ;;  %v2862_v24 = vadd.f32 %v2861_v22, %v2860_v27 }
 0x263   : > { %v3601_v55 = vpop.eup %3600  ;;  %3608 = vpow2.f32 %v2791_v28  ;;  %v4965_v61 = vadd.f32 %v2862_v24, %v4928_v52 }
 0x264   : > { %v3603_v14 = vpop.eup %3602  ;;  %v2334_v57 = vadd.f32 1.0, %v3601_v55 }
 0x265   : > { %v2792_v63 = vmul.f32 -1.442695, %v4965_v61  ;;  %2462 = vrot.lane.b32.xlu0 %v3603_v14, %s3807_s13 }
 0x266   : > { %3610 = vrcp.f32 %v2334_v57 }
 0x267   : > { %v3605_v30 = vpop.eup %3604  ;;  %3612 = vpow2.f32 %v2792_v63 }
 0x268   : > { %v3607_v50 = vpop.eup %3606  ;;  %v2335_v9 = vadd.f32 1.0, %v3605_v30 }
 0x269   : > { %v2863_v16 = vpop.f32.mrf.mxu1  ;;  %2464 = vrot.lane.b32.xlu1 %v3607_v50, %s3807_s13 }
 0x26a   : > { %3614 = vrcp.f32 %v2335_v9 }
 0x26b   : > { %v2864_v58 = vpop.f32.mrf.mxu1 }
 0x26c   : > { %v2865_v46 = vadd.f32 %v2864_v58, %v2863_v16 }
 0x26d   : > { %v2866_v33 = vpop.f32.mrf.mxu1 }
 0x26e   : > { %v4971_v18 = vadd.f32 %v2865_v46, %v4928_v52 }
 0x26f   : > { %v2867_v45 = vpop.f32.mrf.mxu1 }
 0x270   : > { %v3609_v8 = vpop.eup %3608  ;;  %v2793_v40 = vmul.f32 -1.442695, %v4971_v18  ;;  %v2868_v42 = vadd.f32 %v2867_v45, %v2866_v33 }
 0x271   : > { %v2336_v53 = vadd.f32 1.0, %v3609_v8 }
 0x272   : > { %3616 = vpow2.f32 %v2793_v40  ;;  %v4975_v54 = vadd.f32 %v2868_v42, %v4928_v52 }
 0x273   : > { %v3611_v41 = vpop.eup %3610  ;;  %3618 = vrcp.f32 %v2336_v53 }
 0x274   : > { %v3613_v60 = vpop.eup %3612  ;;  %v2794_v39 = vmul.f32 -1.442695, %v4975_v54  ;;  %2466 = vrot.lane.b32.xlu0 %v3611_v41, %s3807_s13 }
 0x275   : > { %v2337_v56 = vadd.f32 1.0, %v3613_v60 }
 0x276   : > { %3620 = vpow2.f32 %v2794_v39  ;;  %v2869_v2 = vpop.f32.mrf.mxu1 }
 0x277   : > { %v3615_v59 = vpop.eup %3614  ;;  %3622 = vrcp.f32 %v2337_v56 }
 0x278   : > { %v2870_v17 = vpop.f32.mrf.mxu1  ;;  %2468 = vrot.lane.b32.xlu1 %v3615_v59, %s3807_s13 }
 0x279   : > { %v2871_v35 = vadd.f32 %v2870_v17, %v2869_v2 }
 0x27a   : > { %v2872_v10 = vpop.f32.mrf.mxu1 }
 0x27b   : > { %v4981_v31 = vadd.f32 %v2871_v35, %v4928_v52 }
 0x27c   : > { %v2873_v38 = vpop.f32.mrf.mxu1 }
 0x27d   : > { %v2795_v36 = vmul.f32 -1.442695, %v4981_v31  ;;  %v2874_v1 = vadd.f32 %v2873_v38, %v2872_v10 }
 0x27f   : > { %v3617_v20 = vpop.eup %3616  ;;  %3624 = vpow2.f32 %v2795_v36  ;;  %v4985_v21 = vadd.f32 %v2874_v1, %v4928_v52 }
 0x280   : > { %v3619_v37 = vpop.eup %3618  ;;  %v2338_v51 = vadd.f32 1.0, %v3617_v20 }
 0x281   : > { %v2796_v6 = vmul.f32 -1.442695, %v4985_v21  ;;  %2470 = vrot.lane.b32.xlu0 %v3619_v37, %s3807_s13 }
 0x282   : > { %3626 = vrcp.f32 %v2338_v51 }
 0x283   : > { %v3621_v62 = vpop.eup %3620  ;;  %3628 = vpow2.f32 %v2796_v6 }
 0x284   : > { %v3623_v23 = vpop.eup %3622  ;;  %v2339_v0 = vadd.f32 1.0, %v3621_v62 }
 0x285   : > { %v2875_v32 = vpop.f32.mrf.mxu1  ;;  %2472 = vrot.lane.b32.xlu1 %v3623_v23, %s3807_s13 }
 0x286   : > { %3630 = vrcp.f32 %v2339_v0 }
 0x287   : > { %v2876_v4 = vpop.f32.mrf.mxu1 }
 0x288   : > { %v2877_v12 = vadd.f32 %v2876_v4, %v2875_v32 }
 0x289   : > { %v2878_v25 = vpop.f32.mrf.mxu1 }
 0x28a   : > { %v4991_v29 = vadd.f32 %v2877_v12, %v4928_v52 }
 0x28b   : > { %v2879_v7 = vpop.f32.mrf.mxu1 }
 0x28c   : > { %v3625_v5 = vpop.eup %3624  ;;  %v2797_v11 = vmul.f32 -1.442695, %v4991_v29  ;;  %v2880_v43 = vadd.f32 %v2879_v7, %v2878_v25 }
 0x28d   : > { %v2340_v13 = vadd.f32 1.0, %v3625_v5 }
 0x28e   : > { %3632 = vpow2.f32 %v2797_v11  ;;  %v4995_v15 = vadd.f32 %v2880_v43, %v4928_v52 }
 0x28f   : > { %v3627_v44 = vpop.eup %3626  ;;  %3634 = vrcp.f32 %v2340_v13 }
 0x290   : > { %v3629_v27 = vpop.eup %3628  ;;  %v2798_v22 = vmul.f32 -1.442695, %v4995_v15  ;;  %2474 = vrot.lane.b32.xlu0 %v3627_v44, %s3807_s13 }
 0x291   : > { %v2341_v28 = vadd.f32 1.0, %v3629_v27 }
 0x292   : > { %3636 = vpow2.f32 %v2798_v22  ;;  %v2881_v24 = vpop.f32.mrf.mxu1 }
 0x293   : > { %v3631_v55 = vpop.eup %3630  ;;  %3638 = vrcp.f32 %v2341_v28 }
 0x294   : > { %v2882_v14 = vpop.f32.mrf.mxu1  ;;  %2476 = vrot.lane.b32.xlu1 %v3631_v55, %s3807_s13 }
 0x295   : > { %v2883_v57 = vadd.f32 %v2882_v14, %v2881_v24 }
 0x296   : > { %v2884_v63 = vpop.f32.mrf.mxu1 }
 0x297   : > { %v5001_v30 = vadd.f32 %v2883_v57, %v4928_v52 }
 0x298   : > { %v2885_v50 = vpop.f32.mrf.mxu1 }
 0x299   : > { %v2799_v9 = vmul.f32 -1.442695, %v5001_v30  ;;  %v2886_v16 = vadd.f32 %v2885_v50, %v2884_v63 }
 0x29b   : > { %v3633_v58 = vpop.eup %3632  ;;  %3640 = vpow2.f32 %v2799_v9  ;;  %v5005_v46 = vadd.f32 %v2886_v16, %v4928_v52 }
 0x29c   : > { %v3635_v33 = vpop.eup %3634  ;;  %v2342_v45 = vadd.f32 1.0, %v3633_v58 }
 0x29d   : > { %v2800_v8 = vmul.f32 -1.442695, %v5005_v46  ;;  %2478 = vrot.lane.b32.xlu0 %v3635_v33, %s3807_s13 }
 0x29e   : > { %3642 = vrcp.f32 %v2342_v45 }
 0x29f   : > { %v3637_v40 = vpop.eup %3636  ;;  %3644 = vpow2.f32 %v2800_v8 }
 0x2a0   : > { %v3639_v42 = vpop.eup %3638  ;;  %v2343_v53 = vadd.f32 1.0, %v3637_v40 }
 0x2a1   : > { %v2887_v41 = vpop.f32.mrf.mxu1  ;;  %2480 = vrot.lane.b32.xlu1 %v3639_v42, %s3807_s13 }
 0x2a2   : > { %3646 = vrcp.f32 %v2343_v53 }
 0x2a3   : > { %v2888_v60 = vpop.f32.mrf.mxu1 }
 0x2a4   : > { %v2889_v39 = vadd.f32 %v2888_v60, %v2887_v41 }
 0x2a5   : > { %v2890_v56 = vpop.f32.mrf.mxu1 }
 0x2a6   : > { %v5011_v2 = vadd.f32 %v2889_v39, %v4928_v52 }
 0x2a7   : > { %v2891_v59 = vpop.f32.mrf.mxu1 }
 0x2a8   : > { %v3641_v17 = vpop.eup %3640  ;;  %v2801_v35 = vmul.f32 -1.442695, %v5011_v2  ;;  %v2892_v10 = vadd.f32 %v2891_v59, %v2890_v56 }
 0x2a9   : > { %v2344_v38 = vadd.f32 1.0, %v3641_v17 }
 0x2aa   : > { %3648 = vpow2.f32 %v2801_v35  ;;  %v5015_v36 = vadd.f32 %v2892_v10, %v4928_v52 }
 0x2ab   : > { %v3643_v1 = vpop.eup %3642  ;;  %3650 = vrcp.f32 %v2344_v38 }
 0x2ac   : > { %v3645_v20 = vpop.eup %3644  ;;  %v2802_v37 = vmul.f32 -1.442695, %v5015_v36  ;;  %2482 = vrot.lane.b32.xlu0 %v3643_v1, %s3807_s13 }
 0x2ad   : > { %v2345_v51 = vadd.f32 1.0, %v3645_v20 }
 0x2ae   : > { %3652 = vpow2.f32 %v2802_v37  ;;  %v2893_v6 = vpop.f32.mrf.mxu1 }
 0x2af   : > { %v3647_v62 = vpop.eup %3646  ;;  %3654 = vrcp.f32 %v2345_v51 }
 0x2b0   : > { %v2894_v23 = vpop.f32.mrf.mxu1  ;;  %2484 = vrot.lane.b32.xlu1 %v3647_v62, %s3807_s13 }
 0x2b1   : > { %v2895_v0 = vadd.f32 %v2894_v23, %v2893_v6 }
 0x2b2   : > { %v2896_v32 = vpop.f32.mrf.mxu1 }
 0x2b3   : > { %v5021_v4 = vadd.f32 %v2895_v0, %v4928_v52 }
 0x2b4   : > { %v2897_v12 = vpop.f32.mrf.mxu1 }
 0x2b5   : > { %v2803_v25 = vmul.f32 -1.442695, %v5021_v4  ;;  %v2898_v7 = vadd.f32 %v2897_v12, %v2896_v32 }
 0x2b7   : > { %v3649_v5 = vpop.eup %3648  ;;  %3656 = vpow2.f32 %v2803_v25  ;;  %v5025_v11 = vadd.f32 %v2898_v7, %v4928_v52 }
 0x2b8   : > { %v3651_v43 = vpop.eup %3650  ;;  %v2346_v13 = vadd.f32 1.0, %v3649_v5 }
 0x2b9   : > { %v2804_v44 = vmul.f32 -1.442695, %v5025_v11  ;;  %2486 = vrot.lane.b32.xlu0 %v3651_v43, %s3807_s13 }
 0x2ba   : > { %3658 = vrcp.f32 %v2346_v13 }
 0x2bb   : > { %v3653_v27 = vpop.eup %3652  ;;  %3660 = vpow2.f32 %v2804_v44 }
 0x2bc   : > { %v3655_v22 = vpop.eup %3654  ;;  %v2347_v28 = vadd.f32 1.0, %v3653_v27 }
 0x2bd   : > { %v2899_v24 = vpop.f32.mrf.mxu1  ;;  %2488 = vrot.lane.b32.xlu1 %v3655_v22, %s3807_s13 }
 0x2be   : > { %3662 = vrcp.f32 %v2347_v28 }
 0x2bf   : > { %v2900_v55 = vpop.f32.mrf.mxu1 }
 0x2c0   : > { %v2901_v14 = vadd.f32 %v2900_v55, %v2899_v24 }
 0x2c1   : > { %v2902_v57 = vpop.f32.mrf.mxu1 }
 0x2c2   : > { %v5031_v63 = vadd.f32 %v2901_v14, %v4928_v52 }
 0x2c3   : > { %v2903_v50 = vpop.f32.mrf.mxu1 }
 0x2c4   : > { %v3657_v9 = vpop.eup %3656  ;;  %v2805_v16 = vmul.f32 -1.442695, %v5031_v63  ;;  %v2904_v58 = vadd.f32 %v2903_v50, %v2902_v57 }
 0x2c5   : > { %v2348_v33 = vadd.f32 1.0, %v3657_v9 }
 0x2c6   : > { %3664 = vpow2.f32 %v2805_v16  ;;  %v5036_v45 = vadd.f32 %v2904_v58, %v4928_v52 }
 0x2c7   : > { %v3659_v8 = vpop.eup %3658  ;;  %3666 = vrcp.f32 %v2348_v33 }
 0x2c8   : > { %v3661_v40 = vpop.eup %3660  ;;  %v2806_v42 = vmul.f32 -1.442695, %v5036_v45  ;;  %2490 = vrot.lane.b32.xlu0 %v3659_v8, %s3807_s13 }
 0x2c9   : > { %v2349_v53 = vadd.f32 1.0, %v3661_v40 }
 0x2ca   : > { %3668 = vpow2.f32 %v2806_v42  ;;  %v2905_v41 = vpop.f32.mrf.mxu1  ;;  %v2459_v60 = vpop.permute.xlu0 %2458 }
 0x2cb   : > { %v3663_v39 = vpop.eup %3662  ;;  %3670 = vrcp.f32 %v2349_v53  ;;  %v2555_v56 = vsel %vm2554_vm9, %v4931_v3, %v2459_v60 }
 0x2cc   : > { %v2588_v59 = vsel %vm2587_vm10, %v2555_v56, %v4931_v3  ;;  %v2906_v17 = vpop.f32.mrf.mxu1  ;;  %2492 = vrot.lane.b32.xlu1 %v3663_v39, %s3807_s13 }
 0x2cd   : > { %2620 = vst [vmem:[%s5047_s16] sm:$0xff] %v2588_v59  ;;  %v2907_v35 = vadd.f32 %v2906_v17, %v2905_v41 }
 0x2ce   : > { %v2908_v10 = vpop.f32.mrf.mxu1  ;;  %v2461_v38 = vpop.permute.xlu1 %2460 }
 0x2cf   : > { %v5051_v1 = vadd.f32 %v2907_v35, %v4928_v52  ;;  %v2556_v20 = vsel %vm2554_vm9, %v4938_v49, %v2461_v38 }
 0x2d0   : > { %v2589_v3 = vsel %vm2587_vm10, %v2556_v20, %v4938_v49  ;;  %v2909_v37 = vpop.f32.mrf.mxu1 }
 0x2d1   : > { %v2807_v51 = vmul.f32 -1.442695, %v5051_v1  ;;  %2621 = vst [vmem:[%s5047_s16 + $0x8] sm:$0xff] %v2589_v3  ;;  %v2910_v6 = vadd.f32 %v2909_v37, %v2908_v10 }
 0x2d3   : > { %v3665_v62 = vpop.eup %3664  ;;  %3672 = vpow2.f32 %v2807_v51  ;;  %v5060_v23 = vadd.f32 %v2910_v6, %v4928_v52 }
 0x2d4   : > { %v3667_v0 = vpop.eup %3666  ;;  %v2350_v32 = vadd.f32 1.0, %v3665_v62 }
 0x2d5   : > { %v2808_v12 = vmul.f32 -1.442695, %v5060_v23  ;;  %2494 = vrot.lane.b32.xlu0 %v3667_v0, %s3807_s13 }
 0x2d6   : > { %3674 = vrcp.f32 %v2350_v32 }
 0x2d7   : > { %v3669_v25 = vpop.eup %3668  ;;  %3676 = vpow2.f32 %v2808_v12  ;;  %v2463_v49 = vpop.permute.xlu0 %2462 }
 0x2d8   : > { %v3671_v7 = vpop.eup %3670  ;;  %v2351_v5 = vadd.f32 1.0, %v3669_v25  ;;  %v2557_v43 = vsel %vm2554_vm9, %v4943_v47, %v2463_v49 }
 0x2d9   : > { %v2590_v13 = vsel %vm2587_vm10, %v2557_v43, %v4943_v47  ;;  %v2911_v44 = vpop.f32.mrf.mxu1  ;;  %2496 = vrot.lane.b32.xlu1 %v3671_v7, %s3807_s13 }
 0x2da   : > { %3678 = vrcp.f32 %v2351_v5  ;;  %2622 = vst [vmem:[%s5047_s16 + $0x10] sm:$0xff] %v2590_v13 }
 0x2db   : > { %v2912_v27 = vpop.f32.mrf.mxu1  ;;  %v2465_v22 = vpop.permute.xlu1 %2464 }
 0x2dc   : > { %v2913_v28 = vadd.f32 %v2912_v27, %v2911_v44  ;;  %v2558_v24 = vsel %vm2554_vm9, %v4947_v48, %v2465_v22 }
 0x2dd   : > { %v2591_v55 = vsel %vm2587_vm10, %v2558_v24, %v4947_v48  ;;  %v2914_v14 = vpop.f32.mrf.mxu1 }
 0x2de   : > { %v5075_v57 = vadd.f32 %v2913_v28, %v4928_v52  ;;  %2623 = vst [vmem:[%s5047_s16 + $0x18] sm:$0xff] %v2591_v55 }
 0x2df   : > { %v2915_v47 = vpop.f32.mrf.mxu1 }
 0x2e0   : > { %v3673_v50 = vpop.eup %3672  ;;  %v2809_v9 = vmul.f32 -1.442695, %v5075_v57  ;;  %v2916_v16 = vadd.f32 %v2915_v47, %v2914_v14 }
 0x2e1   : > { %v2352_v58 = vadd.f32 1.0, %v3673_v50 }
 0x2e2   : > { %3680 = vpow2.f32 %v2809_v9  ;;  %v5080_v33 = vadd.f32 %v2916_v16, %v4928_v52 }
 0x2e3   : > { %v3675_v8 = vpop.eup %3674  ;;  %3682 = vrcp.f32 %v2352_v58 }
 0x2e4   : > { %v3677_v40 = vpop.eup %3676  ;;  %v2810_v48 = vmul.f32 -1.442695, %v5080_v33  ;;  %2498 = vrot.lane.b32.xlu0 %v3675_v8, %s3807_s13 }
 0x2e5   : > { %v2353_v42 = vadd.f32 1.0, %v3677_v40 }
 0x2e6   : > { %3684 = vpow2.f32 %v2810_v48  ;;  %v2917_v53 = vpop.f32.mrf.mxu1  ;;  %v2467_v41 = vpop.permute.xlu0 %2466 }
 0x2e7   : > { %v3679_v60 = vpop.eup %3678  ;;  %3686 = vrcp.f32 %v2353_v42  ;;  %v2559_v39 = vsel %vm2554_vm9, %v4951_v19, %v2467_v41 }
 0x2e8   : > { %v2592_v56 = vsel %vm2587_vm10, %v2559_v39, %v4951_v19  ;;  %v2918_v59 = vpop.f32.mrf.mxu1  ;;  %2500 = vrot.lane.b32.xlu1 %v3679_v60, %s3807_s13 }
 0x2e9   : > { %2624 = vst [vmem:[%s5047_s16 + $0x20] sm:$0xff] %v2592_v56  ;;  %v2919_v17 = vadd.f32 %v2918_v59, %v2917_v53 }
 0x2ea   : > { %v2920_v35 = vpop.f32.mrf.mxu1  ;;  %v2469_v10 = vpop.permute.xlu1 %2468 }
 0x2eb   : > { %v5091_v38 = vadd.f32 %v2919_v17, %v4928_v52  ;;  %v2560_v20 = vsel %vm2554_vm9, %v4955_v26, %v2469_v10 }
 0x2ec   : > { %v2593_v3 = vsel %vm2587_vm10, %v2560_v20, %v4955_v26  ;;  %v2921_v37 = vpop.f32.mrf.mxu1 }
 0x2ed   : > { %v2811_v51 = vmul.f32 -1.442695, %v5091_v38  ;;  %2625 = vst [vmem:[%s5047_s16 + $0x28] sm:$0xff] %v2593_v3  ;;  %v2922_v19 = vadd.f32 %v2921_v37, %v2920_v35 }
 0x2ef   : > { %v3681_v6 = vpop.eup %3680  ;;  %3688 = vpow2.f32 %v2811_v51  ;;  %v5100_v62 = vadd.f32 %v2922_v19, %v4928_v52 }
 0x2f0   : > { %v3683_v0 = vpop.eup %3682  ;;  %v2354_v32 = vadd.f32 1.0, %v3681_v6 }
 0x2f1   : > { %v2812_v12 = vmul.f32 -1.442695, %v5100_v62  ;;  %2502 = vrot.lane.b32.xlu0 %v3683_v0, %s3807_s13 }
 0x2f2   : > { %3690 = vrcp.f32 %v2354_v32 }
 0x2f3   : > { %v3685_v25 = vpop.eup %3684  ;;  %3692 = vpow2.f32 %v2812_v12  ;;  %v2471_v26 = vpop.permute.xlu0 %2470 }
 0x2f4   : > { %v3687_v49 = vpop.eup %3686  ;;  %v2355_v7 = vadd.f32 1.0, %v3685_v25  ;;  %v2561_v5 = vsel %vm2554_vm9, %v4961_v34, %v2471_v26 }
 0x2f5   : > { %v2594_v43 = vsel %vm2587_vm10, %v2561_v5, %v4961_v34  ;;  %v2923_v13 = vpop.f32.mrf.mxu1  ;;  %2504 = vrot.lane.b32.xlu1 %v3687_v49, %s3807_s13 }
 0x2f6   : > { %3694 = vrcp.f32 %v2355_v7  ;;  %2626 = vst [vmem:[%s5047_s16 + $0x30] sm:$0xff] %v2594_v43 }
 0x2f7   : > { %v2924_v44 = vpop.f32.mrf.mxu1  ;;  %v2473_v27 = vpop.permute.xlu1 %2472 }
 0x2f8   : > { %v2925_v22 = vadd.f32 %v2924_v44, %v2923_v13  ;;  %v2562_v28 = vsel %vm2554_vm9, %v4965_v61, %v2473_v27 }
 0x2f9   : > { %v2595_v24 = vsel %vm2587_vm10, %v2562_v28, %v4965_v61  ;;  %v2926_v55 = vpop.f32.mrf.mxu1 }
 0x2fa   : > { %v5115_v14 = vadd.f32 %v2925_v22, %v4928_v52  ;;  %2627 = vst [vmem:[%s5047_s16 + $0x38] sm:$0xff] %v2595_v24 }
 0x2fb   : > { %v2927_v34 = vpop.f32.mrf.mxu1 }
 0x2fc   : > { %v3689_v47 = vpop.eup %3688  ;;  %v2813_v50 = vmul.f32 -1.442695, %v5115_v14  ;;  %v2928_v9 = vadd.f32 %v2927_v34, %v2926_v55 }
 0x2fd   : > { %v2356_v16 = vadd.f32 1.0, %v3689_v47 }
 0x2fe   : > { %3696 = vpow2.f32 %v2813_v50  ;;  %v5120_v58 = vadd.f32 %v2928_v9, %v4928_v52 }
 0x2ff   : > { %v3691_v8 = vpop.eup %3690  ;;  %3698 = vrcp.f32 %v2356_v16 }
 0x300   : > { %v3693_v40 = vpop.eup %3692  ;;  %v2814_v61 = vmul.f32 -1.442695, %v5120_v58  ;;  %2506 = vrot.lane.b32.xlu0 %v3691_v8, %s3807_s13 }
 0x301   : > { %v2357_v48 = vadd.f32 1.0, %v3693_v40 }
 0x302   : > { %3700 = vpow2.f32 %v2814_v61  ;;  %v2929_v42 = vpop.f32.mrf.mxu1  ;;  %v2475_v53 = vpop.permute.xlu0 %2474 }
 0x303   : > { %v3695_v41 = vpop.eup %3694  ;;  %3702 = vrcp.f32 %v2357_v48  ;;  %v2563_v60 = vsel %vm2554_vm9, %v4971_v18, %v2475_v53 }
 0x304   : > { %v2596_v39 = vsel %vm2587_vm10, %v2563_v60, %v4971_v18  ;;  %v2930_v56 = vpop.f32.mrf.mxu1  ;;  %2508 = vrot.lane.b32.xlu1 %v3695_v41, %s3807_s13 }
 0x305   : > { %2628 = vst [vmem:[%s5047_s16 + $0x40] sm:$0xff] %v2596_v39  ;;  %v2931_v59 = vadd.f32 %v2930_v56, %v2929_v42 }
 0x306   : > { %v2932_v17 = vpop.f32.mrf.mxu1  ;;  %v2477_v35 = vpop.permute.xlu1 %2476 }
 0x307   : > { %v5131_v10 = vadd.f32 %v2931_v59, %v4928_v52  ;;  %v2564_v20 = vsel %vm2554_vm9, %v4975_v54, %v2477_v35 }
 0x308   : > { %v2597_v3 = vsel %vm2587_vm10, %v2564_v20, %v4975_v54  ;;  %v2933_v37 = vpop.f32.mrf.mxu1 }
 0x309   : > { %v2815_v51 = vmul.f32 -1.442695, %v5131_v10  ;;  %2629 = vst [vmem:[%s5047_s16 + $0x48] sm:$0xff] %v2597_v3  ;;  %v2934_v18 = vadd.f32 %v2933_v37, %v2932_v17 }
 0x30b   : > { %v3697_v19 = vpop.eup %3696  ;;  %3704 = vpow2.f32 %v2815_v51  ;;  %v5140_v6 = vadd.f32 %v2934_v18, %v4928_v52 }
 0x30c   : > { %v3699_v0 = vpop.eup %3698  ;;  %v2358_v32 = vadd.f32 1.0, %v3697_v19 }
 0x30d   : > { %v2816_v12 = vmul.f32 -1.442695, %v5140_v6  ;;  %2510 = vrot.lane.b32.xlu0 %v3699_v0, %s3807_s13 }
 0x30e   : > { %3706 = vrcp.f32 %v2358_v32 }
 0x30f   : > { %v3701_v54 = vpop.eup %3700  ;;  %3708 = vpow2.f32 %v2816_v12  ;;  %v2479_v25 = vpop.permute.xlu0 %2478 }
 0x310   : > { %v3703_v26 = vpop.eup %3702  ;;  %v2359_v49 = vadd.f32 1.0, %v3701_v54  ;;  %v2565_v7 = vsel %vm2554_vm9, %v4981_v31, %v2479_v25 }
 0x311   : > { %v2598_v52 = vsel %vm2587_vm10, %v2565_v7, %v4981_v31  ;;  %2512 = vrot.lane.b32.xlu1 %v3703_v26, %s3807_s13 }
 0x312   : > { %3710 = vrcp.f32 %v2359_v49  ;;  %2630 = vst [vmem:[%s5047_s16 + $0x50] sm:$0xff] %v2598_v52 }
 0x313   : > { %v2481_v5 = vpop.permute.xlu1 %2480 }
 0x314   : > { %v2566_v43 = vsel %vm2554_vm9, %v4985_v21, %v2481_v5 }
 0x315   : > { %v2599_v13 = vsel %vm2587_vm10, %v2566_v43, %v4985_v21 }
 0x316   : > { %2631 = vst [vmem:[%s5047_s16 + $0x58] sm:$0xff] %v2599_v13 }
 0x318   : > { %v3705_v44 = vpop.eup %3704 }
 0x319   : > { %v2360_v27 = vadd.f32 1.0, %v3705_v44 }
 0x31b   : > { %v3707_v22 = vpop.eup %3706  ;;  %3712 = vrcp.f32 %v2360_v27 }
 0x31c   : > { %v3709_v28 = vpop.eup %3708  ;;  %2514 = vrot.lane.b32.xlu0 %v3707_v22, %s3807_s13 }
 0x31d   : > { %v2361_v31 = vadd.f32 1.0, %v3709_v28 }
 0x31e   : > { %v2483_v24 = vpop.permute.xlu0 %2482 }
 0x31f   : > { %v3711_v55 = vpop.eup %3710  ;;  %3714 = vrcp.f32 %v2361_v31  ;;  %v2567_v34 = vsel %vm2554_vm9, %v4991_v29, %v2483_v24 }
 0x320   : > { %v2600_v21 = vsel %vm2587_vm10, %v2567_v34, %v4991_v29  ;;  %2516 = vrot.lane.b32.xlu1 %v3711_v55, %s3807_s13 }
 0x321   : > { %2632 = vst [vmem:[%s5047_s16 + $0x60] sm:$0xff] %v2600_v21 }
 0x322   : > { %v2485_v47 = vpop.permute.xlu1 %2484 }
 0x323   : > { %v2568_v50 = vsel %vm2554_vm9, %v4995_v15, %v2485_v47 }
 0x324   : > { %v2601_v9 = vsel %vm2587_vm10, %v2568_v50, %v4995_v15 }
 0x325   : > { %2633 = vst [vmem:[%s5047_s16 + $0x68] sm:$0xff] %v2601_v9 }
 0x328   : > { %v3713_v16 = vpop.eup %3712 }
 0x329   : > { %2518 = vrot.lane.b32.xlu0 %v3713_v16, %s3807_s13 }
 0x32b   : > { %v2487_v8 = vpop.permute.xlu0 %2486 }
 0x32c   : > { %v3715_v40 = vpop.eup %3714  ;;  %v2569_v29 = vsel %vm2554_vm9, %v5001_v30, %v2487_v8 }
 0x32d   : > { %v2602_v61 = vsel %vm2587_vm10, %v2569_v29, %v5001_v30  ;;  %2520 = vrot.lane.b32.xlu1 %v3715_v40, %s3807_s13 }
 0x32e   : > { %2634 = vst [vmem:[%s5047_s16 + $0x70] sm:$0xff] %v2602_v61 }
 0x32f   : > { %v2489_v48 = vpop.permute.xlu1 %2488 }
 0x330   : > { %v2570_v15 = vsel %vm2554_vm9, %v5005_v46, %v2489_v48 }
 0x331   : > { %v2603_v42 = vsel %vm2587_vm10, %v2570_v15, %v5005_v46 }
 0x332   : > { %2635 = vst [vmem:[%s5047_s16 + $0x78] sm:$0xff] %v2603_v42 }
 0x33a   : > { %v2491_v53 = vpop.permute.xlu0 %2490 }
 0x33b   : > { %v2571_v41 = vsel %vm2554_vm9, %v5011_v2, %v2491_v53 }
 0x33c   : > { %v2604_v30 = vsel %vm2587_vm10, %v2571_v41, %v5011_v2 }
 0x33d   : > { %2636 = vst [vmem:[%s5047_s16 + $0x80] sm:$0xff] %v2604_v30 }
 0x33e   : > { %v2493_v60 = vpop.permute.xlu1 %2492 }
 0x33f   : > { %v2572_v39 = vsel %vm2554_vm9, %v5015_v36, %v2493_v60 }
 0x340   : > { %v2605_v56 = vsel %vm2587_vm10, %v2572_v39, %v5015_v36 }
 0x341   : > { %2637 = vst [vmem:[%s5047_s16 + $0x88] sm:$0xff] %v2605_v56 }
 0x347   : > { %v2495_v46 = vpop.permute.xlu0 %2494 }
 0x348   : > { %v2573_v59 = vsel %vm2554_vm9, %v5021_v4, %v2495_v46 }
 0x349   : > { %v2606_v17 = vsel %vm2587_vm10, %v2573_v59, %v5021_v4 }
 0x34a   : > { %2638 = vst [vmem:[%s5047_s16 + $0x90] sm:$0xff] %v2606_v17 }
 0x34b   : > { %v2497_v2 = vpop.permute.xlu1 %2496 }
 0x34c   : > { %v2574_v35 = vsel %vm2554_vm9, %v5025_v11, %v2497_v2 }
 0x34d   : > { %v2607_v20 = vsel %vm2587_vm10, %v2574_v35, %v5025_v11 }
 0x34e   : > { %2639 = vst [vmem:[%s5047_s16 + $0x98] sm:$0xff] %v2607_v20 }
 0x356   : > { %v2499_v36 = vpop.permute.xlu0 %2498 }
 0x357   : > { %v2575_v3 = vsel %vm2554_vm9, %v5031_v63, %v2499_v36 }
 0x358   : > { %v2608_v37 = vsel %vm2587_vm10, %v2575_v3, %v5031_v63 }
 0x359   : > { %2640 = vst [vmem:[%s5047_s16 + $0xa0] sm:$0xff] %v2608_v37 }
 0x35a   : > { %v2501_v4 = vpop.permute.xlu1 %2500 }
 0x35b   : > { %v2576_v51 = vsel %vm2554_vm9, %v5036_v45, %v2501_v4 }
 0x35c   : > { %v2609_v18 = vsel %vm2587_vm10, %v2576_v51, %v5036_v45 }
 0x35d   : > { %2641 = vst [vmem:[%s5047_s16 + $0xa8] sm:$0xff] %v2609_v18 }
 0x363   : > { %v2503_v11 = vpop.permute.xlu0 %2502 }
 0x364   : > { %v2577_v19 = vsel %vm2554_vm9, %v5051_v1, %v2503_v11 }
 0x365   : > { %v2610_v0 = vsel %vm2587_vm10, %v2577_v19, %v5051_v1 }
 0x366   : > { %2642 = vst [vmem:[%s5047_s16 + $0xb0] sm:$0xff] %v2610_v0 }
 0x367   : > { %v2505_v63 = vpop.permute.xlu1 %2504 }
 0x368   : > { %v2578_v32 = vsel %vm2554_vm9, %v5060_v23, %v2505_v63 }
 0x369   : > { %v2611_v12 = vsel %vm2587_vm10, %v2578_v32, %v5060_v23 }
 0x36a   : > { %2643 = vst [vmem:[%s5047_s16 + $0xb8] sm:$0xff] %v2611_v12 }
 0x372   : > { %v2507_v45 = vpop.permute.xlu0 %2506 }
 0x373   : > { %v2579_v54 = vsel %vm2554_vm9, %v5075_v57, %v2507_v45 }
 0x374   : > { %v2612_v25 = vsel %vm2587_vm10, %v2579_v54, %v5075_v57 }
 0x375   : > { %2644 = vst [vmem:[%s5047_s16 + $0xc0] sm:$0xff] %v2612_v25 }
 0x376   : > { %v2509_v1 = vpop.permute.xlu1 %2508 }
 0x377   : > { %v2580_v26 = vsel %vm2554_vm9, %v5080_v33, %v2509_v1 }
 0x378   : > { %v2613_v49 = vsel %vm2587_vm10, %v2580_v26, %v5080_v33 }
 0x379   : > { %2645 = vst [vmem:[%s5047_s16 + $0xc8] sm:$0xff] %v2613_v49 }
 0x37f   : > { %v2511_v23 = vpop.permute.xlu0 %2510 }
 0x380   : > { %v2581_v7 = vsel %vm2554_vm9, %v5091_v38, %v2511_v23 }
 0x381   : > { %v2614_v52 = vsel %vm2587_vm10, %v2581_v7, %v5091_v38 }
 0x382   : > { %2646 = vst [vmem:[%s5047_s16 + $0xd0] sm:$0xff] %v2614_v52 }
 0x383   : > { %v2513_v57 = vpop.permute.xlu1 %2512 }
 0x384   : > { %v2582_v5 = vsel %vm2554_vm9, %v5100_v62, %v2513_v57 }
 0x385   : > { %v2615_v33 = vsel %vm2587_vm10, %v2582_v5, %v5100_v62 }
 0x386   : > { %2647 = vst [vmem:[%s5047_s16 + $0xd8] sm:$0xff] %v2615_v33 }
 0x38e   : > { %v2515_v43 = vpop.permute.xlu0 %2514 }
 0x38f   : > { %v2583_v13 = vsel %vm2554_vm9, %v5115_v14, %v2515_v43 }
 0x390   : > { %v2616_v44 = vsel %vm2587_vm10, %v2583_v13, %v5115_v14 }
 0x391   : > { %2648 = vst [vmem:[%s5047_s16 + $0xe0] sm:$0xff] %v2616_v44 }
 0x392   : > { %v2517_v38 = vpop.permute.xlu1 %2516 }
 0x393   : > { %v2584_v27 = vsel %vm2554_vm9, %v5120_v58, %v2517_v38 }
 0x394   : > { %v2617_v22 = vsel %vm2587_vm10, %v2584_v27, %v5120_v58 }
 0x395   : > { %2649 = vst [vmem:[%s5047_s16 + $0xe8] sm:$0xff] %v2617_v22 }
 0x39b   : > { %v2519_v62 = vpop.permute.xlu0 %2518 }
 0x39c   : > { %v2585_v28 = vsel %vm2554_vm9, %v5131_v10, %v2519_v62 }
 0x39d   : > { %v2618_v14 = vsel %vm2587_vm10, %v2585_v28, %v5131_v10 }
 0x39e   : > { %2650 = vst [vmem:[%s5047_s16 + $0xf0] sm:$0xff] %v2618_v14 }
 0x39f   : > { %v2521_v31 = vpop.permute.xlu1 %2520 }
 0x3a0   : > { %v2586_v58 = vsel %vm2554_vm9, %v5140_v6, %v2521_v31 }
 0x3a1   : > { %v2619_v24 = vsel %vm2587_vm10, %v2586_v58, %v5140_v6 }
 0x3a2   : > { %2651 = vst [vmem:[%s5047_s16 + $0xf8] sm:$0xff] %v2619_v24 }
 0x3a3   : > { %3751 = shalt.err (!%p3748_p3)
}
 0x3a4   : > { %s3752_s11 = scalar_lea.hbm %s5259_s10, 4096  ;;  %s3756_s13 = scalar_lea.hbm %s5315_s5, 8192 }
 0x3a5   : > { %p3753_p4 = scmp.ne.s32.totalorder %s5259_s10, %s3752_s11  ;;  %p3757_p9 = scmp.lt.s32.totalorder %s5259_s10, %s5315_s5 }
 0x3a6   : > { %p3758_p10 = scmp.lt.s32.totalorder %s3756_s13, %s3752_s11 }
 0x3a7   : > { %p3754_p7 = pnand %p3753_p4, %p3879_p5 }
 0x3a8   : > { %p3759_p11 = por %p3758_p10, %p3757_p9 }
 0x3a9   : > { %p3755_p8 = pneg %p3754_p7 }
 0x3ab   : > { %p3760_p12 = pnand %p3759_p11, %p3755_p8 }
 0x3ad   : > { %3763 = shalt.err (!%p3760_p12)
}
 0x3ae   : > { %s3809_s16 = smov 128   ;;  %s3810_s26 = smov 8  }
 0x3af   : > { %2936 = dma.vmem_to_hbm [thread:$0]  (%p3879_p5), %s5261_s30, 4096, %s5259_s10, %s5270_s22, %s3809_s16, %s3809_s16, %s3810_s26  }
 0x3b0 PF: > { %p2942_p13 = scmp.ge.s32.totalorder %s3798_s21, 2  ;;  %s2681_s7 = sand.u32 1, %s3786_s18  }
 0x3b1   : > { %s2682_s9 = scalar_lea.sflag [#allocation3], %s2681_s7 }
 0x3b2   : > { %p2939_p0 = pnand %p2942_p13, %p3883_p6 }
 0x3b4   : > { %p2940_p1 = pneg %p2939_p0 }
 0x3b6   : > { %3781 = dma.done.wait (%p2940_p1), %s2682_s9, 4096  }
 0x3b7   : > { %3783 = vsyncadd (%p2940_p1), %s2682_s9, 4294963200  ;;  %p15_p2 = scmp.ge.s32.totalorder %s3866_s24, 4   ;;  %s5318_s18 = smov %s3790_s19 }
 0x3b8   : > { %s5319_s19 = smov %s3794_s20  ;;  %s5320_s20 = smov %s3877_s27 }
 0x3b9   : > { %s5321_s21 = smov %s3866_s24  ;;  %17 = sbr.rel (!%p15_p2) target bundleno = 3 (0x3), region = 75 }
 0x3be   :  { %2687 = vsyncpa [#allocation3], 1 }
 0x3bf   :  { %2689 = vsyncpa [#allocation3 + $0x1], 1 }

</bundles_post_ra>
